<compile_context>
chip_gen: v6e
topology: v6e:2x2x1
jax: 0.10.0
libtpu: 0.0.40
codegen_flags: <defaults>
</compile_context>

<pallas_src>
import functools

import jax
import jax.numpy as jnp
from jax.experimental import pallas as pl
from jax.experimental.pallas import tpu as pltpu

RES = 224                 # params['vit_b16']['resolution']
CROP_LO, CROP_HI = 20, 204
CROP = CROP_HI - CROP_LO  # 184
PATCH = 16
GRID14 = RES // PATCH     # 14
L = GRID14 * GRID14       # 196 tokens


# ----------------------------------------------------------------------------
# helpers (plain JAX glue)
# ----------------------------------------------------------------------------
def _interp_matrix(h_in, h_out):
    """Bilinear interpolation matrix (h_out, h_in) with align_corners=True
    (matches torch F.interpolate(..., mode='bilinear', align_corners=True))."""
    o = jnp.arange(h_out, dtype=jnp.float32)
    src = o * (h_in - 1) / (h_out - 1)
    i0 = jnp.clip(jnp.floor(src).astype(jnp.int32), 0, h_in - 1)
    i1 = jnp.clip(i0 + 1, 0, h_in - 1)
    w1 = src - i0.astype(jnp.float32)
    w0 = 1.0 - w1
    return (jax.nn.one_hot(i0, h_in, dtype=jnp.float32) * w0[:, None]
            + jax.nn.one_hot(i1, h_in, dtype=jnp.float32) * w1[:, None])


def _crop_interp_matrix():
    """(224, 224) matrix = bilinear 184->224 resize with the 20:204 crop folded
    in (columns outside 20..203 are zero), align_corners=True."""
    a = _interp_matrix(CROP, RES)                                  # (224, 184)
    return jnp.zeros((RES, RES), jnp.float32).at[:, CROP_LO:CROP_HI].set(a)


# ----------------------------------------------------------------------------
# Pallas kernels
# ----------------------------------------------------------------------------
def _resize_kernel(a_ref, img_ref, out_ref, *, n_ch):
    # a_ref  : (224, 224) bf16 crop+interp matrix (zero cols outside the crop)
    # img_ref: (1, n_ch*224, 224) f32 -- one view, channels collapsed on sublanes
    # out_ref: (1, n_ch, 224, 224) bf16
    a = a_ref[...]
    x = img_ref[0].astype(jnp.bfloat16)                    # (n_ch*224, 224)
    # Width crop+resize for ALL channels in one MXU matmul; contracting the
    # lane axis of x against axis 1 of `a` is the transposed product, so a
    # second (transposed) constant input is not needed.
    tmp = jax.lax.dot_general(
        x, a, (((1,), (1,)), ((), ())),
        preferred_element_type=jnp.float32)                # (n_ch*224, 224)
    tmp = tmp.astype(jnp.bfloat16)
    for c in range(n_ch):                                  # static, tiny (3)
        # Height crop+resize per channel: (224,224) @ (224,224).
        out_ref[0, c] = jnp.dot(
            a, tmp[c * RES:(c + 1) * RES, :],
            preferred_element_type=jnp.float32).astype(out_ref.dtype)


def bilinear_resize_224(raw_img):
    """raw_img: (V, C, 224, 224) f32 -> crop[20:204, 20:204] + bilinear resize
    to (V, C, 224, 224) bf16, align_corners=True (crop folded into matmuls)."""
    V, Cimg = raw_img.shape[0], raw_img.shape[1]
    a_fold = _crop_interp_matrix().astype(jnp.bfloat16)    # (224, 224)
    img_flat = raw_img.reshape(V, Cimg * RES, RES)         # free metadata reshape
    return pl.pallas_call(
        functools.partial(_resize_kernel, n_ch=Cimg),
        out_shape=jax.ShapeDtypeStruct((V, Cimg, RES, RES), jnp.bfloat16),
        grid=(V,),
        in_specs=[
            pl.BlockSpec((RES, RES), lambda v: (0, 0)),
            pl.BlockSpec((1, Cimg * RES, RES), lambda v: (v, 0, 0)),
        ],
        out_specs=pl.BlockSpec((1, Cimg, RES, RES), lambda v: (v, 0, 0, 0)),
        compiler_params=pltpu.CompilerParams(
            dimension_semantics=("parallel",)),
    )(a_fold, img_flat)


def _embed_norm_kernel(x_ref, w_ref, b_ref, out_ref):
    # patch-embedding matmul (bf16 MXU, f32 accum) then x / ||x||_2 (last dim)
    y = jnp.dot(x_ref[0], w_ref[...], preferred_element_type=jnp.float32)
    y = y + b_ref[...]
    ssq = jnp.sum(y * y, axis=-1, keepdims=True)
    # floor == F.normalize semantics; differs from bare x / x.norm() only for
    # exactly-zero rows (0 here vs NaN there).
    out_ref[0] = y * jax.lax.rsqrt(jnp.maximum(ssq, 1e-24))


def embed_and_normalize(patches, w, b):
    """patches: (V, 196, D) bf16 -> L2-normalized features (V, 196, C) f32.
    grid=(V,) parallel: both v7x TensorCores used, LHS DMA pipelined; w/b have
    constant index maps so they are staged once."""
    V, Ltok, D = patches.shape
    C = w.shape[-1]
    return pl.pallas_call(
        _embed_norm_kernel,
        out_shape=jax.ShapeDtypeStruct((V, Ltok, C), jnp.float32),
        grid=(V,),
        in_specs=[
            pl.BlockSpec((1, Ltok, D), lambda v: (v, 0, 0)),
            pl.BlockSpec((D, C), lambda v: (0, 0)),
            pl.BlockSpec((1, C), lambda v: (0, 0)),
        ],
        out_specs=pl.BlockSpec((1, Ltok, C), lambda v: (v, 0, 0)),
        compiler_params=pltpu.CompilerParams(
            dimension_semantics=("parallel",)),
    )(patches, w, b)


# ----------------------------------------------------------------------------
# Extractor.forward equivalent
# ----------------------------------------------------------------------------
def extractor_forward(pc, raw_img, is_seen, point_loc_in_img, w_embed, b_embed):
    del pc  # TODO(synk): RealisticProjection.get_img (point cloud -> multi-view
    #         depth images, is_seen, point locations) is not provided in the
    #         module source; its outputs (raw_img, is_seen, point_loc_in_img)
    #         are passed in as synthesized inputs instead.

    # ---- mv_proj ----
    point_loc = jnp.ceil((point_loc_in_img - 20.0) * 224.0 / 184.0)
    img224 = bilinear_resize_224(raw_img)            # (V, C, 224, 224) bf16

    # ---- encoder + feature post-processing ----
    # TODO(synk): self.model = CLIP ViT-B/16 encode_image is an external
    # pretrained network; it is replaced by its first stage (16x16 patch-embed
    # matmul) with deterministic synthetic weights so the downstream (B,196,C)
    # token semantics are preserved.
    V, Cimg = img224.shape[0], img224.shape[1]
    patches = img224.reshape(V, Cimg, GRID14, PATCH, GRID14, PATCH)
    patches = patches.transpose(0, 2, 4, 1, 3, 5).reshape(
        V, L, Cimg * PATCH * PATCH)                  # bf16 intermediate
    x = embed_and_normalize(patches, w_embed.astype(jnp.bfloat16),
                            b_embed)                 # (V, 196, C) f32

    C = x.shape[-1]
    # kept as (B, C, 14, 14) to match the original module's output layout.
    feat = x.reshape(V, GRID14, GRID14, C).transpose(0, 3, 1, 2)
    return is_seen, point_loc, feat


# ----------------------------------------------------------------------------
if __name__ == "__main__":
    key = jax.random.PRNGKey(0)
    k1, k2, k3, k4, k5 = jax.random.split(key, 5)

    V, Cimg, N, Cfeat = 2, 3, 64, 128

    pc = jax.random.normal(k1, (V, N, 3), dtype=jnp.float32)
    raw_img = jax.random.uniform(k2, (V, Cimg, RES, RES), dtype=jnp.float32)
    is_seen = (jax.random.uniform(k3, (V, N)) > 0.5).astype(jnp.float32)
    point_loc_in_img = jax.random.uniform(
        k4, (V, N, 2), dtype=jnp.float32, minval=20.0, maxval=204.0)

    w_embed = jax.random.normal(
        k5, (Cimg * PATCH * PATCH, Cfeat), dtype=jnp.float32) * 0.02
    b_embed = jnp.zeros((1, Cfeat), dtype=jnp.float32)

    fwd = jax.jit(extractor_forward)
    is_seen_o, ploc_o, feat_o = fwd(pc, raw_img, is_seen,
                                    point_loc_in_img, w_embed, b_embed)
    jax.block_until_ready((is_seen_o, ploc_o, feat_o))

    # shapes
    assert feat_o.shape == (V, Cfeat, GRID14, GRID14)
    assert ploc_o.shape == (V, N, 2)

    # point_loc semantics: ceil((p - 20) * 224 / 184)
    ref_ploc = jnp.ceil((point_loc_in_img - 20.0) * 224.0 / 184.0)
    assert bool(jnp.all(ploc_o == ref_ploc))

    # features are L2-normalized along the channel axis
    norms = jnp.sqrt(jnp.sum(feat_o * feat_o, axis=1))
    assert bool(jnp.all(jnp.abs(norms - 1.0) < 1e-3))

    # value check vs a pure-JAX fp32 reference (bf16 MXU path => loose tol)
    hi = jax.lax.Precision.HIGHEST
    a_m = _interp_matrix(CROP, RES)                                 # (224, 184)
    crop = raw_img[:, :, CROP_LO:CROP_HI, CROP_LO:CROP_HI]
    img_ref = jnp.einsum('oh,vchw,pw->vcop', a_m, crop, a_m, precision=hi)
    p_ref = img_ref.reshape(V, Cimg, GRID14, PATCH, GRID14, PATCH)
    p_ref = p_ref.transpose(0, 2, 4, 1, 3, 5).reshape(V * L,
                                                      Cimg * PATCH * PATCH)
    y_ref = jnp.matmul(p_ref, w_embed, precision=hi) + b_embed
    y_ref = y_ref / jnp.linalg.norm(y_ref, axis=-1, keepdims=True)
    feat_ref = y_ref.reshape(V, GRID14, GRID14, Cfeat).transpose(0, 3, 1, 2)
    max_err = float(jnp.max(jnp.abs(feat_o - feat_ref)))
    assert max_err < 0.05, max_err

    print("KERNEL_OK")
</pallas_src>

<mosaic_0001>
module attributes {stable_mosaic.version = 11 : i64} {
  func.func @_resize_kernel(%arg0: i32, %arg1: memref<224x224xbf16, #tpu.memory_space<vmem>>, %arg2: memref<1x672x224xf32, #tpu.memory_space<vmem>>, %arg3: memref<1x3x224x224xbf16, #tpu.memory_space<vmem>>) attributes {dimension_semantics = [#tpu.dimension_semantics<parallel>], iteration_bounds = array<i64: 2>, scalar_prefetch = 0 : i64, scratch_operands = 0 : i64, tpu.core_type = #tpu.core_type<tc>, window_params = [{pipeline_mode = #tpu.pipeline_mode<synchronous>, transform_indices = @transform_0, window_bounds = array<i64: 224, 224>}, {transform_indices = @transform_1, window_bounds = array<i64: 1, 672, 224>}, {transform_indices = @transform_2, window_bounds = array<i64: 1, 3, 224, 224>}]} {
    %c0 = arith.constant 0 : index
    %c0_0 = arith.constant 0 : index
    %0 = vector.load %arg1[%c0, %c0_0] : memref<224x224xbf16, #tpu.memory_space<vmem>>, vector<224x224xbf16>
    %c0_1 = arith.constant 0 : index
    %c0_2 = arith.constant 0 : index
    %c0_3 = arith.constant 0 : index
    %1 = vector.load %arg2[%c0_1, %c0_2, %c0_3] : memref<1x672x224xf32, #tpu.memory_space<vmem>>, vector<1x672x224xf32>
    %2 = vector.shape_cast %1 : vector<1x672x224xf32> to vector<672x224xf32>
    %3 = arith.truncf %2 : vector<672x224xf32> to vector<672x224xbf16>
    %cst = arith.constant dense<0.000000e+00> : vector<672x224xf32>
    %4 = tpu.matmul %3, %0, %cst {dimension_numbers = #tpu.dot_dimension_numbers<[1], [1], [0], [0], [0, 0, 1, 0], [], []>} : vector<672x224xbf16>, vector<224x224xbf16>, vector<672x224xf32> -> vector<672x224xf32>
    %5 = arith.truncf %4 : vector<672x224xf32> to vector<672x224xbf16>
    %6 = vector.extract_strided_slice %5 {offsets = [0, 0], sizes = [224, 224], strides = [1, 1]} : vector<672x224xbf16> to vector<224x224xbf16>
    %cst_4 = arith.constant dense<0.000000e+00> : vector<224x224xf32>
    %7 = tpu.matmul %0, %6, %cst_4 {dimension_numbers = #tpu.dot_dimension_numbers<[1], [0], [0], [1], [0, 0, 1, 1], [], []>} : vector<224x224xbf16>, vector<224x224xbf16>, vector<224x224xf32> -> vector<224x224xf32>
    %8 = arith.truncf %7 : vector<224x224xf32> to vector<224x224xbf16>
    %c0_5 = arith.constant 0 : index
    %c0_6 = arith.constant 0 : index
    %c0_7 = arith.constant 0 : index
    %c0_8 = arith.constant 0 : index
    %9 = vector.load %arg3[%c0_5, %c0_6, %c0_7, %c0_8] : memref<1x3x224x224xbf16, #tpu.memory_space<vmem>>, vector<1x1x224x224xbf16>
    %10 = vector.shape_cast %9 : vector<1x1x224x224xbf16> to vector<224x224xbf16>
    %11 = vector.shape_cast %8 : vector<224x224xbf16> to vector<1x1x224x224xbf16>
    tpu.vector_store %arg3[%c0_5, %c0_6, %c0_7, %c0_8], %11 {strides = array<i32>} : memref<1x3x224x224xbf16, #tpu.memory_space<vmem>>, vector<1x1x224x224xbf16>,
    %12 = vector.extract_strided_slice %5 {offsets = [224, 0], sizes = [224, 224], strides = [1, 1]} : vector<672x224xbf16> to vector<224x224xbf16>
    %cst_9 = arith.constant dense<0.000000e+00> : vector<224x224xf32>
    %13 = tpu.matmul %0, %12, %cst_9 {dimension_numbers = #tpu.dot_dimension_numbers<[1], [0], [0], [1], [0, 0, 1, 1], [], []>} : vector<224x224xbf16>, vector<224x224xbf16>, vector<224x224xf32> -> vector<224x224xf32>
    %14 = arith.truncf %13 : vector<224x224xf32> to vector<224x224xbf16>
    %c0_10 = arith.constant 0 : index
    %c1 = arith.constant 1 : index
    %c0_11 = arith.constant 0 : index
    %c0_12 = arith.constant 0 : index
    %15 = vector.load %arg3[%c0_10, %c1, %c0_11, %c0_12] : memref<1x3x224x224xbf16, #tpu.memory_space<vmem>>, vector<1x1x224x224xbf16>
    %16 = vector.shape_cast %15 : vector<1x1x224x224xbf16> to vector<224x224xbf16>
    %17 = vector.shape_cast %14 : vector<224x224xbf16> to vector<1x1x224x224xbf16>
    tpu.vector_store %arg3[%c0_10, %c1, %c0_11, %c0_12], %17 {strides = array<i32>} : memref<1x3x224x224xbf16, #tpu.memory_space<vmem>>, vector<1x1x224x224xbf16>,
    %18 = vector.extract_strided_slice %5 {offsets = [448, 0], sizes = [224, 224], strides = [1, 1]} : vector<672x224xbf16> to vector<224x224xbf16>
    %cst_13 = arith.constant dense<0.000000e+00> : vector<224x224xf32>
    %19 = tpu.matmul %0, %18, %cst_13 {dimension_numbers = #tpu.dot_dimension_numbers<[1], [0], [0], [1], [0, 0, 1, 1], [], []>} : vector<224x224xbf16>, vector<224x224xbf16>, vector<224x224xf32> -> vector<224x224xf32>
    %20 = arith.truncf %19 : vector<224x224xf32> to vector<224x224xbf16>
    %c0_14 = arith.constant 0 : index
    %c2 = arith.constant 2 : index
    %c0_15 = arith.constant 0 : index
    %c0_16 = arith.constant 0 : index
    %21 = vector.load %arg3[%c0_14, %c2, %c0_15, %c0_16] : memref<1x3x224x224xbf16, #tpu.memory_space<vmem>>, vector<1x1x224x224xbf16>
    %22 = vector.shape_cast %21 : vector<1x1x224x224xbf16> to vector<224x224xbf16>
    %23 = vector.shape_cast %20 : vector<224x224xbf16> to vector<1x1x224x224xbf16>
    tpu.vector_store %arg3[%c0_14, %c2, %c0_15, %c0_16], %23 {strides = array<i32>} : memref<1x3x224x224xbf16, #tpu.memory_space<vmem>>, vector<1x1x224x224xbf16>,
    return
  }
  func.func @transform_0(%arg0: i32) -> (i32, i32) {
    %c0_i32 = arith.constant 0 : i32
    %c0_i32_0 = arith.constant 0 : i32
    %c0_i32_1 = arith.constant 0 : i32
    return %c0_i32, %c0_i32_0 : i32, i32
  }
  func.func @transform_1(%arg0: i32) -> (i32, i32, i32) {
    %c0_i32 = arith.constant 0 : i32
    %c0_i32_0 = arith.constant 0 : i32
    %c0_i32_1 = arith.constant 0 : i32
    return %arg0, %c0_i32, %c0_i32_0 : i32, i32, i32
  }
  func.func @transform_2(%arg0: i32) -> (i32, i32, i32, i32) {
    %c0_i32 = arith.constant 0 : i32
    %c0_i32_0 = arith.constant 0 : i32
    %c0_i32_1 = arith.constant 0 : i32
    %c0_i32_2 = arith.constant 0 : i32
    return %arg0, %c0_i32, %c0_i32_0, %c0_i32_1 : i32, i32, i32, i32
  }
}

module attributes {stable_mosaic.version = 11 : i64} {
  func.func @_embed_norm_kernel(%arg0: i32, %arg1: memref<1x196x768xbf16, #tpu.memory_space<vmem>>, %arg2: memref<768x128xbf16, #tpu.memory_space<vmem>>, %arg3: memref<1x128xf32, #tpu.memory_space<vmem>>, %arg4: memref<1x196x128xf32, #tpu.memory_space<vmem>>) attributes {dimension_semantics = [#tpu.dimension_semantics<parallel>], iteration_bounds = array<i64: 2>, scalar_prefetch = 0 : i64, scratch_operands = 0 : i64, tpu.core_type = #tpu.core_type<tc>, window_params = [{transform_indices = @transform_0, window_bounds = array<i64: 1, 196, 768>}, {pipeline_mode = #tpu.pipeline_mode<synchronous>, transform_indices = @transform_1, window_bounds = array<i64: 768, 128>}, {pipeline_mode = #tpu.pipeline_mode<synchronous>, transform_indices = @transform_2, window_bounds = array<i64: 1, 128>}, {transform_indices = @transform_3, window_bounds = array<i64: 1, 196, 128>}]} {
    %c0 = arith.constant 0 : index
    %c0_0 = arith.constant 0 : index
    %c0_1 = arith.constant 0 : index
    %0 = vector.load %arg1[%c0, %c0_0, %c0_1] : memref<1x196x768xbf16, #tpu.memory_space<vmem>>, vector<1x196x768xbf16>
    %1 = vector.shape_cast %0 : vector<1x196x768xbf16> to vector<196x768xbf16>
    %c0_2 = arith.constant 0 : index
    %c0_3 = arith.constant 0 : index
    %2 = vector.load %arg2[%c0_2, %c0_3] : memref<768x128xbf16, #tpu.memory_space<vmem>>, vector<768x128xbf16>
    %cst = arith.constant dense<0.000000e+00> : vector<196x128xf32>
    %3 = tpu.matmul %1, %2, %cst {dimension_numbers = #tpu.dot_dimension_numbers<[1], [0], [0], [1], [0, 0, 1, 1], [], []>} : vector<196x768xbf16>, vector<768x128xbf16>, vector<196x128xf32> -> vector<196x128xf32>
    %c0_4 = arith.constant 0 : index
    %c0_5 = arith.constant 0 : index
    %4 = vector.load %arg3[%c0_4, %c0_5] : memref<1x128xf32, #tpu.memory_space<vmem>>, vector<1x128xf32>
    %5 = vector.broadcast %4 : vector<1x128xf32> to vector<196x128xf32>
    %6 = arith.addf %3, %5 : vector<196x128xf32>
    %7 = arith.mulf %6, %6 : vector<196x128xf32>
    %cst_6 = arith.constant dense<0.000000e+00> : vector<196xf32>
    %8 = vector.multi_reduction <add>, %7, %cst_6 [1] : vector<196x128xf32> to vector<196xf32>
    %9 = vector.shape_cast %8 : vector<196xf32> to vector<196x1xf32>
    %cst_7 = arith.constant 1.000000e-24 : f32
    %10 = vector.broadcast %cst_7 : f32 to vector<196x1xf32>
    %11 = arith.maximumf %9, %10 : vector<196x1xf32>
    %12 = math.rsqrt %11 : vector<196x1xf32>
    %13 = vector.broadcast %12 : vector<196x1xf32> to vector<196x128xf32>
    %14 = arith.mulf %6, %13 : vector<196x128xf32>
    %c0_8 = arith.constant 0 : index
    %c0_9 = arith.constant 0 : index
    %c0_10 = arith.constant 0 : index
    %15 = vector.load %arg4[%c0_8, %c0_9, %c0_10] : memref<1x196x128xf32, #tpu.memory_space<vmem>>, vector<1x196x128xf32>
    %16 = vector.shape_cast %15 : vector<1x196x128xf32> to vector<196x128xf32>
    %17 = vector.shape_cast %14 : vector<196x128xf32> to vector<1x196x128xf32>
    tpu.vector_store %arg4[%c0_8, %c0_9, %c0_10], %17 {strides = array<i32>} : memref<1x196x128xf32, #tpu.memory_space<vmem>>, vector<1x196x128xf32>,
    return
  }
  func.func @transform_0(%arg0: i32) -> (i32, i32, i32) {
    %c0_i32 = arith.constant 0 : i32
    %c0_i32_0 = arith.constant 0 : i32
    %c0_i32_1 = arith.constant 0 : i32
    return %arg0, %c0_i32, %c0_i32_0 : i32, i32, i32
  }
  func.func @transform_1(%arg0: i32) -> (i32, i32) {
    %c0_i32 = arith.constant 0 : i32
    %c0_i32_0 = arith.constant 0 : i32
    %c0_i32_1 = arith.constant 0 : i32
    return %c0_i32, %c0_i32_0 : i32, i32
  }
  func.func @transform_2(%arg0: i32) -> (i32, i32) {
    %c0_i32 = arith.constant 0 : i32
    %c0_i32_0 = arith.constant 0 : i32
    %c0_i32_1 = arith.constant 0 : i32
    return %c0_i32, %c0_i32_0 : i32, i32
  }
  func.func @transform_3(%arg0: i32) -> (i32, i32, i32) {
    %c0_i32 = arith.constant 0 : i32
    %c0_i32_0 = arith.constant 0 : i32
    %c0_i32_1 = arith.constant 0 : i32
    return %arg0, %c0_i32, %c0_i32_0 : i32, i32, i32
  }
}

</mosaic_0001>

<bundles_post_ra>
// kernel: extractor_forward.2
= control target key start
LH: loop header
LB: loop body
LE: loop exit
PB: predicated region body
PF: predicated region fallthrough
CT: control target
= control target key end

     0   :  { %7 = vsyncpa [#allocation3], 0  ;;  %s4257_s0 = inlined_call_operand.vmem [shape: bf16[224,224], index: 0, kind: input, shape index: {}]   ;;  %s4258_s1 = inlined_call_operand.hbm [shape: f32[2,672,224], index: 1, kind: input, shape index: {}]   ;;  %s4259_s2 = inlined_call_operand.vmem [shape: bf16[2,3,224,224], index: 2, kind: output, shape index: {}]  }
   0x1   :  { %9 = vsyncpa [#allocation3 + $0x1], 0  ;;  %s3011_s9 = smov 0   ;;  %s3013_s10 = smov 0  }
   0x2   :  { %s3015_s11 = smov 0   ;;  %s3017_s12 = smov 0  }
   0x3 LB: > { %s3030_s13 = sadd.s32 4294967295, %s2991_s12   ;;  %s3033_s14 = sadd.s32 1, %s2991_s12   ;;  %s2991_s12 = sphi %s3017_s12, %s4289_s12   ;;  %s2987_s11 = sphi %s3015_s11, %s4288_s11   ;;  %s2983_s10 = sphi %s3013_s10, %s4287_s10   ;;  %s2979_s9 = sphi %s3011_s9, %s4286_s9  }
   0x4   : > { %s40_s15 = ssub.s32 %s2991_s12, %s3033_s14  ;;  %s43_s16 = sadd.s32 1, %s2987_s11 }
   0x5   : > { %p41_p0 = scmp.eq.s32.totalorder %s40_s15, 0  ;;  %p50_p1 = scmp.ne.s32.totalorder %s2987_s11, %s2983_s10 }
   0x6   : > { %p51_p2 = scmp.eq.s32.totalorder %s2991_s12, 0  ;;  %p56_p3 = scmp.ne.s32.totalorder %s2983_s10, %s2979_s9 }
   0x7   : > { %s3043_s17 = scalar_select %p41_p0, %s2987_s11, %s43_s16  }
   0x8   : > { %p52_p4 = por %p51_p2, %p50_p1  ;;  %p57_p5 = scmp.eq.s32.totalorder %s3030_s13, 0 }
   0x9   : > { %p2824_p6 = scmp.lt.s32.totalorder %s2991_s12, 2  ;;  %s109_s19 = sand.u32 1, %s2987_s11  }
   0xa   : > { %p3047_p7 = por %p57_p5, %p56_p3  ;;  %s2814_s20 = smul.u32 1344, %s109_s19 }
   0xb   : > { %s2815_s21 = smul.u32 21504, %s2991_s12  ;;  %p3053_p8 = pnand %p2824_p6, %p52_p4 }
   0xc   : > { %s4266_s18 = scalar_select %p3047_p7, 1, 0 }
   0xd   : > { %s3060_s25 = scalar_lea.hbm %s4258_s1, %s2815_s21  ;;  %s113_s26 = scalar_lea.vmem [#allocation2], %s2814_s20 }
   0xe   : > { %s120_s27 = sshll.u32 %s113_s26, 4  ;;  %s3065_s28 = scalar_lea.sflag [#allocation3], %s109_s19  ;;  %s3062_s27 = int_to_ptr.vmem [resolvable:$true] %s120_s27 }
   0xf   : > { %s2929_s29 = scalar_lea.hbm %s3060_s25, 21504  ;;  %p2931_p11 = pneg %p3053_p8 }
  0x10   : > { %p2930_p10 = scmp.ne.s32.totalorder %s3060_s25, %s2929_s29  ;;  %s2934_s4 = scalar_lea.hbm %s4258_s1, 43008 }
  0x11   : > { %p2935_p0 = scmp.lt.s32.totalorder %s3060_s25, %s4258_s1  ;;  %p2936_p1 = scmp.lt.s32.totalorder %s2934_s4, %s2929_s29 }
  0x12   : > { %p2932_p12 = pnand %p2931_p11, %p2930_p10 }
  0x13   : > { %p2937_p2 = por %p2936_p1, %p2935_p0 }
  0x14   : > { %p2933_p13 = pneg %p2932_p12 }
  0x16   : > { %p2938_p3 = pnand %p2937_p2, %p2933_p13 }
  0x18   : > { %2941 = shalt.err (!%p2938_p3)
}
  0x19   : > { %s2942_s7 = scalar_lea.vmem %s3062_s27, 21504  ;;  %s2993_s8 = smov [#allocation2]  }
  0x1a   : > { %p2943_p4 = scmp.ne.s32.totalorder %s3062_s27, %s2942_s7  ;;  %s2947_s9 = sshll.u32 %s2993_s8, 4  ;;  %s2948_s9 = int_to_ptr.vmem [resolvable:$false] %s2947_s9 }
  0x1b   : > { %s2949_s15 = scalar_lea.vmem %s2948_s9, 43008  ;;  %p2950_p10 = scmp.lt.s32.totalorder %s3062_s27, %s2948_s9 }
  0x1c   : > { %p2945_p5 = pnand %p2943_p4, %p2931_p11  ;;  %p2951_p12 = scmp.lt.s32.totalorder %s2949_s15, %s2942_s7 }
  0x1e   : > { %p2946_p6 = pneg %p2945_p5  ;;  %p2952_p9 = por %p2951_p12, %p2950_p10 }
  0x20   : > { %p2953_p7 = pnand %p2952_p9, %p2946_p6 }
  0x22   : > { %2956 = shalt.err (!%p2953_p7)
}
  0x23   : > { %s2994_s16 = smov 256   ;;  %s2995_s19 = smov 16  }
  0x24   : > { %2823 = dma.hbm_to_vmem [thread:$0]  (!%p3053_p8), %s3060_s25, 21504, %s3062_s27, %s3065_s28, %s2994_s16, %s2994_s16, %s2995_s19  }
  0x25   : > { %p128_p11 = scmp.lt.s32.totalorder %s2991_s12, 3  ;;  %p4268_p13 = scmp.ge.s32.totalorder %s2991_s12, 1 }
  0x27   : > { %p129_p0 = pnand %p4268_p13, %p128_p11 }
  0x29   : > { %132 = sbr.rel (%p129_p0) target bundleno = 1023 (0x3ff), region = 28 }
  0x2e   : > { %s134_s20 = sand.u32 1, %s2983_s10   ;;  %p4269_p7 = scmp.ne.s32.totalorder %s4266_s18, 0 }
  0x2f   : > { %s2816_s21 = smul.u32 1344, %s134_s20  ;;  %s135_s23 = scalar_lea.sflag [#allocation3], %s134_s20 }
  0x31   : > { %s3090_s24 = scalar_lea.vmem [#allocation2], %s2816_s21 }
  0x32   : > { %2974 = dma.done.wait (%p4269_p7), %s135_s23, 21504  }
  0x33   : > { %2976 = vsyncadd (%p4269_p7), %s135_s23, 4294945792  ;;  %vm571_vm0 = vcmask 785408   ;;  %v2859_v0 = vld [vmem:[%s4257_s0 + $0x74] ss:$8 sps:$4 sm:$0xff]   ;;  %v2861_v1 = vld [vmem:[%s4257_s0 + $0x70] ss:$8 sps:$4 sm:$0xff]  }
  0x34   : > { %2490 = vmatprep.subr.msk.bf16.mxu0 %vm571_vm0, %v2859_v0  ;;  %v2862_v2 = vld [vmem:[%s4257_s0 + $0x64] ss:$8 sps:$4 sm:$0xff]   ;;  %v2864_v3 = vld [vmem:[%s4257_s0 + $0x60] ss:$8 sps:$4 sm:$0xff]   ;;  %v2865_v4 = vld [vmem:[%s4257_s0 + $0x54] ss:$8 sps:$4 sm:$0xff]  }
  0x35   : > { %741 = vmatpush1.bf16.xpose.msra.mxu0 %v2861_v1  ;;  %v2880_v5 = vld [vmem:[%s4257_s0 + $0x4] ss:$8 sps:$4 sm:$0xff]   ;;  %v2867_v6 = vld [vmem:[%s4257_s0 + $0x50] ss:$8 sps:$4 sm:$0xff]   ;;  %v2870_v11 = vld [vmem:[%s4257_s0 + $0x40] ss:$8 sps:$4 sm:$0xff]  }
  0x36   : > { %2491 = vmatprep.subr.msk.bf16.mxu0 %vm571_vm0, %v2862_v2  ;;  %2546 = vmatprep.mubr.msk.bf16.mxu1 %vm571_vm0, %v2880_v5  ;;  %v2868_v7 = vld [vmem:[%s4257_s0 + $0x44] ss:$8 sps:$4 sm:$0xff]   ;;  %v196_v9 = vld [vmem:[%s3090_s24 + $0x18] sm:$0xff]  ;;  %v3148_v15 = vld [vmem:[%s4257_s0 + $0x20] ss:$8 sps:$4 sm:$0xff]   ;;  %p159_p8 = scmp.lt.s32.totalorder %s3030_s13, 1 }
  0x37   : > { %v194_v8 = vld [vmem:[%s3090_s24 + $0x8] sm:$0xff]  ;;  %v2871_v12 = vld [vmem:[%s4257_s0 + $0x34] ss:$8 sps:$4 sm:$0xff]   ;;  %v2873_v13 = vld [vmem:[%s4257_s0 + $0x30] ss:$8 sps:$4 sm:$0xff]   ;;  %vm1618_vm1 = vcmask 1043456  }
  0x38   : > { %v362_v10 = vpack.c.bf16 %v196_v9, %v194_v8  ;;  %v3141_v14 = vld [vmem:[%s4257_s0 + $0x24] ss:$8 sps:$4 sm:$0xff]   ;;  %v3153_v16 = vld [vmem:[%s4257_s0 + $0x14] ss:$8 sps:$4 sm:$0xff]   ;;  %v3161_v17 = vld [vmem:[%s4257_s0 + $0x10] ss:$8 sps:$4 sm:$0xff]  }
  0x39   : > { %v3168_v18 = vld [vmem:[%s4257_s0] ss:$8 sps:$4 sm:$0xff]   ;;  %v2883_v19 = vld [vmem:[%s4257_s0 + $0xd4] ss:$8 sps:$4 sm:$0xff]   ;;  %v2885_v20 = vld [vmem:[%s4257_s0 + $0xd0] ss:$8 sps:$4 sm:$0xff]  }
  0x3a   : > { %2504 = vmatprep.mubr.msk.bf16.mxu0 %vm571_vm0, %v362_v10  ;;  %v2886_v21 = vld [vmem:[%s4257_s0 + $0xc4] ss:$8 sps:$4 sm:$0xff]   ;;  %v2888_v22 = vld [vmem:[%s4257_s0 + $0xc0] ss:$8 sps:$4 sm:$0xff]   ;;  %v2889_v23 = vld [vmem:[%s4257_s0 + $0xb4] ss:$8 sps:$4 sm:$0xff]  }
  0x3b   : > { %v2891_v24 = vld [vmem:[%s4257_s0 + $0xb0] ss:$8 sps:$4 sm:$0xff]   ;;  %v2892_v25 = vld [vmem:[%s4257_s0 + $0xa4] ss:$8 sps:$4 sm:$0xff]   ;;  %v2894_v26 = vld [vmem:[%s4257_s0 + $0xa0] ss:$8 sps:$4 sm:$0xff]  }
  0x3c   : > { %v2895_v27 = vld [vmem:[%s4257_s0 + $0x94] ss:$8 sps:$4 sm:$0xff]   ;;  %v2897_v28 = vld [vmem:[%s4257_s0 + $0x90] ss:$8 sps:$4 sm:$0xff]   ;;  %v2898_v29 = vld [vmem:[%s4257_s0 + $0x84] ss:$8 sps:$4 sm:$0xff]  }
  0x3d   : > { %743 = vmatpush1.bf16.xpose.msra.mxu0 %v2864_v3  ;;  %v2900_v30 = vld [vmem:[%s4257_s0 + $0x80] ss:$8 sps:$4 sm:$0xff]   ;;  %v195_v32 = vld [vmem:[%s3090_s24 + $0x10] sm:$0xff]  ;;  %v200_v34 = vld [vmem:[%s3090_s24 + $0x38] sm:$0xff]  ;;  %s4291_s13 = smov (!%p159_p8, %s3030_s13), 1  ;;  %vm1619_vm2 = vcmask 785412  }
  0x3e   : > { %2492 = vmatprep.subr.msk.bf16.mxu0 %vm571_vm0, %v2865_v4  ;;  %v193_v31 = vld [vmem:[%s3090_s24] sm:$0xff]  ;;  %v198_v33 = vld [vmem:[%s3090_s24 + $0x28] sm:$0xff]  ;;  %v199_v38 = vld [vmem:[%s3090_s24 + $0x30] sm:$0xff]  ;;  %s2817_s23 = smul.u32 672, %s4291_s13 }
  0x3f   : > { %v361_v35 = vpack.c.bf16 %v195_v32, %v193_v31  ;;  %v364_v36 = vpack.c.bf16 %v200_v34, %v198_v33  ;;  %v197_v37 = vld [vmem:[%s3090_s24 + $0x20] sm:$0xff]  ;;  %v202_v39 = vld [vmem:[%s3090_s24 + $0x48] sm:$0xff]  ;;  %v204_v40 = vld [vmem:[%s3090_s24 + $0x58] sm:$0xff] }
  0x40   : > { %v363_v41 = vpack.c.bf16 %v199_v38, %v197_v37  ;;  %v366_v42 = vpack.c.bf16 %v204_v40, %v202_v39  ;;  %v201_v43 = vld [vmem:[%s3090_s24 + $0x40] sm:$0xff]  ;;  %v203_v44 = vld [vmem:[%s3090_s24 + $0x50] sm:$0xff]  ;;  %v206_v45 = vld [vmem:[%s3090_s24 + $0x68] sm:$0xff]  ;;  %s3925_s12 = scalar_lea.vmem %s4259_s2, %s2817_s23 }
  0x41   : > { %v208_v46 = vld [vmem:[%s3090_s24 + $0x78] sm:$0xff]  ;;  %v365_v47 = vpack.c.bf16 %v203_v44, %v201_v43  ;;  %v205_v49 = vld [vmem:[%s3090_s24 + $0x60] sm:$0xff]  ;;  %v207_v50 = vld [vmem:[%s3090_s24 + $0x70] sm:$0xff] }
  0x42   : > { %v368_v48 = vpack.c.bf16 %v208_v46, %v206_v45  ;;  %v210_v51 = vld [vmem:[%s3090_s24 + $0x88] sm:$0xff]  ;;  %v212_v52 = vld [vmem:[%s3090_s24 + $0x98] sm:$0xff]  ;;  %v367_v53 = vpack.c.bf16 %v207_v50, %v205_v49  ;;  %v209_v55 = vld [vmem:[%s3090_s24 + $0x80] sm:$0xff] }
  0x43   : > { %v370_v54 = vpack.c.bf16 %v212_v52, %v210_v51  ;;  %v211_v56 = vld [vmem:[%s3090_s24 + $0x90] sm:$0xff]  ;;  %v214_v57 = vld [vmem:[%s3090_s24 + $0xa8] sm:$0xff]  ;;  %v216_v58 = vld [vmem:[%s3090_s24 + $0xb8] sm:$0xff] }
  0x44   : > { %v369_v59 = vpack.c.bf16 %v211_v56, %v209_v55  ;;  %v372_v60 = vpack.c.bf16 %v216_v58, %v214_v57  ;;  %v213_v61 = vld [vmem:[%s3090_s24 + $0xa0] sm:$0xff]  ;;  %v215_v62 = vld [vmem:[%s3090_s24 + $0xb0] sm:$0xff]  ;;  %v218_v63 = vld [vmem:[%s3090_s24 + $0xc8] sm:$0xff] }
  0x45   : > { %745 = vmatpush1.bf16.xpose.msra.mxu0 %v2867_v6  ;;  %v220_v0 = vld [vmem:[%s3090_s24 + $0xd8] sm:$0xff]  ;;  %v371_v1 = vpack.c.bf16 %v215_v62, %v213_v61  ;;  %v217_v3 = vld [vmem:[%s3090_s24 + $0xc0] sm:$0xff]  ;;  %v219_v4 = vld [vmem:[%s3090_s24 + $0xd0] sm:$0xff] }
  0x46   : > { %2493 = vmatprep.subr.msk.bf16.mxu0 %vm571_vm0, %v2868_v7  ;;  %v374_v2 = vpack.c.bf16 %v220_v0, %v218_v63  ;;  %v224_v6 = vld [vmem:[%s3090_s24 + $0xf8] sm:$0xff]  ;;  %v373_v7 = vpack.c.bf16 %v219_v4, %v217_v3  ;;  %v221_v9 = vld [vmem:[%s3090_s24 + $0xe0] sm:$0xff]  ;;  %v223_v10 = vld [vmem:[%s3090_s24 + $0xf0] sm:$0xff] }
  0x47   : > { %v233_v32 = vld [vmem:[%s3090_s24 + $0x140] sm:$0xff]  ;;  %v235_v33 = vld [vmem:[%s3090_s24 + $0x150] sm:$0xff]  ;;  %v238_v34 = vld [vmem:[%s3090_s24 + $0x168] sm:$0xff] }
  0x48   : > { %v237_v38 = vld [vmem:[%s3090_s24 + $0x160] sm:$0xff]  ;;  %v239_v39 = vld [vmem:[%s3090_s24 + $0x170] sm:$0xff]  ;;  %v242_v40 = vld [vmem:[%s3090_s24 + $0x188] sm:$0xff] }
  0x49   : > { %v241_v44 = vld [vmem:[%s3090_s24 + $0x180] sm:$0xff]  ;;  %v243_v45 = vld [vmem:[%s3090_s24 + $0x190] sm:$0xff]  ;;  %v246_v46 = vld [vmem:[%s3090_s24 + $0x1a8] sm:$0xff] }
  0x4a   : > { %v245_v50 = vld [vmem:[%s3090_s24 + $0x1a0] sm:$0xff]  ;;  %v247_v51 = vld [vmem:[%s3090_s24 + $0x1b0] sm:$0xff]  ;;  %v250_v52 = vld [vmem:[%s3090_s24 + $0x1c8] sm:$0xff] }
  0x4b   : > { %v249_v56 = vld [vmem:[%s3090_s24 + $0x1c0] sm:$0xff]  ;;  %v251_v57 = vld [vmem:[%s3090_s24 + $0x1d0] sm:$0xff]  ;;  %v254_v58 = vld [vmem:[%s3090_s24 + $0x1e8] sm:$0xff] }
  0x4c   : > { %v253_v62 = vld [vmem:[%s3090_s24 + $0x1e0] sm:$0xff]  ;;  %v255_v63 = vld [vmem:[%s3090_s24 + $0x1f0] sm:$0xff]  ;;  %v258_v0 = vld [vmem:[%s3090_s24 + $0x208] sm:$0xff] }
  0x4d   : > { %747 = vmatpush1.bf16.xpose.msra.mxu0 %v2870_v11  ;;  %v226_v11 = vld [vmem:[%s3090_s24 + $0x108] sm:$0xff]  ;;  %v257_v4 = vld [vmem:[%s3090_s24 + $0x200] sm:$0xff]  ;;  %vm3927_vm3 = vmor %vm1619_vm2, %vm1618_vm1 }
  0x4e   : > { %2494 = vmatprep.subr.msk.bf16.mxu0 %vm571_vm0, %v2871_v12  ;;  %v228_v12 = vld [vmem:[%s3090_s24 + $0x118] sm:$0xff] }
  0x55   : > { %749 = vmatpush1.bf16.xpose.msra.mxu0 %v2873_v13  ;;  %v375_v13 = vpack.c.bf16 %v223_v10, %v221_v9  ;;  %v261_v10 = vld [vmem:[%s3090_s24 + $0x220] sm:$0xff] }
  0x56   : > { %2495 = vmatprep.subr.msk.bf16.mxu0 %vm571_vm0, %v3141_v14 }
  0x5d   : > { %751 = vmatpush1.bf16.xpose.msra.mxu0 %v3148_v15 }
  0x5e   : > { %2496 = vmatprep.subr.msk.bf16.mxu0 %vm571_vm0, %v3153_v16 }
  0x65   : > { %753 = vmatpush1.bf16.xpose.msra.mxu0 %v3161_v17 }
  0x66   : > { %2497 = vmatprep.subr.msk.bf16.mxu0 %vm571_vm0, %v2880_v5  ;;  %v222_v5 = vld [vmem:[%s3090_s24 + $0xe8] sm:$0xff] }
  0x67   : > { %v376_v8 = vpack.c.bf16 %v224_v6, %v222_v5  ;;  %v259_v5 = vld [vmem:[%s3090_s24 + $0x210] sm:$0xff]  ;;  %v262_v6 = vld [vmem:[%s3090_s24 + $0x228] sm:$0xff] }
  0x6d   : > { %755 = vmatpush1.bf16.xpose.msra.mxu0 %v3168_v18 }
  0x6e   : > { %2498 = vmatprep.subr.msk.bf16.mxu0 %vm571_vm0, %v2883_v19  ;;  %v378_v19 = vpack.c.bf16 %v228_v12, %v226_v11  ;;  %v263_v11 = vld [vmem:[%s3090_s24 + $0x230] sm:$0xff]  ;;  %v266_v12 = vld [vmem:[%s3090_s24 + $0x248] sm:$0xff] }
  0x75   : > { %761 = vmatpush2.bf16.xpose.msra.mxu0 %v2885_v20  ;;  %v225_v20 = vld [vmem:[%s3090_s24 + $0x100] sm:$0xff] }
  0x76   : > { %2499 = vmatprep.subr.msk.bf16.mxu0 %vm571_vm0, %v2886_v21  ;;  %v227_v21 = vld [vmem:[%s3090_s24 + $0x110] sm:$0xff] }
  0x7d   : > { %763 = vmatpush2.bf16.xpose.msra.mxu0 %v2888_v22  ;;  %v230_v22 = vld [vmem:[%s3090_s24 + $0x128] sm:$0xff] }
  0x7e   : > { %2500 = vmatprep.subr.msk.bf16.mxu0 %vm571_vm0, %v2889_v23  ;;  %v232_v23 = vld [vmem:[%s3090_s24 + $0x138] sm:$0xff] }
  0x85   : > { %765 = vmatpush2.bf16.xpose.msra.mxu0 %v2891_v24  ;;  %v377_v24 = vpack.c.bf16 %v227_v21, %v225_v20  ;;  %v265_v21 = vld [vmem:[%s3090_s24 + $0x240] sm:$0xff] }
  0x86   : > { %2501 = vmatprep.subr.msk.bf16.mxu0 %vm571_vm0, %v2892_v25  ;;  %v380_v25 = vpack.c.bf16 %v232_v23, %v230_v22  ;;  %v267_v22 = vld [vmem:[%s3090_s24 + $0x250] sm:$0xff]  ;;  %v270_v23 = vld [vmem:[%s3090_s24 + $0x268] sm:$0xff] }
  0x8d   : > { %767 = vmatpush2.bf16.xpose.msra.mxu0 %v2894_v26  ;;  %v229_v26 = vld [vmem:[%s3090_s24 + $0x120] sm:$0xff] }
  0x8e   : > { %2502 = vmatprep.subr.msk.bf16.mxu0 %vm571_vm0, %v2895_v27  ;;  %v231_v27 = vld [vmem:[%s3090_s24 + $0x130] sm:$0xff] }
  0x95   : > { %769 = vmatpush2.bf16.xpose.msra.mxu0 %v2897_v28  ;;  %v234_v28 = vld [vmem:[%s3090_s24 + $0x148] sm:$0xff] }
  0x96   : > { %2503 = vmatprep.subr.msk.bf16.mxu0 %vm571_vm0, %v2898_v29  ;;  %v236_v29 = vld [vmem:[%s3090_s24 + $0x158] sm:$0xff] }
  0x97   : > { %v382_v31 = vpack.c.bf16 %v236_v29, %v234_v28  ;;  %v271_v28 = vld [vmem:[%s3090_s24 + $0x270] sm:$0xff]  ;;  %v274_v29 = vld [vmem:[%s3090_s24 + $0x288] sm:$0xff] }
  0x9d   : > { %771 = vmatpush2.bf16.xpose.msra.mxu0 %v2900_v30  ;;  %v379_v30 = vpack.c.bf16 %v231_v27, %v229_v26  ;;  %v269_v27 = vld [vmem:[%s3090_s24 + $0x260] sm:$0xff] }
  0xa4   : > { %773 = vmatmul.mubr.bf16.vlgmr.msra.gmra.mxu0 %v361_v35  ;;  %v240_v35 = vld [vmem:[%s3090_s24 + $0x178] sm:$0xff] }
  0xa5   : > { %2505 = vmatprep.mubr.msk.bf16.mxu0 %vm571_vm0, %v364_v36  ;;  %v381_v36 = vpack.c.bf16 %v235_v33, %v233_v32  ;;  %v384_v37 = vpack.c.bf16 %v240_v35, %v238_v34  ;;  %v273_v33 = vld [vmem:[%s3090_s24 + $0x280] sm:$0xff]  ;;  %v275_v34 = vld [vmem:[%s3090_s24 + $0x290] sm:$0xff]  ;;  %v278_v35 = vld [vmem:[%s3090_s24 + $0x2a8] sm:$0xff] }
  0xac   : > { %783 = vmatmul.mubr.bf16.gmra.mxu0 %v363_v41  ;;  %v244_v41 = vld [vmem:[%s3090_s24 + $0x198] sm:$0xff] }
  0xad   : > { %2506 = vmatprep.mubr.msk.bf16.mxu0 %vm571_vm0, %v366_v42  ;;  %v383_v42 = vpack.c.bf16 %v239_v39, %v237_v38  ;;  %v386_v43 = vpack.c.bf16 %v244_v41, %v242_v40  ;;  %v277_v39 = vld [vmem:[%s3090_s24 + $0x2a0] sm:$0xff]  ;;  %v279_v40 = vld [vmem:[%s3090_s24 + $0x2b0] sm:$0xff]  ;;  %v282_v41 = vld [vmem:[%s3090_s24 + $0x2c8] sm:$0xff] }
  0xb4   : > { %793 = vmatmul.mubr.bf16.gmra.mxu0 %v365_v47  ;;  %v248_v47 = vld [vmem:[%s3090_s24 + $0x1b8] sm:$0xff] }
  0xb5   : > { %2507 = vmatprep.mubr.msk.bf16.mxu0 %vm571_vm0, %v368_v48  ;;  %v385_v48 = vpack.c.bf16 %v243_v45, %v241_v44  ;;  %v388_v49 = vpack.c.bf16 %v248_v47, %v246_v46  ;;  %v281_v45 = vld [vmem:[%s3090_s24 + $0x2c0] sm:$0xff]  ;;  %v283_v46 = vld [vmem:[%s3090_s24 + $0x2d0] sm:$0xff]  ;;  %v286_v47 = vld [vmem:[%s3090_s24 + $0x2e8] sm:$0xff] }
  0xbc   : > { %803 = vmatmul.mubr.bf16.gmra.mxu0 %v367_v53  ;;  %v252_v53 = vld [vmem:[%s3090_s24 + $0x1d8] sm:$0xff] }
  0xbd   : > { %2508 = vmatprep.mubr.msk.bf16.mxu0 %vm571_vm0, %v370_v54  ;;  %v387_v54 = vpack.c.bf16 %v247_v51, %v245_v50  ;;  %v390_v55 = vpack.c.bf16 %v252_v53, %v250_v52  ;;  %v285_v51 = vld [vmem:[%s3090_s24 + $0x2e0] sm:$0xff]  ;;  %v287_v52 = vld [vmem:[%s3090_s24 + $0x2f0] sm:$0xff]  ;;  %v290_v53 = vld [vmem:[%s3090_s24 + $0x308] sm:$0xff] }
  0xc4   : > { %813 = vmatmul.mubr.bf16.gmra.mxu0 %v369_v59  ;;  %v256_v59 = vld [vmem:[%s3090_s24 + $0x1f8] sm:$0xff] }
  0xc5   : > { %2509 = vmatprep.mubr.msk.bf16.mxu0 %vm571_vm0, %v372_v60  ;;  %v389_v60 = vpack.c.bf16 %v251_v57, %v249_v56  ;;  %v392_v61 = vpack.c.bf16 %v256_v59, %v254_v58  ;;  %v289_v57 = vld [vmem:[%s3090_s24 + $0x300] sm:$0xff]  ;;  %v291_v58 = vld [vmem:[%s3090_s24 + $0x310] sm:$0xff]  ;;  %v294_v59 = vld [vmem:[%s3090_s24 + $0x328] sm:$0xff] }
  0xcc   : > { %823 = vmatmul.mubr.bf16.gmra.mxu0 %v371_v1  ;;  %v260_v1 = vld [vmem:[%s3090_s24 + $0x218] sm:$0xff] }
  0xcd   : > { %2510 = vmatprep.mubr.msk.bf16.mxu0 %vm571_vm0, %v374_v2  ;;  %v391_v2 = vpack.c.bf16 %v255_v63, %v253_v62  ;;  %v394_v3 = vpack.c.bf16 %v260_v1, %v258_v0  ;;  %v293_v0 = vld [vmem:[%s3090_s24 + $0x320] sm:$0xff]  ;;  %v295_v1 = vld [vmem:[%s3090_s24 + $0x330] sm:$0xff] }
  0xd4   : > { %833 = vmatmul.mubr.bf16.gmra.mxu0 %v373_v7  ;;  %v264_v7 = vld [vmem:[%s3090_s24 + $0x238] sm:$0xff] }
  0xd5   : > { %2511 = vmatprep.mubr.msk.bf16.mxu0 %vm571_vm0, %v376_v8  ;;  %v393_v8 = vpack.c.bf16 %v259_v5, %v257_v4  ;;  %v396_v9 = vpack.c.bf16 %v264_v7, %v262_v6  ;;  %v300_v4 = vld [vmem:[%s3090_s24 + $0x358] sm:$0xff]  ;;  %v411_v6 = vpack.c.bf16 %v295_v1, %v293_v0 }
  0xd6   : > { %v320_v0 = vld [vmem:[%s3090_s24 + $0x3f8] sm:$0xff] }
  0xdc   : > { %843 = vmatmul.mubr.bf16.gmra.mxu0 %v375_v13  ;;  %v268_v13 = vld [vmem:[%s3090_s24 + $0x258] sm:$0xff] }
  0xdd   : > { %2512 = vmatprep.mubr.msk.bf16.mxu0 %vm571_vm0, %v378_v19  ;;  %v395_v19 = vpack.c.bf16 %v263_v11, %v261_v10  ;;  %v398_v20 = vpack.c.bf16 %v268_v13, %v266_v12  ;;  %v297_v12 = vld [vmem:[%s3090_s24 + $0x340] sm:$0xff]  ;;  %v299_v13 = vld [vmem:[%s3090_s24 + $0x350] sm:$0xff] }
  0xe4   : > { %853 = vmatmul.mubr.bf16.gmra.mxu0 %v377_v24  ;;  %v272_v24 = vld [vmem:[%s3090_s24 + $0x278] sm:$0xff] }
  0xe5   : > { %2513 = vmatprep.mubr.msk.bf16.mxu0 %vm571_vm0, %v380_v25  ;;  %v397_v25 = vpack.c.bf16 %v267_v22, %v265_v21  ;;  %v400_v26 = vpack.c.bf16 %v272_v24, %v270_v23  ;;  %v304_v21 = vld [vmem:[%s3090_s24 + $0x378] sm:$0xff]  ;;  %v413_v23 = vpack.c.bf16 %v299_v13, %v297_v12  ;;  %v317_v12 = vld [vmem:[%s3090_s24 + $0x3e0] sm:$0xff]  ;;  %v319_v13 = vld [vmem:[%s3090_s24 + $0x3f0] sm:$0xff] }
  0xec   : > { %863 = vmatmul.mubr.bf16.gmra.mxu0 %v379_v30  ;;  %v276_v30 = vld [vmem:[%s3090_s24 + $0x298] sm:$0xff] }
  0xed   : > { %2514 = vmatprep.mubr.msk.bf16.mxu0 %vm571_vm0, %v382_v31  ;;  %v399_v31 = vpack.c.bf16 %v271_v28, %v269_v27  ;;  %v402_v32 = vpack.c.bf16 %v276_v30, %v274_v29  ;;  %v301_v29 = vld [vmem:[%s3090_s24 + $0x360] sm:$0xff]  ;;  %v303_v30 = vld [vmem:[%s3090_s24 + $0x370] sm:$0xff] }
  0xf4   : > { %873 = vmatmul.mubr.bf16.gmra.mxu0 %v381_v36  ;;  %v280_v36 = vld [vmem:[%s3090_s24 + $0x2b8] sm:$0xff] }
  0xf5   : > { %2515 = vmatprep.mubr.msk.bf16.mxu0 %vm571_vm0, %v384_v37  ;;  %v401_v37 = vpack.c.bf16 %v275_v34, %v273_v33  ;;  %v404_v38 = vpack.c.bf16 %v280_v36, %v278_v35  ;;  %v308_v33 = vld [vmem:[%s3090_s24 + $0x398] sm:$0xff]  ;;  %v415_v35 = vpack.c.bf16 %v303_v30, %v301_v29  ;;  %v423_v29 = vpack.c.bf16 %v319_v13, %v317_v12 }
  0xfc   : > { %883 = vmatmul.mubr.bf16.gmra.mxu0 %v383_v42  ;;  %v284_v42 = vld [vmem:[%s3090_s24 + $0x2d8] sm:$0xff] }
  0xfd   : > { %2516 = vmatprep.mubr.msk.bf16.mxu0 %vm571_vm0, %v386_v43  ;;  %v403_v43 = vpack.c.bf16 %v279_v40, %v277_v39  ;;  %v406_v44 = vpack.c.bf16 %v284_v42, %v282_v41  ;;  %v305_v39 = vld [vmem:[%s3090_s24 + $0x380] sm:$0xff]  ;;  %v307_v40 = vld [vmem:[%s3090_s24 + $0x390] sm:$0xff]  ;;  %v310_v42 = vld [vmem:[%s3090_s24 + $0x3a8] sm:$0xff] }
 0x104   : > { %893 = vmatmul.mubr.bf16.gmra.mxu0 %v385_v48  ;;  %v288_v48 = vld [vmem:[%s3090_s24 + $0x2f8] sm:$0xff] }
 0x105   : > { %2517 = vmatprep.mubr.msk.bf16.mxu0 %vm571_vm0, %v388_v49  ;;  %v405_v49 = vpack.c.bf16 %v283_v46, %v281_v45  ;;  %v408_v50 = vpack.c.bf16 %v288_v48, %v286_v47  ;;  %v417_v45 = vpack.c.bf16 %v307_v40, %v305_v39  ;;  %v326_v40 = vld [vmem:[%s3090_s24 + $0x428] sm:$0xff] }
 0x10c   : > { %903 = vmatmul.mubr.bf16.gmra.mxu0 %v387_v54  ;;  %v292_v54 = vld [vmem:[%s3090_s24 + $0x318] sm:$0xff] }
 0x10d   : > { %2518 = vmatprep.mubr.msk.bf16.mxu0 %vm571_vm0, %v390_v55  ;;  %v407_v55 = vpack.c.bf16 %v287_v52, %v285_v51  ;;  %v410_v56 = vpack.c.bf16 %v292_v54, %v290_v53  ;;  %v314_v52 = vld [vmem:[%s3090_s24 + $0x3c8] sm:$0xff]  ;;  %v316_v53 = vld [vmem:[%s3090_s24 + $0x3d8] sm:$0xff] }
 0x114   : > { %913 = vmatmul.mubr.bf16.gmra.mxu0 %v389_v60  ;;  %v296_v60 = vld [vmem:[%s3090_s24 + $0x338] sm:$0xff] }
 0x115   : > { %2519 = vmatprep.mubr.msk.bf16.mxu0 %vm571_vm0, %v392_v61  ;;  %v409_v61 = vpack.c.bf16 %v291_v58, %v289_v57  ;;  %v412_v62 = vpack.c.bf16 %v296_v60, %v294_v59  ;;  %v313_v59 = vld [vmem:[%s3090_s24 + $0x3c0] sm:$0xff]  ;;  %v315_v60 = vld [vmem:[%s3090_s24 + $0x3d0] sm:$0xff] }
 0x11c   : > { %923 = vmatmul.mubr.bf16.gmra.mxu0 %v391_v2 }
 0x11d   : > { %2520 = vmatprep.mubr.msk.bf16.mxu0 %vm571_vm0, %v394_v3  ;;  %v298_v3 = vld [vmem:[%s3090_s24 + $0x348] sm:$0xff] }
 0x124   : > { %933 = vmatmul.mubr.bf16.gmra.mxu0 %v393_v8  ;;  %v414_v8 = vpack.c.bf16 %v300_v4, %v298_v3  ;;  %v421_v3 = vpack.c.bf16 %v315_v60, %v313_v59  ;;  %v327_v59 = vld [vmem:[%s3090_s24 + $0x430] sm:$0xff] }
 0x125   : > { %2521 = vmatprep.mubr.msk.bf16.mxu0 %vm571_vm0, %v396_v9 }
 0x12c   : > { %943 = vmatmul.mubr.bf16.gmra.mxu0 %v395_v19 }
 0x12d   : > { %2522 = vmatprep.mubr.msk.bf16.mxu0 %vm571_vm0, %v398_v20  ;;  %v302_v20 = vld [vmem:[%s3090_s24 + $0x368] sm:$0xff] }
 0x134   : > { %953 = vmatmul.mubr.bf16.gmra.mxu0 %v397_v25  ;;  %v416_v25 = vpack.c.bf16 %v304_v21, %v302_v20  ;;  %v322_v21 = vld [vmem:[%s3090_s24 + $0x408] sm:$0xff] }
 0x135   : > { %2523 = vmatprep.mubr.msk.bf16.mxu0 %vm571_vm0, %v400_v26 }
 0x13c   : > { %963 = vmatmul.mubr.bf16.gmra.mxu0 %v399_v31 }
 0x13d   : > { %2524 = vmatprep.mubr.msk.bf16.mxu0 %vm571_vm0, %v402_v32  ;;  %v306_v32 = vld [vmem:[%s3090_s24 + $0x388] sm:$0xff] }
 0x13e   : > { %v418_v36 = vpack.c.bf16 %v308_v33, %v306_v32 }
 0x144   : > { %973 = vmatmul.mubr.bf16.gmra.mxu0 %v401_v37 }
 0x145   : > { %2525 = vmatprep.mubr.msk.bf16.mxu0 %vm571_vm0, %v404_v38 }
 0x14c   : > { %983 = vmatmul.mubr.bf16.gmra.mxu0 %v403_v43  ;;  %v312_v43 = vld [vmem:[%s3090_s24 + $0x3b8] sm:$0xff] }
 0x14d   : > { %2526 = vmatprep.mubr.msk.bf16.mxu0 %vm571_vm0, %v406_v44  ;;  %v420_v46 = vpack.c.bf16 %v312_v43, %v310_v42  ;;  %v328_v42 = vld [vmem:[%s3090_s24 + $0x438] sm:$0xff] }
 0x154   : > { %993 = vmatmul.mubr.bf16.gmra.mxu0 %v405_v49  ;;  %v309_v49 = vld [vmem:[%s3090_s24 + $0x3a0] sm:$0xff] }
 0x155   : > { %2527 = vmatprep.mubr.msk.bf16.mxu0 %vm571_vm0, %v408_v50  ;;  %v311_v50 = vld [vmem:[%s3090_s24 + $0x3b0] sm:$0xff] }
 0x15c   : > { %1003 = vmatmul.mubr.bf16.gmra.mxu0 %v407_v55  ;;  %v419_v55 = vpack.c.bf16 %v311_v50, %v309_v49 }
 0x15d   : > { %2528 = vmatprep.mubr.msk.bf16.mxu0 %vm571_vm0, %v410_v56  ;;  %v422_v56 = vpack.c.bf16 %v316_v53, %v314_v52 }
 0x164   : > { %v3337_v63 = vpop.f32.mrf.mxu0  ;;  %1013 = vmatmul.mubr.bf16.gmra.mxu0 %v409_v61 }
 0x165   : > { %2529 = vmatprep.mubr.msk.bf16.mxu0 %vm571_vm0, %v412_v62  ;;  %v318_v62 = vld [vmem:[%s3090_s24 + $0x3e8] sm:$0xff] }
 0x166   : > { %v3342_v2 = vpop.f32.mrf.mxu0  ;;  %v424_v4 = vpack.c.bf16 %v320_v0, %v318_v62  ;;  %v330_v62 = vld [vmem:[%s3090_s24 + $0x448] sm:$0xff]  ;;  %v332_v0 = vld [vmem:[%s3090_s24 + $0x458] sm:$0xff] }
 0x168   : > { %v3346_v5 = vpop.f32.mrf.mxu0 }
 0x169   : > { %v1193_v7 = vpack.c.bf16 %v3346_v5, %v3337_v63  ;;  %v345_v63 = vld [vmem:[%s3090_s24 + $0x4c0] sm:$0xff]  ;;  %v347_v5 = vld [vmem:[%s3090_s24 + $0x4d0] sm:$0xff] }
 0x16a   : > { %v3350_v9 = vpop.f32.mrf.mxu0 }
 0x16b   : > { %v1194_v10 = vpack.c.bf16 %v3350_v9, %v3342_v2  ;;  %v346_v9 = vld [vmem:[%s3090_s24 + $0x4c8] sm:$0xff] }
 0x16c   : > { %v3354_v11 = vpop.f32.mrf.mxu0  ;;  %1023 = vmatmul.mubr.bf16.gmra.mxu0 %v411_v6 }
 0x16d   : > { %2530 = vmatprep.mubr.msk.bf16.mxu0 %vm571_vm0, %v414_v8 }
 0x16e   : > { %v3359_v19 = vpop.f32.mrf.mxu0 }
 0x170   : > { %v3363_v22 = vpop.f32.mrf.mxu0 }
 0x171   : > { %v1195_v24 = vpack.c.bf16 %v3363_v22, %v3354_v11  ;;  %v341_v11 = vld [vmem:[%s3090_s24 + $0x4a0] sm:$0xff]  ;;  %v343_v22 = vld [vmem:[%s3090_s24 + $0x4b0] sm:$0xff] }
 0x172   : > { %v3367_v26 = vpop.f32.mrf.mxu0 }
 0x173   : > { %v1196_v27 = vpack.c.bf16 %v3367_v26, %v3359_v19 }
 0x174   : > { %v3371_v28 = vpop.f32.mrf.mxu0  ;;  %1033 = vmatmul.mubr.bf16.gmra.mxu0 %v413_v23  ;;  %v324_v23 = vld [vmem:[%s3090_s24 + $0x418] sm:$0xff] }
 0x175   : > { %2531 = vmatprep.mubr.msk.bf16.mxu0 %vm571_vm0, %v416_v25  ;;  %v426_v30 = vpack.c.bf16 %v324_v23, %v322_v21 }
 0x176   : > { %v3376_v31 = vpop.f32.mrf.mxu0 }
 0x178   : > { %v3380_v34 = vpop.f32.mrf.mxu0 }
 0x17a   : > { %v3382_v37 = vpop.f32.mrf.mxu0 }
 0x17c   : > { %v3384_v38 = vpop.f32.mrf.mxu0  ;;  %1043 = vmatmul.mubr.bf16.gmra.mxu0 %v415_v35  ;;  %v321_v35 = vld [vmem:[%s3090_s24 + $0x400] sm:$0xff] }
 0x17d   : > { %2532 = vmatprep.mubr.msk.bf16.mxu0 %vm571_vm0, %v418_v36  ;;  %v323_v36 = vld [vmem:[%s3090_s24 + $0x410] sm:$0xff] }
 0x17e   : > { %v3389_v41 = vpop.f32.mrf.mxu0 }
 0x180   : > { %v3393_v44 = vpop.f32.mrf.mxu0 }
 0x182   : > { %v3395_v47 = vpop.f32.mrf.mxu0 }
 0x184   : > { %v3397_v48 = vpop.f32.mrf.mxu0  ;;  %1053 = vmatmul.mubr.bf16.gmra.mxu0 %v417_v45  ;;  %v425_v45 = vpack.c.bf16 %v323_v36, %v321_v35  ;;  %v1199_v36 = vpack.c.bf16 %v3393_v44, %v3384_v38  ;;  %v1197_v38 = vpack.c.bf16 %v3380_v34, %v3371_v28  ;;  %v339_v28 = vld [vmem:[%s3090_s24 + $0x490] sm:$0xff] }
 0x185   : > { %2533 = vmatprep.mubr.msk.bf16.mxu0 %vm571_vm0, %v420_v46  ;;  %v428_v46 = vpack.c.bf16 %v328_v42, %v326_v40  ;;  %v335_v40 = vld [vmem:[%s3090_s24 + $0x470] sm:$0xff]  ;;  %v340_v42 = vld [vmem:[%s3090_s24 + $0x498] sm:$0xff] }
 0x186   : > { %v3402_v51 = vpop.f32.mrf.mxu0 }
 0x188   : > { %v3406_v54 = vpop.f32.mrf.mxu0 }
 0x18a   : > { %v3408_v57 = vpop.f32.mrf.mxu0 }
 0x18c   : > { %v3410_v58 = vpop.f32.mrf.mxu0  ;;  %1063 = vmatmul.mubr.bf16.gmra.mxu0 %v419_v55 }
 0x18d   : > { %2534 = vmatprep.mubr.msk.bf16.mxu0 %vm571_vm0, %v422_v56  ;;  %v325_v56 = vld [vmem:[%s3090_s24 + $0x420] sm:$0xff] }
 0x18e   : > { %v826_v61 = vpop.f32.mrf.mxu0  ;;  %v427_v12 = vpack.c.bf16 %v327_v59, %v325_v56  ;;  %v435_v56 = vpack.c.bf16 %v343_v22, %v341_v11 }
 0x190   : > { %v828_v1 = vpop.f32.mrf.mxu0 }
 0x191   : > { %v1203_v23 = vpack.c.bf16 %v828_v1, %v3410_v58  ;;  %v1201_v58 = vpack.c.bf16 %v3406_v54, %v3397_v48  ;;  %v1198_v48 = vpack.c.bf16 %v3382_v37, %v3376_v31  ;;  %v333_v54 = vld [vmem:[%s3090_s24 + $0x460] sm:$0xff] }
 0x192   : > { %v830_v6 = vpop.f32.mrf.mxu0  ;;  %v431_v31 = vpack.c.bf16 %v335_v40, %v333_v54 }
 0x193   : > { %v1204_v13 = vpack.c.bf16 %v830_v6, %v826_v61  ;;  %v334_v61 = vld [vmem:[%s3090_s24 + $0x468] sm:$0xff]  ;;  %v336_v6 = vld [vmem:[%s3090_s24 + $0x478] sm:$0xff] }
 0x194   : > { %v834_v8 = vpop.f32.mrf.mxu0  ;;  %1073 = vmatmul.mubr.bf16.gmra.mxu0 %v421_v3 }
 0x195   : > { %2535 = vmatprep.mubr.msk.bf16.mxu0 %vm571_vm0, %v424_v4 }
 0x196   : > { %v836_v20 = vpop.f32.mrf.mxu0 }
 0x198   : > { %v838_v25 = vpop.f32.mrf.mxu0 }
 0x199   : > { %v1205_v3 = vpack.c.bf16 %v838_v25, %v834_v8  ;;  %v329_v8 = vld [vmem:[%s3090_s24 + $0x440] sm:$0xff]  ;;  %v331_v25 = vld [vmem:[%s3090_s24 + $0x450] sm:$0xff] }
 0x19a   : > { %v840_v32 = vpop.f32.mrf.mxu0 }
 0x19b   : > { %v1206_v55 = vpack.c.bf16 %v840_v32, %v836_v20  ;;  %v430_v20 = vpack.c.bf16 %v332_v0, %v330_v62 }
 0x19c   : > { %v844_v33 = vpop.f32.mrf.mxu0  ;;  %1083 = vmatmul.mubr.bf16.gmra.mxu0 %v423_v29 }
 0x19d   : > { %2536 = vmatprep.mubr.msk.bf16.mxu0 %vm571_vm0, %v426_v30  ;;  %v1202_v30 = vpack.c.bf16 %v3408_v57, %v3402_v51  ;;  %v1200_v51 = vpack.c.bf16 %v3395_v47, %v3389_v41  ;;  %v432_v57 = vpack.c.bf16 %v336_v6, %v334_v61  ;;  %v338_v47 = vld [vmem:[%s3090_s24 + $0x488] sm:$0xff] }
 0x19e   : > { %v846_v39 = vpop.f32.mrf.mxu0  ;;  %v434_v37 = vpack.c.bf16 %v340_v42, %v338_v47 }
 0x1a0   : > { %v848_v43 = vpop.f32.mrf.mxu0 }
 0x1a1   : > { %v1207_v52 = vpack.c.bf16 %v848_v43, %v844_v33  ;;  %v429_v33 = vpack.c.bf16 %v331_v25, %v329_v8 }
 0x1a2   : > { %v850_v49 = vpop.f32.mrf.mxu0 }
 0x1a3   : > { %v1208_v50 = vpack.c.bf16 %v850_v49, %v846_v39  ;;  %v342_v49 = vld [vmem:[%s3090_s24 + $0x4a8] sm:$0xff] }
 0x1a4   : > { %v3427_v53 = vpop.f32.mrf.mxu0  ;;  %1093 = vmatmul.mubr.bf16.gmra.mxu0 %v425_v45 }
 0x1a5   : > { %1277 = vmatprep.subr.bf16.mxu1 %v1208_v50  ;;  %2537 = vmatprep.mubr.msk.bf16.mxu0 %vm571_vm0, %v428_v46  ;;  %v337_v46 = vld [vmem:[%s3090_s24 + $0x480] sm:$0xff]  ;;  %v344_v50 = vld [vmem:[%s3090_s24 + $0x4b8] sm:$0xff] }
 0x1a6   : > { %v3432_v60 = vpop.f32.mrf.mxu0  ;;  %1278 = vmatpush1.bf16.msra.mxu1 %v1207_v52  ;;  %v433_v26 = vpack.c.bf16 %v339_v28, %v337_v46 }
 0x1a7   : > { %1279 = vmatprep.subr.bf16.mxu1 %v1206_v55 }
 0x1a8   : > { %v3436_v4 = vpop.f32.mrf.mxu0 }
 0x1aa   : > { %v3438_v21 = vpop.f32.mrf.mxu0  ;;  %1280 = vmatpush1.bf16.msra.mxu1 %v1205_v3  ;;  %v350_v3 = vld [vmem:[%s3090_s24 + $0x4e8] sm:$0xff] }
 0x1ab   : > { %1281 = vmatprep.subr.bf16.mxu1 %v1204_v13 }
 0x1ac   : > { %v3441_v29 = vpop.f32.mrf.mxu0  ;;  %1103 = vmatmul.mubr.bf16.gmra.mxu0 %v427_v12  ;;  %v352_v12 = vld [vmem:[%s3090_s24 + $0x4f8] sm:$0xff] }
 0x1ad   : > { %2538 = vmatprep.mubr.msk.bf16.mxu0 %vm571_vm0, %v430_v20  ;;  %v437_v20 = vpack.c.bf16 %v347_v5, %v345_v63 }
 0x1ae   : > { %v3448_v32 = vpop.f32.mrf.mxu0  ;;  %1282 = vmatpush1.bf16.msra.mxu1 %v1203_v23  ;;  %v440_v23 = vpack.c.bf16 %v352_v12, %v350_v3  ;;  %v3597_v12 = vld [vmem:[%s4257_s0 + $0x44] ss:$8 sps:$4 sm:$0xff]  }
 0x1af   : > { %1283 = vmatprep.subr.bf16.mxu1 %v1202_v30  ;;  %4272 = vst [vmem:[#allocation7_spill] sm:$0xff] %v3597_v12 }
 0x1b0   : > { %v3454_v1 = vpop.f32.mrf.mxu0 }
 0x1b2   : > { %v3458_v35 = vpop.f32.mrf.mxu0  ;;  %1284 = vmatpush1.bf16.msra.mxu1 %v1201_v58  ;;  %v349_v58 = vld [vmem:[%s3090_s24 + $0x4e0] sm:$0xff] }
 0x1b3   : > { %1285 = vmatprep.subr.bf16.mxu1 %v1200_v51 }
 0x1b4   : > { %v3462_v39 = vpop.f32.mrf.mxu0  ;;  %1113 = vmatmul.mubr.bf16.gmra.mxu0 %v429_v33  ;;  %v351_v33 = vld [vmem:[%s3090_s24 + $0x4f0] sm:$0xff] }
 0x1b5   : > { %2539 = vmatprep.mubr.msk.bf16.mxu0 %vm571_vm0, %v432_v57  ;;  %v354_v57 = vld [vmem:[%s3090_s24 + $0x508] sm:$0xff]  ;;  %v439_v40 = vpack.c.bf16 %v351_v33, %v349_v58 }
 0x1b6   : > { %v3469_v41 = vpop.f32.mrf.mxu0  ;;  %1286 = vmatpush1.bf16.msra.mxu1 %v1199_v36  ;;  %v356_v36 = vld [vmem:[%s3090_s24 + $0x518] sm:$0xff] }
 0x1b7   : > { %1287 = vmatprep.subr.bf16.mxu1 %v1198_v48 }
 0x1b8   : > { %v3475_v44 = vpop.f32.mrf.mxu0 }
 0x1ba   : > { %v3477_v43 = vpop.f32.mrf.mxu0  ;;  %1288 = vmatpush1.bf16.msra.mxu1 %v1197_v38  ;;  %v442_v38 = vpack.c.bf16 %v356_v36, %v354_v57 }
 0x1bb   : > { %1289 = vmatprep.subr.bf16.mxu1 %v1196_v27  ;;  %v436_v27 = vpack.c.bf16 %v344_v50, %v342_v49  ;;  %v353_v49 = vld [vmem:[%s3090_s24 + $0x500] sm:$0xff]  ;;  %v355_v50 = vld [vmem:[%s3090_s24 + $0x510] sm:$0xff] }
 0x1bc   : > { %v3482_v45 = vpop.f32.mrf.mxu0  ;;  %1123 = vmatmul.mubr.bf16.gmra.mxu0 %v431_v31 }
 0x1bd   : > { %2540 = vmatprep.mubr.msk.bf16.mxu0 %vm571_vm0, %v434_v37 }
 0x1be   : > { %v886_v34 = vpop.f32.mrf.mxu0  ;;  %1290 = vmatpush1.bf16.msra.mxu1 %v1195_v24 }
 0x1bf   : > { %1291 = vmatprep.subr.bf16.mxu1 %v1194_v10  ;;  %v348_v10 = vld [vmem:[%s3090_s24 + $0x4d8] sm:$0xff] }
 0x1c0   : > { %v888_v19 = vpop.f32.mrf.mxu0  ;;  %v438_v59 = vpack.c.bf16 %v348_v10, %v346_v9  ;;  %v359_v9 = vld [vmem:[%s3090_s24 + $0x530] sm:$0xff] }
 0x1c1   : > { %v1215_v46 = vpack.c.bf16 %v888_v19, %v3482_v45  ;;  %v1213_v45 = vpack.c.bf16 %v3475_v44, %v3462_v39  ;;  %v1211_v39 = vpack.c.bf16 %v3454_v1, %v3441_v29 }
 0x1c2   : > { %v890_v52 = vpop.f32.mrf.mxu0  ;;  %1292 = vmatpush1.bf16.msra.mxu1 %v1193_v7 }
 0x1c3   : > { %v1216_v47 = vpack.c.bf16 %v890_v52, %v886_v34  ;;  %v1214_v34 = vpack.c.bf16 %v3477_v43, %v3469_v41  ;;  %v360_v52 = vld [vmem:[%s3090_s24 + $0x538] sm:$0xff]  ;;  %v1212_v41 = vpack.c.bf16 %v3458_v35, %v3448_v32  ;;  %v1210_v32 = vpack.c.bf16 %v3438_v21, %v3432_v60  ;;  %v357_v35 = vld [vmem:[%s3090_s24 + $0x520] sm:$0xff] }
 0x1c4   : > { %v894_v55 = vpop.f32.mrf.mxu0  ;;  %1133 = vmatmul.mubr.bf16.gmra.mxu0 %v433_v26  ;;  %v443_v29 = vpack.c.bf16 %v359_v9, %v357_v35 }
 0x1c5   : > { %2541 = vmatprep.mubr.msk.bf16.mxu0 %vm571_vm0, %v436_v27  ;;  %v358_v27 = vld [vmem:[%s3090_s24 + $0x528] sm:$0xff] }
 0x1c6   : > { %v896_v2 = vpop.f32.mrf.mxu0  ;;  %v444_v11 = vpack.c.bf16 %v360_v52, %v358_v27 }
 0x1c8   : > { %v898_v24 = vpop.f32.mrf.mxu0 }
 0x1c9   : > { %v1217_v48 = vpack.c.bf16 %v898_v24, %v894_v55  ;;  %v441_v55 = vpack.c.bf16 %v355_v50, %v353_v49  ;;  %v1209_v24 = vpack.c.bf16 %v3436_v4, %v3427_v53 }
 0x1ca   : > { %v900_v62 = vpop.f32.mrf.mxu0 }
 0x1cb   : > { %v1218_v6 = vpack.c.bf16 %v900_v62, %v896_v2 }
 0x1cc   : > { %v904_v0 = vpop.f32.mrf.mxu0  ;;  %1143 = vmatmul.mubr.bf16.gmra.mxu0 %v435_v56 }
 0x1cd   : > { %2542 = vmatprep.mubr.msk.bf16.mxu0 %vm571_vm0, %v438_v59 }
 0x1ce   : > { %v906_v7 = vpop.f32.mrf.mxu0 }
 0x1d0   : > { %v908_v13 = vpop.f32.mrf.mxu0 }
 0x1d1   : > { %v1219_v25 = vpack.c.bf16 %v908_v13, %v904_v0 }
 0x1d2   : > { %v910_v30 = vpop.f32.mrf.mxu0 }
 0x1d3   : > { %v1220_v8 = vpack.c.bf16 %v910_v30, %v906_v7  ;;  %v3604_v30 = vld [vmem:[%s4257_s0 + $0x40] ss:$8 sps:$4 sm:$0xff]  }
 0x1d4   : > { %v3508_v61 = vpop.f32.mrf.mxu0  ;;  %1153 = vmatmul.mubr.bf16.gmra.mxu0 %v437_v20  ;;  %4273 = vst [vmem:[#allocation8_spill] sm:$0xff] %v3604_v30 }
 0x1d5   : > { %1297 = vmatprep.subr.bf16.mxu1 %v1220_v8  ;;  %2543 = vmatprep.mubr.msk.bf16.mxu0 %vm571_vm0, %v440_v23 }
 0x1d6   : > { %v3513_v51 = vpop.f32.mrf.mxu0  ;;  %1298 = vmatpush2.bf16.msra.mxu1 %v1219_v25  ;;  %v3610_v25 = vld [vmem:[%s4257_s0 + $0x54] ss:$8 sps:$4 sm:$0xff]  }
 0x1d7   : > { %1299 = vmatprep.subr.bf16.mxu1 %v1218_v6  ;;  %4274 = vst [vmem:[#allocation9_spill] sm:$0xff] %v3610_v25 }
 0x1d8   : > { %v3517_v54 = vpop.f32.mrf.mxu0 }
 0x1d9   : > { %v1221_v42 = vpack.c.bf16 %v3517_v54, %v3508_v61 }
 0x1da   : > { %v3521_v31 = vpop.f32.mrf.mxu0  ;;  %1300 = vmatpush2.bf16.msra.mxu1 %v1217_v48 }
 0x1db   : > { %v1222_v37 = vpack.c.bf16 %v3521_v31, %v3513_v51  ;;  %1301 = vmatprep.subr.bf16.mxu1 %v1216_v47  ;;  %v3717_v51 = vld [vmem:[%s4257_s0 + $0xa4] ss:$8 sps:$4 sm:$0xff]  }
 0x1dc   : > { %v3526_v28 = vpop.f32.mrf.mxu0  ;;  %1163 = vmatmul.mubr.bf16.gmra.mxu0 %v439_v40  ;;  %v3619_v40 = vld [vmem:[%s4257_s0 + $0x50] ss:$8 sps:$4 sm:$0xff]  }
 0x1dd   : > { %2544 = vmatprep.mubr.msk.bf16.mxu0 %vm571_vm0, %v442_v38  ;;  %v3627_v38 = vld [vmem:[%s4257_s0 + $0x64] ss:$8 sps:$4 sm:$0xff]  }
 0x1de   : > { %v3533_v26 = vpop.f32.mrf.mxu0  ;;  %1302 = vmatpush2.bf16.msra.mxu1 %v1215_v46 }
 0x1df   : > { %1303 = vmatprep.subr.bf16.mxu1 %v1214_v34 }
 0x1e0   : > { %v3539_v19 = vpop.f32.mrf.mxu0 }
 0x1e1   : > { %v1223_v43 = vpack.c.bf16 %v3539_v19, %v3526_v28  ;;  %v3711_v19 = vld [vmem:[%s4257_s0 + $0x90] ss:$8 sps:$4 sm:$0xff]  }
 0x1e2   : > { %v3545_v22 = vpop.f32.mrf.mxu0  ;;  %1304 = vmatpush2.bf16.msra.mxu1 %v1213_v45 }
 0x1e3   : > { %v1224_v2 = vpack.c.bf16 %v3545_v22, %v3533_v26  ;;  %1305 = vmatprep.subr.bf16.mxu1 %v1212_v41 }
 0x1e4   : > { %v3551_v44 = vpop.f32.mrf.mxu0  ;;  %1173 = vmatmul.mubr.bf16.gmra.mxu0 %v441_v55  ;;  %v3640_v55 = vld [vmem:[%s4257_s0 + $0x60] ss:$8 sps:$4 sm:$0xff]  }
 0x1e5   : > { %2545 = vmatprep.mubr.msk.bf16.mxu0 %vm571_vm0, %v444_v11  ;;  %v3648_v11 = vld [vmem:[%s4257_s0 + $0x74] ss:$8 sps:$4 sm:$0xff]  }
 0x1e6   : > { %v3558_v10 = vpop.f32.mrf.mxu0  ;;  %1306 = vmatpush2.bf16.msra.mxu1 %v1211_v39 }
 0x1e7   : > { %1307 = vmatprep.subr.bf16.mxu1 %v1210_v32 }
 0x1e8   : > { %v3562_v56 = vpop.f32.mrf.mxu0 }
 0x1ea   : > { %v3564_v1 = vpop.f32.mrf.mxu0  ;;  %1308 = vmatpush2.bf16.msra.mxu1 %v1209_v24 }
 0x1ec   : > { %v3566_v59 = vpop.f32.mrf.mxu0  ;;  %1183 = vmatmul.mubr.bf16.gmra.mxu0 %v443_v29 }
 0x1ed   : > { %1310 = vmatmul.mubr.bf16.vlgmr.msra.gmra.mxu1 %v3168_v18 }
 0x1ee   : > { %v3569_v60 = vpop.f32.mrf.mxu0  ;;  %2547 = vmatprep.mubr.msk.bf16.mxu1 %vm571_vm0, %v3153_v16  ;;  %v3584_v16 = vld [vmem:[%s4257_s0 + $0x34] ss:$8 sps:$4 sm:$0xff]  }
 0x1ef   : > { %4270 = vst [vmem:[#allocation5_spill] sm:$0xff] %v3584_v16 }
 0x1f0   : > { %v3573_v21 = vpop.f32.mrf.mxu0 }
 0x1f1   : > { %v1227_v24 = vpack.c.bf16 %v3573_v21, %v3566_v59 }
 0x1f2   : > { %v3575_v62 = vpop.f32.mrf.mxu0 }
 0x1f3   : > { %v1228_v35 = vpack.c.bf16 %v3575_v62, %v3569_v60  ;;  %v3675_v62 = vld [vmem:[%s4257_s0 + $0x84] ss:$8 sps:$4 sm:$0xff]  }
 0x1f4   : > { %v954_v53 = vpop.f32.mrf.mxu0 }
 0x1f5   : > { %1320 = vmatmul.mubr.bf16.gmra.mxu1 %v3161_v17 }
 0x1f6   : > { %v956_v4 = vpop.f32.mrf.mxu0  ;;  %2548 = vmatprep.mubr.msk.bf16.mxu1 %vm571_vm0, %v3141_v14  ;;  %v3591_v14 = vld [vmem:[%s4257_s0 + $0x30] ss:$8 sps:$4 sm:$0xff]  }
 0x1f7   : > { %4271 = vst [vmem:[#allocation6_spill] sm:$0xff] %v3591_v14 }
 0x1f8   : > { %v958_v0 = vpop.f32.mrf.mxu0 }
 0x1f9   : > { %v1229_v39 = vpack.c.bf16 %v958_v0, %v954_v53  ;;  %v3667_v53 = vld [vmem:[%s4257_s0 + $0x70] ss:$8 sps:$4 sm:$0xff]   ;;  %v3689_v0 = vld [vmem:[%s4257_s0 + $0x80] ss:$8 sps:$4 sm:$0xff]  }
 0x1fa   : > { %v960_v63 = vpop.f32.mrf.mxu0 }
 0x1fb   : > { %v1230_v45 = vpack.c.bf16 %v960_v63, %v956_v4  ;;  %v1226_v4 = vpack.c.bf16 %v3564_v1, %v3558_v10  ;;  %v1225_v10 = vpack.c.bf16 %v3562_v56, %v3551_v44  ;;  %v3698_v44 = vld [vmem:[%s4257_s0 + $0x94] ss:$8 sps:$4 sm:$0xff]  }
 0x1fc   : > { %v964_v5 = vpop.f32.mrf.mxu0 }
 0x1fd   : > { %1330 = vmatmul.mubr.bf16.gmra.mxu1 %v3148_v15 }
 0x1fe   : > { %v966_v18 = vpop.f32.mrf.mxu0  ;;  %2549 = vmatprep.mubr.msk.bf16.mxu1 %vm571_vm0, %v3584_v16 }
 0x200   : > { %v968_v7 = vpop.f32.mrf.mxu0 }
 0x201   : > { %v1231_v27 = vpack.c.bf16 %v968_v7, %v964_v5 }
 0x202   : > { %v970_v17 = vpop.f32.mrf.mxu0 }
 0x203   : > { %v1232_v49 = vpack.c.bf16 %v970_v17, %v966_v18 }
 0x204   : > { %v974_v3 = vpop.f32.mrf.mxu0 }
 0x205   : > { %1340 = vmatmul.mubr.bf16.gmra.mxu1 %v3591_v14 }
 0x206   : > { %v976_v15 = vpop.f32.mrf.mxu0  ;;  %2550 = vmatprep.mubr.msk.bf16.mxu1 %vm571_vm0, %v3597_v12 }
 0x208   : > { %v978_v13 = vpop.f32.mrf.mxu0 }
 0x209   : > { %v1233_v46 = vpack.c.bf16 %v978_v13, %v974_v3 }
 0x20a   : > { %v980_v20 = vpop.f32.mrf.mxu0 }
 0x20b   : > { %v1234_v48 = vpack.c.bf16 %v980_v20, %v976_v15  ;;  %v3739_v15 = vld [vmem:[%s4257_s0 + $0xb0] ss:$8 sps:$4 sm:$0xff]   ;;  %v3747_v20 = vld [vmem:[%s4257_s0 + $0xc4] ss:$8 sps:$4 sm:$0xff]  }
 0x20c   : > { %v984_v23 = vpop.f32.mrf.mxu0 }
 0x20d   : > { %1350 = vmatmul.mubr.bf16.gmra.mxu1 %v3604_v30 }
 0x20e   : > { %v986_v8 = vpop.f32.mrf.mxu0  ;;  %2551 = vmatprep.mubr.msk.bf16.mxu1 %vm571_vm0, %v3610_v25 }
 0x210   : > { %v988_v6 = vpop.f32.mrf.mxu0 }
 0x211   : > { %v1235_v57 = vpack.c.bf16 %v988_v6, %v984_v23 }
 0x212   : > { %v990_v58 = vpop.f32.mrf.mxu0 }
 0x213   : > { %v1236_v33 = vpack.c.bf16 %v990_v58, %v986_v8 }
 0x214   : > { %v3614_v36 = vpop.f32.mrf.mxu0 }
 0x215   : > { %1649 = vmatprep.subr.bf16.mxu1 %v1236_v33  ;;  %1360 = vmatmul.mubr.bf16.gmra.mxu1 %v3619_v40 }
 0x216   : > { %v3622_v47 = vpop.f32.mrf.mxu0  ;;  %1650 = vmatpush1.bf16.msra.mxu1 %v1235_v57  ;;  %2552 = vmatprep.mubr.msk.bf16.mxu1 %vm571_vm0, %v3627_v38 }
 0x217   : > { %1651 = vmatprep.subr.bf16.mxu1 %v1234_v48 }
 0x218   : > { %v3631_v34 = vpop.f32.mrf.mxu0 }
 0x21a   : > { %v3633_v50 = vpop.f32.mrf.mxu0  ;;  %1652 = vmatpush1.bf16.msra.mxu1 %v1233_v46 }
 0x21b   : > { %1653 = vmatprep.subr.bf16.mxu1 %v1232_v49 }
 0x21c   : > { %v3635_v52 = vpop.f32.mrf.mxu0 }
 0x21d   : > { %1370 = vmatmul.mubr.bf16.gmra.mxu1 %v3640_v55 }
 0x21e   : > { %v3643_v41 = vpop.f32.mrf.mxu0  ;;  %1654 = vmatpush1.bf16.msra.mxu1 %v1231_v27  ;;  %2553 = vmatprep.mubr.msk.bf16.mxu1 %vm571_vm0, %v3648_v11  ;;  %v3765_v27 = vld [vmem:[%s4257_s0 + $0xc0] ss:$8 sps:$4 sm:$0xff]  }
 0x21f   : > { %1655 = vmatprep.subr.bf16.mxu1 %v1230_v45 }
 0x220   : > { %v3652_v32 = vpop.f32.mrf.mxu0 }
 0x222   : > { %v3656_v9 = vpop.f32.mrf.mxu0  ;;  %1656 = vmatpush1.bf16.msra.mxu1 %v1229_v39  ;;  %v3773_v39 = vld [vmem:[%s4257_s0 + $0xd4] ss:$8 sps:$4 sm:$0xff]  }
 0x223   : > { %1657 = vmatprep.subr.bf16.mxu1 %v1228_v35 }
 0x224   : > { %v3660_v29 = vpop.f32.mrf.mxu0 }
 0x225   : > { %1380 = vmatmul.mubr.bf16.gmra.mxu1 %v3667_v53 }
 0x226   : > { %v3670_v60 = vpop.f32.mrf.mxu0  ;;  %1658 = vmatpush1.bf16.msra.mxu1 %v1227_v24  ;;  %2554 = vmatprep.mubr.msk.bf16.mxu1 %vm571_vm0, %v3675_v62 }
 0x227   : > { %1659 = vmatprep.subr.bf16.mxu1 %v1226_v4  ;;  %v1240_v4 = vpack.c.bf16 %v3656_v9, %v3643_v41  ;;  %v3798_v41 = vld [vmem:[%s4257_s0 + $0xd0] ss:$8 sps:$4 sm:$0xff]  }
 0x228   : > { %v3681_v1 = vpop.f32.mrf.mxu0 }
 0x229   : > { %v1241_v35 = vpack.c.bf16 %v3681_v1, %v3660_v29  ;;  %v1238_v29 = vpack.c.bf16 %v3633_v50, %v3622_v47  ;;  %v3806_v1 = vld [vmem:[%s4257_s0 + $0x4] ss:$8 sps:$4 sm:$0xff]   ;;  %v1237_v47 = vpack.c.bf16 %v3631_v34, %v3614_v36 }
 0x22a   : > { %v1020_v59 = vpop.f32.mrf.mxu0  ;;  %1660 = vmatpush1.bf16.msra.mxu1 %v1225_v10 }
 0x22b   : > { %1661 = vmatprep.subr.bf16.mxu1 %v1224_v2  ;;  %v3730_v2 = vld [vmem:[%s4257_s0 + $0xb4] ss:$8 sps:$4 sm:$0xff]   ;;  %v1242_v49 = vpack.c.bf16 %v1020_v59, %v3670_v60 }
 0x22c   : > { %v1024_v21 = vpop.f32.mrf.mxu0 }
 0x22d   : > { %1390 = vmatmul.mubr.bf16.gmra.mxu1 %v3689_v0 }
 0x22e   : > { %v1026_v63 = vpop.f32.mrf.mxu0  ;;  %1662 = vmatpush1.bf16.msra.mxu1 %v1223_v43  ;;  %2555 = vmatprep.mubr.msk.bf16.mxu1 %vm571_vm0, %v3698_v44 }
 0x22f   : > { %1663 = vmatprep.subr.bf16.mxu1 %v1222_v37 }
 0x230   : > { %v1028_v26 = vpop.f32.mrf.mxu0 }
 0x231   : > { %v1243_v48 = vpack.c.bf16 %v1028_v26, %v1024_v21  ;;  %v1239_v21 = vpack.c.bf16 %v3652_v32, %v3635_v52  ;;  %v3821_v26 = vld [vmem:[%s4257_s0] ss:$8 sps:$4 sm:$0xff]  }
 0x232   : > { %v1030_v22 = vpop.f32.mrf.mxu0  ;;  %1664 = vmatpush1.bf16.msra.mxu1 %v1221_v42  ;;  %v3724_v42 = vld [vmem:[%s4257_s0 + $0xa0] ss:$8 sps:$4 sm:$0xff]  }
 0x233   : > { %v1244_v6 = vpack.c.bf16 %v1030_v22, %v1026_v63 }
 0x234   : > { %v1034_v28 = vpop.f32.mrf.mxu0 }
 0x235   : > { %1400 = vmatmul.mubr.bf16.gmra.mxu1 %v3711_v19 }
 0x236   : > { %v1036_v43 = vpop.f32.mrf.mxu0  ;;  %2556 = vmatprep.mubr.msk.bf16.mxu1 %vm571_vm0, %v3717_v51 }
 0x238   : > { %v1038_v31 = vpop.f32.mrf.mxu0 }
 0x239   : > { %v1245_v23 = vpack.c.bf16 %v1038_v31, %v1034_v28  ;;  %v3827_v28 = vld [vmem:[%s4257_s0 + $0x14] ss:$8 sps:$4 sm:$0xff]   ;;  %v3836_v31 = vld [vmem:[%s4257_s0 + $0x10] ss:$8 sps:$4 sm:$0xff]  }
 0x23a   : > { %v1040_v61 = vpop.f32.mrf.mxu0 }
 0x23b   : > { %v1246_v3 = vpack.c.bf16 %v1040_v61, %v1036_v43 }
 0x23c   : > { %v1044_v54 = vpop.f32.mrf.mxu0 }
 0x23d   : > { %1410 = vmatmul.mubr.bf16.gmra.mxu1 %v3724_v42 }
 0x23e   : > { %v1046_v37 = vpop.f32.mrf.mxu0  ;;  %2557 = vmatprep.mubr.msk.bf16.mxu1 %vm571_vm0, %v3730_v2 }
 0x240   : > { %v1048_v56 = vpop.f32.mrf.mxu0 }
 0x241   : > { %v1247_v7 = vpack.c.bf16 %v1048_v56, %v1044_v54  ;;  %v3842_v54 = vld [vmem:[%s4257_s0 + $0x24] ss:$8 sps:$4 sm:$0xff]  }
 0x242   : > { %v1050_v5 = vpop.f32.mrf.mxu0 }
 0x243   : > { %v1248_v18 = vpack.c.bf16 %v1050_v5, %v1046_v37 }
 0x244   : > { %v3734_v17 = vpop.f32.mrf.mxu0 }
 0x245   : > { %1669 = vmatprep.subr.bf16.mxu1 %v1248_v18  ;;  %1420 = vmatmul.mubr.bf16.gmra.mxu1 %v3739_v15  ;;  %v3849_v18 = vld [vmem:[%s4257_s0 + $0x20] ss:$8 sps:$4 sm:$0xff]  }
 0x246   : > { %v3742_v13 = vpop.f32.mrf.mxu0  ;;  %1670 = vmatpush2.bf16.msra.mxu1 %v1247_v7  ;;  %2558 = vmatprep.mubr.msk.bf16.mxu1 %vm571_vm0, %v3747_v20 }
 0x247   : > { %1671 = vmatprep.subr.bf16.mxu1 %v1246_v3 }
 0x248   : > { %v3751_v8 = vpop.f32.mrf.mxu0 }
 0x24a   : > { %v3755_v33 = vpop.f32.mrf.mxu0  ;;  %1672 = vmatpush2.bf16.msra.mxu1 %v1245_v23 }
 0x24b   : > { %1673 = vmatprep.subr.bf16.mxu1 %v1244_v6 }
 0x24c   : > { %v3759_v46 = vpop.f32.mrf.mxu0 }
 0x24d   : > { %1430 = vmatmul.mubr.bf16.gmra.mxu1 %v3765_v27 }
 0x24e   : > { %v3768_v45 = vpop.f32.mrf.mxu0  ;;  %1674 = vmatpush2.bf16.msra.mxu1 %v1243_v48  ;;  %2559 = vmatprep.mubr.msk.bf16.mxu1 %vm571_vm0, %v3773_v39 }
 0x24f   : > { %1675 = vmatprep.subr.bf16.mxu1 %v1242_v49 }
 0x250   : > { %v3779_v24 = vpop.f32.mrf.mxu0 }
 0x252   : > { %v3785_v10 = vpop.f32.mrf.mxu0  ;;  %1676 = vmatpush2.bf16.msra.mxu1 %v1241_v35 }
 0x253   : > { %1677 = vmatprep.subr.bf16.mxu1 %v1240_v4 }
 0x254   : > { %v3791_v63 = vpop.f32.mrf.mxu0 }
 0x255   : > { %1440 = vmatmul.mubr.bf16.gmra.mxu1 %v3798_v41 }
 0x256   : > { %v3801_v9 = vpop.f32.mrf.mxu0  ;;  %1678 = vmatpush2.bf16.msra.mxu1 %v1239_v21  ;;  %2588 = vmatprep.mubr.msk.bf16.mxu1 %vm571_vm0, %v3806_v1 }
 0x257   : > { %1679 = vmatprep.subr.bf16.mxu1 %v1238_v29 }
 0x258   : > { %v3812_v50 = vpop.f32.mrf.mxu0 }
 0x25a   : > { %v3814_v52 = vpop.f32.mrf.mxu0  ;;  %1680 = vmatpush2.bf16.msra.mxu1 %v1237_v47 }
 0x25c   : > { %v3816_v32 = vpop.f32.mrf.mxu0 }
 0x25d   : > { %1682 = vmatmul.mubr.bf16.vlgmr.msra.gmra.mxu1 %v3821_v26 }
 0x25e   : > { %v1086_v22 = vpop.f32.mrf.mxu0  ;;  %2589 = vmatprep.mubr.msk.bf16.mxu1 %vm571_vm0, %v3827_v28 }
 0x260   : > { %v3831_v36 = vpop.f32.mrf.mxu0 }
 0x262   : > { %v1090_v34 = vpop.f32.mrf.mxu0 }
 0x264   : > { %v1094_v43 = vpop.f32.mrf.mxu0 }
 0x265   : > { %1692 = vmatmul.mubr.bf16.gmra.mxu1 %v3836_v31 }
 0x266   : > { %v1096_v61 = vpop.f32.mrf.mxu0  ;;  %2590 = vmatprep.mubr.msk.bf16.mxu1 %vm571_vm0, %v3842_v54 }
 0x268   : > { %v1098_v37 = vpop.f32.mrf.mxu0 }
 0x26a   : > { %v1100_v56 = vpop.f32.mrf.mxu0 }
 0x26c   : > { %v1104_v5 = vpop.f32.mrf.mxu0 }
 0x26d   : > { %1702 = vmatmul.mubr.bf16.gmra.mxu1 %v3849_v18 }
 0x26e   : > { %v1106_v7 = vpop.f32.mrf.mxu0  ;;  %2591 = vmatprep.mubr.msk.bf16.mxu1 %vm571_vm0, %v3584_v16 }
 0x270   : > { %v1108_v3 = vpop.f32.mrf.mxu0 }
 0x272   : > { %v1110_v23 = vpop.f32.mrf.mxu0 }
 0x274   : > { %v1114_v6 = vpop.f32.mrf.mxu0 }
 0x275   : > { %1712 = vmatmul.mubr.bf16.gmra.mxu1 %v3591_v14 }
 0x276   : > { %v1116_v48 = vpop.f32.mrf.mxu0  ;;  %2592 = vmatprep.mubr.msk.bf16.mxu1 %vm571_vm0, %v3597_v12 }
 0x278   : > { %v1118_v49 = vpop.f32.mrf.mxu0 }
 0x27a   : > { %v1120_v35 = vpop.f32.mrf.mxu0 }
 0x27b   : > { %v1262_v59 = vpack.c.bf16 %v1120_v35, %v1116_v48 }
 0x27c   : > { %v1124_v4 = vpop.f32.mrf.mxu0 }
 0x27d   : > { %1722 = vmatmul.mubr.bf16.gmra.mxu1 %v3604_v30  ;;  %v1261_v30 = vpack.c.bf16 %v1118_v49, %v1114_v6 }
 0x27e   : > { %v1126_v21 = vpop.f32.mrf.mxu0  ;;  %2593 = vmatprep.mubr.msk.bf16.mxu1 %vm571_vm0, %v3610_v25  ;;  %v1260_v25 = vpack.c.bf16 %v1110_v23, %v1106_v7  ;;  %v1256_v7 = vpack.c.bf16 %v1090_v34, %v1086_v22  ;;  %v1253_v22 = vpack.c.bf16 %v3812_v50, %v3791_v63  ;;  %v4277_v63 = vpack.c.bf16 %v3755_v33, %v3742_v13 }
 0x280   : > { %v1128_v29 = vpop.f32.mrf.mxu0 }
 0x281   : > { %v1263_v57 = vpack.c.bf16 %v1128_v29, %v1124_v4  ;;  %v1259_v4 = vpack.c.bf16 %v1108_v3, %v1104_v5 }
 0x282   : > { %v1130_v47 = vpop.f32.mrf.mxu0 }
 0x283   : > { %v1264_v58 = vpack.c.bf16 %v1130_v47, %v1126_v21 }
 0x284   : > { %v3860_v60 = vpop.f32.mrf.mxu0 }
 0x285   : > { %2019 = vmatprep.subr.bf16.mxu1 %v1264_v58  ;;  %1732 = vmatmul.mubr.bf16.gmra.mxu1 %v3619_v40  ;;  %v1258_v58 = vpack.c.bf16 %v1100_v56, %v1096_v61  ;;  %v1254_v61 = vpack.c.bf16 %v3814_v52, %v3801_v9  ;;  %v4275_v9 = vpack.c.bf16 %v3785_v10, %v3768_v45 }
 0x286   : > { %v3863_v12 = vpop.f32.mrf.mxu0  ;;  %2020 = vmatpush1.bf16.msra.mxu1 %v1263_v57  ;;  %2594 = vmatprep.mubr.msk.bf16.mxu1 %vm571_vm0, %v3627_v38  ;;  %v1257_v57 = vpack.c.bf16 %v1098_v37, %v1094_v43  ;;  %v4276_v43 = vpack.c.bf16 %v3779_v24, %v3759_v46  ;;  %v4278_v45 = vpack.c.bf16 %v3751_v8, %v3734_v17 }
 0x287   : > { %2021 = vmatprep.subr.bf16.mxu1 %v1262_v59 }
 0x288   : > { %v3867_v14 = vpop.f32.mrf.mxu0 }
 0x28a   : > { %v3869_v16 = vpop.f32.mrf.mxu0  ;;  %2022 = vmatpush1.bf16.msra.mxu1 %v1261_v30  ;;  %v1255_v30 = vpack.c.bf16 %v3831_v36, %v3816_v32 }
 0x28b   : > { %2023 = vmatprep.subr.bf16.mxu1 %v1260_v25 }
 0x28c   : > { %v3871_v48 = vpop.f32.mrf.mxu0 }
 0x28d   : > { %1742 = vmatmul.mubr.bf16.gmra.mxu1 %v3640_v55 }
 0x28e   : > { %v3874_v35 = vpop.f32.mrf.mxu0  ;;  %2024 = vmatpush1.bf16.msra.mxu1 %v1259_v4  ;;  %2595 = vmatprep.mubr.msk.bf16.mxu1 %vm571_vm0, %v3648_v11 }
 0x28f   : > { %2025 = vmatprep.subr.bf16.mxu1 %v1258_v58 }
 0x290   : > { %v3878_v59 = vpop.f32.mrf.mxu0 }
 0x292   : > { %v3880_v23 = vpop.f32.mrf.mxu0  ;;  %2026 = vmatpush1.bf16.msra.mxu1 %v1257_v57 }
 0x293   : > { %2027 = vmatprep.subr.bf16.mxu1 %v1256_v7 }
 0x294   : > { %v3884_v25 = vpop.f32.mrf.mxu0 }
 0x295   : > { %1752 = vmatmul.mubr.bf16.gmra.mxu1 %v3667_v53 }
 0x296   : > { %v3889_v56 = vpop.f32.mrf.mxu0  ;;  %2028 = vmatpush1.bf16.msra.mxu1 %v1255_v30  ;;  %2596 = vmatprep.mubr.msk.bf16.mxu1 %vm571_vm0, %v3675_v62 }
 0x297   : > { %2029 = vmatprep.subr.bf16.mxu1 %v1254_v61 }
 0x298   : > { %v3895_v34 = vpop.f32.mrf.mxu0 }
 0x29a   : > { %v3897_v32 = vpop.f32.mrf.mxu0  ;;  %2030 = vmatpush1.bf16.msra.mxu1 %v1253_v22 }
 0x29b   : > { %2031 = vmatprep.subr.bf16.mxu1 %v4275_v9 }
 0x29c   : > { %v1164_v52 = vpop.f32.mrf.mxu0 }
 0x29d   : > { %1762 = vmatmul.mubr.bf16.gmra.mxu1 %v3689_v0 }
 0x29e   : > { %v1166_v36 = vpop.f32.mrf.mxu0  ;;  %2032 = vmatpush1.bf16.msra.mxu1 %v4276_v43  ;;  %2597 = vmatprep.mubr.msk.bf16.mxu1 %vm571_vm0, %v3698_v44 }
 0x29f   : > { %2033 = vmatprep.subr.bf16.mxu1 %v4277_v63 }
 0x2a0   : > { %v1168_v50 = vpop.f32.mrf.mxu0 }
 0x2a2   : > { %v1170_v37 = vpop.f32.mrf.mxu0  ;;  %2034 = vmatpush1.bf16.msra.mxu1 %v4278_v45 }
 0x2a3   : > { %v1272_v43 = vpack.c.bf16 %v1170_v37, %v1166_v36 }
 0x2a4   : > { %v1174_v10 = vpop.f32.mrf.mxu0 }
 0x2a5   : > { %1772 = vmatmul.mubr.bf16.gmra.mxu1 %v3711_v19 }
 0x2a6   : > { %v1176_v5 = vpop.f32.mrf.mxu0  ;;  %2598 = vmatprep.mubr.msk.bf16.mxu1 %vm571_vm0, %v3717_v51 }
 0x2a8   : > { %v1178_v46 = vpop.f32.mrf.mxu0 }
 0x2a9   : > { %v1273_v22 = vpack.c.bf16 %v1178_v46, %v1174_v10  ;;  %v1267_v10 = vpack.c.bf16 %v3878_v59, %v3871_v48  ;;  %v1265_v48 = vpack.c.bf16 %v3867_v14, %v3860_v60 }
 0x2aa   : > { %v1180_v24 = vpop.f32.mrf.mxu0 }
 0x2ab   : > { %v1274_v7 = vpack.c.bf16 %v1180_v24, %v1176_v5  ;;  %v1271_v5 = vpack.c.bf16 %v1168_v50, %v1164_v52  ;;  %v1269_v52 = vpack.c.bf16 %v3895_v34, %v3884_v25 }
 0x2ac   : > { %v1184_v13 = vpop.f32.mrf.mxu0 }
 0x2ad   : > { %v1311_v33 = vpop.f32.mrf.mxu1  ;;  %1782 = vmatmul.mubr.bf16.gmra.mxu1 %v3724_v42 }
 0x2ae   : > { %v1186_v17 = vpop.f32.mrf.mxu0  ;;  %2599 = vmatprep.mubr.msk.bf16.mxu1 %vm571_vm0, %v3730_v2 }
 0x2af   : > { %v1313_v8 = vpop.f32.mrf.mxu1 }
 0x2b0   : > { %v1188_v6 = vpop.f32.mrf.mxu0  ;;  %v2730_v49 = vpack.c.bf16 %v1313_v8, %v1311_v33 }
 0x2b1   : > { %v1315_v21 = vpop.f32.mrf.mxu1  ;;  %v1275_v58 = vpack.c.bf16 %v1188_v6, %v1184_v13  ;;  %v1270_v13 = vpack.c.bf16 %v3897_v32, %v3889_v56  ;;  %v1268_v56 = vpack.c.bf16 %v3880_v23, %v3874_v35 }
 0x2b2   : > { %v1190_v29 = vpop.f32.mrf.mxu0  ;;  %1621 = vst.msk [vmem:[%s3925_s12] sm:$0xff] %vm3927_vm3, %v2730_v49 }
 0x2b3   : > { %v1276_v47 = vpack.c.bf16 %v1190_v29, %v1186_v17  ;;  %v1317_v4 = vpop.f32.mrf.mxu1  ;;  %v1266_v17 = vpack.c.bf16 %v3869_v16, %v3863_v12 }
 0x2b4   : > { %v2731_v57 = vpack.c.bf16 %v1317_v4, %v1315_v21 }
 0x2b5   : > { %2039 = vmatprep.subr.bf16.mxu1 %v1276_v47  ;;  %v1321_v30 = vpop.f32.mrf.mxu1  ;;  %1792 = vmatmul.mubr.bf16.gmra.mxu1 %v3739_v15 }
 0x2b6   : > { %2040 = vmatpush2.bf16.msra.mxu1 %v1275_v58  ;;  %1622 = vst.msk [vmem:[%s3925_s12 + $0x8] sm:$0xff] %vm3927_vm3, %v2731_v57  ;;  %2600 = vmatprep.mubr.msk.bf16.mxu1 %vm571_vm0, %v3747_v20 }
 0x2b7   : > { %2041 = vmatprep.subr.bf16.mxu1 %v1274_v7  ;;  %v1323_v61 = vpop.f32.mrf.mxu1 }
 0x2b8   : > { %v2732_v9 = vpack.c.bf16 %v1323_v61, %v1321_v30 }
 0x2b9   : > { %v1325_v63 = vpop.f32.mrf.mxu1 }
 0x2ba   : > { %2042 = vmatpush2.bf16.msra.mxu1 %v1273_v22  ;;  %1623 = vst.msk [vmem:[%s3925_s12 + $0x10] sm:$0xff] %vm3927_vm3, %v2732_v9  ;;  %v4282_v22 = vld [vmem:[#allocation6_spill] sm:$0xff] }
 0x2bb   : > { %2043 = vmatprep.subr.bf16.mxu1 %v1272_v43  ;;  %v1327_v45 = vpop.f32.mrf.mxu1 }
 0x2bc   : > { %v2733_v24 = vpack.c.bf16 %v1327_v45, %v1325_v63 }
 0x2bd   : > { %v1331_v33 = vpop.f32.mrf.mxu1  ;;  %1802 = vmatmul.mubr.bf16.gmra.mxu1 %v3765_v27 }
 0x2be   : > { %2044 = vmatpush2.bf16.msra.mxu1 %v1271_v5  ;;  %1624 = vst.msk [vmem:[%s3925_s12 + $0x18] sm:$0xff] %vm3927_vm3, %v2733_v24  ;;  %2601 = vmatprep.mubr.msk.bf16.mxu1 %vm571_vm0, %v3773_v39 }
 0x2bf   : > { %2045 = vmatprep.subr.bf16.mxu1 %v1270_v13  ;;  %v1333_v36 = vpop.f32.mrf.mxu1  ;;  %v4284_v13 = vld [vmem:[#allocation8_spill] sm:$0xff] }
 0x2c0   : > { %v2734_v50 = vpack.c.bf16 %v1333_v36, %v1331_v33  ;;  %v4285_v33 = vld [vmem:[#allocation9_spill] sm:$0xff] }
 0x2c1   : > { %v1335_v32 = vpop.f32.mrf.mxu1 }
 0x2c2   : > { %2046 = vmatpush2.bf16.msra.mxu1 %v1269_v52  ;;  %1625 = vst.msk [vmem:[%s3925_s12 + $0x20] sm:$0xff] %vm3927_vm3, %v2734_v50 }
 0x2c3   : > { %2047 = vmatprep.subr.bf16.mxu1 %v1268_v56  ;;  %v1337_v37 = vpop.f32.mrf.mxu1 }
 0x2c4   : > { %v2735_v46 = vpack.c.bf16 %v1337_v37, %v1335_v32 }
 0x2c5   : > { %v1341_v25 = vpop.f32.mrf.mxu1  ;;  %1812 = vmatmul.mubr.bf16.gmra.mxu1 %v3798_v41 }
 0x2c6   : > { %2048 = vmatpush2.bf16.msra.mxu1 %v1267_v10  ;;  %1626 = vst.msk [vmem:[%s3925_s12 + $0x28] sm:$0xff] %vm3927_vm3, %v2735_v46  ;;  %2658 = vmatprep.mubr.msk.bf16.mxu1 %vm571_vm0, %v3806_v1 }
 0x2c7   : > { %2049 = vmatprep.subr.bf16.mxu1 %v1266_v17  ;;  %v1343_v35 = vpop.f32.mrf.mxu1 }
 0x2c8   : > { %v2736_v59 = vpack.c.bf16 %v1343_v35, %v1341_v25 }
 0x2c9   : > { %v1345_v23 = vpop.f32.mrf.mxu1 }
 0x2ca   : > { %2050 = vmatpush2.bf16.msra.mxu1 %v1265_v48  ;;  %1627 = vst.msk [vmem:[%s3925_s12 + $0x30] sm:$0xff] %vm3927_vm3, %v2736_v59 }
 0x2cb   : > { %v1347_v16 = vpop.f32.mrf.mxu1 }
 0x2cc   : > { %v2737_v12 = vpack.c.bf16 %v1347_v16, %v1345_v23 }
 0x2cd   : > { %v1351_v34 = vpop.f32.mrf.mxu1  ;;  %2052 = vmatmul.mubr.bf16.vlgmr.msra.gmra.mxu1 %v3821_v26 }
 0x2ce   : > { %1628 = vst.msk [vmem:[%s3925_s12 + $0x38] sm:$0xff] %vm3927_vm3, %v2737_v12  ;;  %2659 = vmatprep.mubr.msk.bf16.mxu1 %vm571_vm0, %v3827_v28 }
 0x2cf   : > { %v1353_v14 = vpop.f32.mrf.mxu1 }
 0x2d0   : > { %v2738_v60 = vpack.c.bf16 %v1353_v14, %v1351_v34 }
 0x2d1   : > { %v1355_v1 = vpop.f32.mrf.mxu1 }
 0x2d2   : > { %1629 = vst.msk [vmem:[%s3925_s12 + $0x40] sm:$0xff] %vm3927_vm3, %v2738_v60 }
 0x2d3   : > { %v1357_v8 = vpop.f32.mrf.mxu1 }
 0x2d4   : > { %v2739_v6 = vpack.c.bf16 %v1357_v8, %v1355_v1 }
 0x2d5   : > { %v1361_v49 = vpop.f32.mrf.mxu1  ;;  %2062 = vmatmul.mubr.bf16.gmra.mxu1 %v3836_v31  ;;  %v4281_v31 = vld [vmem:[#allocation5_spill] sm:$0xff] }
 0x2d6   : > { %1630 = vst.msk [vmem:[%s3925_s12 + $0x48] sm:$0xff] %vm3927_vm3, %v2739_v6  ;;  %2660 = vmatprep.mubr.msk.bf16.mxu1 %vm571_vm0, %v3842_v54 }
 0x2d7   : > { %v1363_v26 = vpop.f32.mrf.mxu1 }
 0x2d8   : > { %v2740_v28 = vpack.c.bf16 %v1363_v26, %v1361_v49 }
 0x2d9   : > { %v1365_v21 = vpop.f32.mrf.mxu1 }
 0x2da   : > { %1631 = vst.msk [vmem:[%s3925_s12 + $0x50] sm:$0xff] %vm3927_vm3, %v2740_v28 }
 0x2db   : > { %v1367_v29 = vpop.f32.mrf.mxu1 }
 0x2dc   : > { %v2741_v47 = vpack.c.bf16 %v1367_v29, %v1365_v21 }
 0x2dd   : > { %v1371_v4 = vpop.f32.mrf.mxu1  ;;  %2072 = vmatmul.mubr.bf16.gmra.mxu1 %v3849_v18  ;;  %v4283_v18 = vld [vmem:[#allocation7_spill] sm:$0xff] }
 0x2de   : > { %1632 = vst.msk [vmem:[%s3925_s12 + $0x58] sm:$0xff] %vm3927_vm3, %v2741_v47  ;;  %2661 = vmatprep.mubr.msk.bf16.mxu1 %vm571_vm0, %v4281_v31 }
 0x2df   : > { %v1373_v54 = vpop.f32.mrf.mxu1 }
 0x2e0   : > { %v2742_v58 = vpack.c.bf16 %v1373_v54, %v1371_v4 }
 0x2e1   : > { %v1375_v57 = vpop.f32.mrf.mxu1 }
 0x2e2   : > { %1633 = vst.msk [vmem:[%s3925_s12 + $0x60] sm:$0xff] %vm3927_vm3, %v2742_v58 }
 0x2e3   : > { %v1377_v7 = vpop.f32.mrf.mxu1 }
 0x2e4   : > { %v2743_v30 = vpack.c.bf16 %v1377_v7, %v1375_v57 }
 0x2e5   : > { %v1381_v61 = vpop.f32.mrf.mxu1  ;;  %2082 = vmatmul.mubr.bf16.gmra.mxu1 %v4282_v22 }
 0x2e6   : > { %1634 = vst.msk [vmem:[%s3925_s12 + $0x68] sm:$0xff] %vm3927_vm3, %v2743_v30  ;;  %2662 = vmatprep.mubr.msk.bf16.mxu1 %vm571_vm0, %v4283_v18 }
 0x2e7   : > { %v1383_v9 = vpop.f32.mrf.mxu1 }
 0x2e8   : > { %v2744_v43 = vpack.c.bf16 %v1383_v9, %v1381_v61 }
 0x2e9   : > { %v1385_v63 = vpop.f32.mrf.mxu1 }
 0x2ea   : > { %1635 = vst.msk [vmem:[%s3925_s12 + $0x70] sm:$0xff] %vm3927_vm3, %v2744_v43 }
 0x2eb   : > { %v1387_v45 = vpop.f32.mrf.mxu1 }
 0x2ec   : > { %v2745_v5 = vpack.c.bf16 %v1387_v45, %v1385_v63 }
 0x2ed   : > { %v1391_v24 = vpop.f32.mrf.mxu1  ;;  %2092 = vmatmul.mubr.bf16.gmra.mxu1 %v4284_v13 }
 0x2ee   : > { %1636 = vst.msk [vmem:[%s3925_s12 + $0x78] sm:$0xff] %vm3927_vm3, %v2745_v5  ;;  %2663 = vmatprep.mubr.msk.bf16.mxu1 %vm571_vm0, %v4285_v33 }
 0x2ef   : > { %v1393_v36 = vpop.f32.mrf.mxu1 }
 0x2f0   : > { %v2746_v52 = vpack.c.bf16 %v1393_v36, %v1391_v24 }
 0x2f1   : > { %v1395_v50 = vpop.f32.mrf.mxu1 }
 0x2f2   : > { %1637 = vst.msk [vmem:[%s3925_s12 + $0x80] sm:$0xff] %vm3927_vm3, %v2746_v52 }
 0x2f3   : > { %v1397_v56 = vpop.f32.mrf.mxu1 }
 0x2f4   : > { %v2747_v32 = vpack.c.bf16 %v1397_v56, %v1395_v50 }
 0x2f5   : > { %v1401_v37 = vpop.f32.mrf.mxu1  ;;  %2102 = vmatmul.mubr.bf16.gmra.mxu1 %v3619_v40 }
 0x2f6   : > { %1638 = vst.msk [vmem:[%s3925_s12 + $0x88] sm:$0xff] %vm3927_vm3, %v2747_v32  ;;  %2664 = vmatprep.mubr.msk.bf16.mxu1 %vm571_vm0, %v3627_v38 }
 0x2f7   : > { %v1403_v10 = vpop.f32.mrf.mxu1 }
 0x2f8   : > { %v2748_v46 = vpack.c.bf16 %v1403_v10, %v1401_v37 }
 0x2f9   : > { %v1405_v17 = vpop.f32.mrf.mxu1 }
 0x2fa   : > { %1639 = vst.msk [vmem:[%s3925_s12 + $0x90] sm:$0xff] %vm3927_vm3, %v2748_v46 }
 0x2fb   : > { %v1407_v25 = vpop.f32.mrf.mxu1 }
 0x2fc   : > { %v2749_v35 = vpack.c.bf16 %v1407_v25, %v1405_v17 }
 0x2fd   : > { %v1411_v48 = vpop.f32.mrf.mxu1  ;;  %2112 = vmatmul.mubr.bf16.gmra.mxu1 %v3640_v55 }
 0x2fe   : > { %1640 = vst.msk [vmem:[%s3925_s12 + $0x98] sm:$0xff] %vm3927_vm3, %v2749_v35  ;;  %2665 = vmatprep.mubr.msk.bf16.mxu1 %vm571_vm0, %v3648_v11 }
 0x2ff   : > { %v1413_v40 = vpop.f32.mrf.mxu1 }
 0x300   : > { %v2750_v38 = vpack.c.bf16 %v1413_v40, %v1411_v48 }
 0x301   : > { %v1415_v59 = vpop.f32.mrf.mxu1 }
 0x302   : > { %1641 = vst.msk [vmem:[%s3925_s12 + $0xa0] sm:$0xff] %vm3927_vm3, %v2750_v38 }
 0x303   : > { %v1417_v23 = vpop.f32.mrf.mxu1 }
 0x304   : > { %v2751_v16 = vpack.c.bf16 %v1417_v23, %v1415_v59 }
 0x305   : > { %v1421_v12 = vpop.f32.mrf.mxu1  ;;  %2122 = vmatmul.mubr.bf16.gmra.mxu1 %v3667_v53 }
 0x306   : > { %1642 = vst.msk [vmem:[%s3925_s12 + $0xa8] sm:$0xff] %vm3927_vm3, %v2751_v16  ;;  %2666 = vmatprep.mubr.msk.bf16.mxu1 %vm571_vm0, %v3675_v62 }
 0x307   : > { %v1423_v55 = vpop.f32.mrf.mxu1 }
 0x308   : > { %v2752_v11 = vpack.c.bf16 %v1423_v55, %v1421_v12 }
 0x309   : > { %v1425_v34 = vpop.f32.mrf.mxu1 }
 0x30a   : > { %1643 = vst.msk [vmem:[%s3925_s12 + $0xb0] sm:$0xff] %vm3927_vm3, %v2752_v11 }
 0x30b   : > { %v1427_v14 = vpop.f32.mrf.mxu1 }
 0x30c   : > { %v2753_v60 = vpack.c.bf16 %v1427_v14, %v1425_v34 }
 0x30d   : > { %v1431_v1 = vpop.f32.mrf.mxu1  ;;  %2132 = vmatmul.mubr.bf16.gmra.mxu1 %v3689_v0 }
 0x30e   : > { %1644 = vst.msk [vmem:[%s3925_s12 + $0xb8] sm:$0xff] %vm3927_vm3, %v2753_v60  ;;  %2667 = vmatprep.mubr.msk.bf16.mxu1 %vm571_vm0, %v3698_v44 }
 0x30f   : > { %v1433_v53 = vpop.f32.mrf.mxu1 }
 0x310   : > { %v2754_v62 = vpack.c.bf16 %v1433_v53, %v1431_v1 }
 0x311   : > { %v1435_v8 = vpop.f32.mrf.mxu1 }
 0x312   : > { %1645 = vst.msk [vmem:[%s3925_s12 + $0xc0] sm:$0xff] %vm3927_vm3, %v2754_v62 }
 0x313   : > { %v1437_v6 = vpop.f32.mrf.mxu1 }
 0x314   : > { %v2755_v49 = vpack.c.bf16 %v1437_v6, %v1435_v8 }
 0x315   : > { %v1441_v26 = vpop.f32.mrf.mxu1  ;;  %2142 = vmatmul.mubr.bf16.gmra.mxu1 %v3711_v19 }
 0x316   : > { %1646 = vst.msk [vmem:[%s3925_s12 + $0xc8] sm:$0xff] %vm3927_vm3, %v2755_v49  ;;  %2668 = vmatprep.mubr.msk.bf16.mxu1 %vm571_vm0, %v3717_v51 }
 0x317   : > { %v1443_v0 = vpop.f32.mrf.mxu1 }
 0x318   : > { %v2756_v44 = vpack.c.bf16 %v1443_v0, %v1441_v26 }
 0x319   : > { %v1445_v28 = vpop.f32.mrf.mxu1 }
 0x31a   : > { %1647 = vst.msk [vmem:[%s3925_s12 + $0xd0] sm:$0xff] %vm3927_vm3, %v2756_v44 }
 0x31b   : > { %v1447_v21 = vpop.f32.mrf.mxu1 }
 0x31c   : > { %v2757_v29 = vpack.c.bf16 %v1447_v21, %v1445_v28 }
 0x31d   : > { %v1683_v47 = vpop.f32.mrf.mxu1  ;;  %2152 = vmatmul.mubr.bf16.gmra.mxu1 %v3724_v42 }
 0x31e   : > { %1648 = vst.msk [vmem:[%s3925_s12 + $0xd8] sm:$0xff] %vm3927_vm3, %v2757_v29  ;;  %2669 = vmatprep.mubr.msk.bf16.mxu1 %vm571_vm0, %v3730_v2 }
 0x31f   : > { %v1685_v19 = vpop.f32.mrf.mxu1 }
 0x320   : > { %v2758_v51 = vpack.c.bf16 %v1685_v19, %v1683_v47 }
 0x321   : > { %v1687_v4 = vpop.f32.mrf.mxu1 }
 0x322   : > { %2630 = vst.msk [vmem:[%s3925_s12 + $0xe0] sm:$0xff] %vm3927_vm3, %v2758_v51 }
 0x323   : > { %v1689_v31 = vpop.f32.mrf.mxu1 }
 0x324   : > { %v2759_v54 = vpack.c.bf16 %v1689_v31, %v1687_v4 }
 0x325   : > { %v1693_v58 = vpop.f32.mrf.mxu1  ;;  %2162 = vmatmul.mubr.bf16.gmra.mxu1 %v3739_v15 }
 0x326   : > { %2631 = vst.msk [vmem:[%s3925_s12 + $0xe8] sm:$0xff] %vm3927_vm3, %v2759_v54  ;;  %2670 = vmatprep.mubr.msk.bf16.mxu1 %vm571_vm0, %v3747_v20 }
 0x327   : > { %v1695_v42 = vpop.f32.mrf.mxu1 }
 0x328   : > { %v2760_v2 = vpack.c.bf16 %v1695_v42, %v1693_v58 }
 0x329   : > { %v1697_v57 = vpop.f32.mrf.mxu1 }
 0x32a   : > { %2632 = vst.msk [vmem:[%s3925_s12 + $0xf0] sm:$0xff] %vm3927_vm3, %v2760_v2 }
 0x32b   : > { %v1699_v7 = vpop.f32.mrf.mxu1 }
 0x32c   : > { %v2761_v30 = vpack.c.bf16 %v1699_v7, %v1697_v57 }
 0x32d   : > { %v1703_v61 = vpop.f32.mrf.mxu1  ;;  %2172 = vmatmul.mubr.bf16.gmra.mxu1 %v3765_v27 }
 0x32e   : > { %2633 = vst.msk [vmem:[%s3925_s12 + $0xf8] sm:$0xff] %vm3927_vm3, %v2761_v30  ;;  %2671 = vmatprep.mubr.msk.bf16.mxu1 %vm571_vm0, %v3773_v39 }
 0x32f   : > { %v1705_v15 = vpop.f32.mrf.mxu1 }
 0x330   : > { %v2762_v20 = vpack.c.bf16 %v1705_v15, %v1703_v61 }
 0x331   : > { %v1707_v22 = vpop.f32.mrf.mxu1 }
 0x332   : > { %2634 = vst.msk [vmem:[%s3925_s12 + $0x100] sm:$0xff] %vm3927_vm3, %v2762_v20 }
 0x333   : > { %v1709_v18 = vpop.f32.mrf.mxu1 }
 0x334   : > { %v2763_v9 = vpack.c.bf16 %v1709_v18, %v1707_v22 }
 0x335   : > { %v1713_v43 = vpop.f32.mrf.mxu1  ;;  %2182 = vmatmul.mubr.bf16.gmra.mxu1 %v3798_v41 }
 0x336   : > { %2635 = vst.msk [vmem:[%s3925_s12 + $0x108] sm:$0xff] %vm3927_vm3, %v2763_v9 }
 0x337   : > { %v1715_v27 = vpop.f32.mrf.mxu1 }
 0x338   : > { %v2764_v63 = vpack.c.bf16 %v1715_v27, %v1713_v43 }
 0x339   : > { %v1717_v39 = vpop.f32.mrf.mxu1 }
 0x33a   : > { %2636 = vst.msk [vmem:[%s3925_s12 + $0x110] sm:$0xff] %vm3927_vm3, %v2764_v63 }
 0x33b   : > { %v1719_v45 = vpop.f32.mrf.mxu1 }
 0x33c   : > { %v2765_v5 = vpack.c.bf16 %v1719_v45, %v1717_v39 }
 0x33d   : > { %v1723_v24 = vpop.f32.mrf.mxu1 }
 0x33e   : > { %2637 = vst.msk [vmem:[%s3925_s12 + $0x118] sm:$0xff] %vm3927_vm3, %v2765_v5 }
 0x33f   : > { %v1725_v13 = vpop.f32.mrf.mxu1 }
 0x340   : > { %v2766_v41 = vpack.c.bf16 %v1725_v13, %v1723_v24 }
 0x341   : > { %v1727_v33 = vpop.f32.mrf.mxu1 }
 0x342   : > { %2638 = vst.msk [vmem:[%s3925_s12 + $0x120] sm:$0xff] %vm3927_vm3, %v2766_v41 }
 0x343   : > { %v1729_v36 = vpop.f32.mrf.mxu1 }
 0x344   : > { %v2767_v52 = vpack.c.bf16 %v1729_v36, %v1727_v33 }
 0x345   : > { %v1733_v50 = vpop.f32.mrf.mxu1 }
 0x346   : > { %2639 = vst.msk [vmem:[%s3925_s12 + $0x128] sm:$0xff] %vm3927_vm3, %v2767_v52 }
 0x347   : > { %v1735_v56 = vpop.f32.mrf.mxu1 }
 0x348   : > { %v2768_v32 = vpack.c.bf16 %v1735_v56, %v1733_v50 }
 0x349   : > { %v1737_v37 = vpop.f32.mrf.mxu1 }
 0x34a   : > { %2640 = vst.msk [vmem:[%s3925_s12 + $0x130] sm:$0xff] %vm3927_vm3, %v2768_v32 }
 0x34b   : > { %v1739_v10 = vpop.f32.mrf.mxu1 }
 0x34c   : > { %v2769_v46 = vpack.c.bf16 %v1739_v10, %v1737_v37 }
 0x34d   : > { %v1743_v17 = vpop.f32.mrf.mxu1 }
 0x34e   : > { %2641 = vst.msk [vmem:[%s3925_s12 + $0x138] sm:$0xff] %vm3927_vm3, %v2769_v46 }
 0x34f   : > { %v1745_v25 = vpop.f32.mrf.mxu1 }
 0x350   : > { %v2770_v35 = vpack.c.bf16 %v1745_v25, %v1743_v17 }
 0x351   : > { %v1747_v48 = vpop.f32.mrf.mxu1 }
 0x352   : > { %2642 = vst.msk [vmem:[%s3925_s12 + $0x140] sm:$0xff] %vm3927_vm3, %v2770_v35 }
 0x353   : > { %v1749_v40 = vpop.f32.mrf.mxu1 }
 0x354   : > { %v2771_v38 = vpack.c.bf16 %v1749_v40, %v1747_v48 }
 0x355   : > { %v1753_v59 = vpop.f32.mrf.mxu1 }
 0x356   : > { %2643 = vst.msk [vmem:[%s3925_s12 + $0x148] sm:$0xff] %vm3927_vm3, %v2771_v38 }
 0x357   : > { %v1755_v23 = vpop.f32.mrf.mxu1 }
 0x358   : > { %v2772_v16 = vpack.c.bf16 %v1755_v23, %v1753_v59 }
 0x359   : > { %v1757_v12 = vpop.f32.mrf.mxu1 }
 0x35a   : > { %2644 = vst.msk [vmem:[%s3925_s12 + $0x150] sm:$0xff] %vm3927_vm3, %v2772_v16 }
 0x35b   : > { %v1759_v55 = vpop.f32.mrf.mxu1 }
 0x35c   : > { %v2773_v11 = vpack.c.bf16 %v1759_v55, %v1757_v12 }
 0x35d   : > { %v1763_v34 = vpop.f32.mrf.mxu1 }
 0x35e   : > { %2645 = vst.msk [vmem:[%s3925_s12 + $0x158] sm:$0xff] %vm3927_vm3, %v2773_v11 }
 0x35f   : > { %v1765_v14 = vpop.f32.mrf.mxu1 }
 0x360   : > { %v2774_v60 = vpack.c.bf16 %v1765_v14, %v1763_v34 }
 0x361   : > { %v1767_v1 = vpop.f32.mrf.mxu1 }
 0x362   : > { %2646 = vst.msk [vmem:[%s3925_s12 + $0x160] sm:$0xff] %vm3927_vm3, %v2774_v60 }
 0x363   : > { %v1769_v53 = vpop.f32.mrf.mxu1 }
 0x364   : > { %v2775_v62 = vpack.c.bf16 %v1769_v53, %v1767_v1 }
 0x365   : > { %v1773_v8 = vpop.f32.mrf.mxu1 }
 0x366   : > { %2647 = vst.msk [vmem:[%s3925_s12 + $0x168] sm:$0xff] %vm3927_vm3, %v2775_v62 }
 0x367   : > { %v1775_v6 = vpop.f32.mrf.mxu1 }
 0x368   : > { %v2776_v49 = vpack.c.bf16 %v1775_v6, %v1773_v8 }
 0x369   : > { %v1777_v26 = vpop.f32.mrf.mxu1 }
 0x36a   : > { %2648 = vst.msk [vmem:[%s3925_s12 + $0x170] sm:$0xff] %vm3927_vm3, %v2776_v49 }
 0x36b   : > { %v1779_v0 = vpop.f32.mrf.mxu1 }
 0x36c   : > { %v2777_v44 = vpack.c.bf16 %v1779_v0, %v1777_v26 }
 0x36d   : > { %v1783_v28 = vpop.f32.mrf.mxu1 }
 0x36e   : > { %2649 = vst.msk [vmem:[%s3925_s12 + $0x178] sm:$0xff] %vm3927_vm3, %v2777_v44 }
 0x36f   : > { %v1785_v21 = vpop.f32.mrf.mxu1 }
 0x370   : > { %v2778_v29 = vpack.c.bf16 %v1785_v21, %v1783_v28 }
 0x371   : > { %v1787_v47 = vpop.f32.mrf.mxu1 }
 0x372   : > { %2650 = vst.msk [vmem:[%s3925_s12 + $0x180] sm:$0xff] %vm3927_vm3, %v2778_v29 }
 0x373   : > { %v1789_v19 = vpop.f32.mrf.mxu1 }
 0x374   : > { %v2779_v51 = vpack.c.bf16 %v1789_v19, %v1787_v47 }
 0x375   : > { %v1793_v4 = vpop.f32.mrf.mxu1 }
 0x376   : > { %2651 = vst.msk [vmem:[%s3925_s12 + $0x188] sm:$0xff] %vm3927_vm3, %v2779_v51 }
 0x377   : > { %v1795_v31 = vpop.f32.mrf.mxu1 }
 0x378   : > { %v2780_v54 = vpack.c.bf16 %v1795_v31, %v1793_v4 }
 0x379   : > { %v1797_v58 = vpop.f32.mrf.mxu1 }
 0x37a   : > { %2652 = vst.msk [vmem:[%s3925_s12 + $0x190] sm:$0xff] %vm3927_vm3, %v2780_v54 }
 0x37b   : > { %v1799_v42 = vpop.f32.mrf.mxu1 }
 0x37c   : > { %v2781_v2 = vpack.c.bf16 %v1799_v42, %v1797_v58 }
 0x37d   : > { %v1803_v57 = vpop.f32.mrf.mxu1 }
 0x37e   : > { %2653 = vst.msk [vmem:[%s3925_s12 + $0x198] sm:$0xff] %vm3927_vm3, %v2781_v2 }
 0x37f   : > { %v1805_v7 = vpop.f32.mrf.mxu1 }
 0x380   : > { %v2782_v30 = vpack.c.bf16 %v1805_v7, %v1803_v57 }
 0x381   : > { %v1807_v61 = vpop.f32.mrf.mxu1 }
 0x382   : > { %2654 = vst.msk [vmem:[%s3925_s12 + $0x1a0] sm:$0xff] %vm3927_vm3, %v2782_v30 }
 0x383   : > { %v1809_v15 = vpop.f32.mrf.mxu1 }
 0x384   : > { %v2783_v20 = vpack.c.bf16 %v1809_v15, %v1807_v61 }
 0x385   : > { %v1813_v22 = vpop.f32.mrf.mxu1 }
 0x386   : > { %2655 = vst.msk [vmem:[%s3925_s12 + $0x1a8] sm:$0xff] %vm3927_vm3, %v2783_v20 }
 0x387   : > { %v1815_v18 = vpop.f32.mrf.mxu1 }
 0x388   : > { %v2784_v9 = vpack.c.bf16 %v1815_v18, %v1813_v22 }
 0x389   : > { %v1817_v43 = vpop.f32.mrf.mxu1 }
 0x38a   : > { %2656 = vst.msk [vmem:[%s3925_s12 + $0x1b0] sm:$0xff] %vm3927_vm3, %v2784_v9 }
 0x38b   : > { %v1819_v27 = vpop.f32.mrf.mxu1 }
 0x38c   : > { %v2785_v63 = vpack.c.bf16 %v1819_v27, %v1817_v43 }
 0x38d   : > { %v2053_v39 = vpop.f32.mrf.mxu1 }
 0x38e   : > { %2657 = vst.msk [vmem:[%s3925_s12 + $0x1b8] sm:$0xff] %vm3927_vm3, %v2785_v63 }
 0x38f   : > { %v2055_v45 = vpop.f32.mrf.mxu1 }
 0x390   : > { %v2786_v5 = vpack.c.bf16 %v2055_v45, %v2053_v39 }
 0x391   : > { %v2057_v24 = vpop.f32.mrf.mxu1 }
 0x392   : > { %2700 = vst.msk [vmem:[%s3925_s12 + $0x1c0] sm:$0xff] %vm3927_vm3, %v2786_v5 }
 0x393   : > { %v2059_v13 = vpop.f32.mrf.mxu1 }
 0x394   : > { %v2787_v41 = vpack.c.bf16 %v2059_v13, %v2057_v24 }
 0x395   : > { %v2063_v33 = vpop.f32.mrf.mxu1 }
 0x396   : > { %2701 = vst.msk [vmem:[%s3925_s12 + $0x1c8] sm:$0xff] %vm3927_vm3, %v2787_v41 }
 0x397   : > { %v2065_v36 = vpop.f32.mrf.mxu1 }
 0x398   : > { %v2788_v52 = vpack.c.bf16 %v2065_v36, %v2063_v33 }
 0x399   : > { %v2067_v50 = vpop.f32.mrf.mxu1 }
 0x39a   : > { %2702 = vst.msk [vmem:[%s3925_s12 + $0x1d0] sm:$0xff] %vm3927_vm3, %v2788_v52 }
 0x39b   : > { %v2069_v56 = vpop.f32.mrf.mxu1 }
 0x39c   : > { %v2789_v32 = vpack.c.bf16 %v2069_v56, %v2067_v50 }
 0x39d   : > { %v2073_v37 = vpop.f32.mrf.mxu1 }
 0x39e   : > { %2703 = vst.msk [vmem:[%s3925_s12 + $0x1d8] sm:$0xff] %vm3927_vm3, %v2789_v32 }
 0x39f   : > { %v2075_v10 = vpop.f32.mrf.mxu1 }
 0x3a0   : > { %v2790_v46 = vpack.c.bf16 %v2075_v10, %v2073_v37 }
 0x3a1   : > { %v2077_v17 = vpop.f32.mrf.mxu1 }
 0x3a2   : > { %2704 = vst.msk [vmem:[%s3925_s12 + $0x1e0] sm:$0xff] %vm3927_vm3, %v2790_v46 }
 0x3a3   : > { %v2079_v25 = vpop.f32.mrf.mxu1 }
 0x3a4   : > { %v2791_v35 = vpack.c.bf16 %v2079_v25, %v2077_v17 }
 0x3a5   : > { %v2083_v48 = vpop.f32.mrf.mxu1 }
 0x3a6   : > { %2705 = vst.msk [vmem:[%s3925_s12 + $0x1e8] sm:$0xff] %vm3927_vm3, %v2791_v35 }
 0x3a7   : > { %v2085_v40 = vpop.f32.mrf.mxu1 }
 0x3a8   : > { %v2792_v38 = vpack.c.bf16 %v2085_v40, %v2083_v48 }
 0x3a9   : > { %v2087_v59 = vpop.f32.mrf.mxu1 }
 0x3aa   : > { %2706 = vst.msk [vmem:[%s3925_s12 + $0x1f0] sm:$0xff] %vm3927_vm3, %v2792_v38 }
 0x3ab   : > { %v2089_v23 = vpop.f32.mrf.mxu1 }
 0x3ac   : > { %v2793_v16 = vpack.c.bf16 %v2089_v23, %v2087_v59 }
 0x3ad   : > { %v2093_v12 = vpop.f32.mrf.mxu1 }
 0x3ae   : > { %2707 = vst.msk [vmem:[%s3925_s12 + $0x1f8] sm:$0xff] %vm3927_vm3, %v2793_v16 }
 0x3af   : > { %v2095_v55 = vpop.f32.mrf.mxu1 }
 0x3b0   : > { %v2794_v11 = vpack.c.bf16 %v2095_v55, %v2093_v12 }
 0x3b1   : > { %v2097_v34 = vpop.f32.mrf.mxu1 }
 0x3b2   : > { %2708 = vst.msk [vmem:[%s3925_s12 + $0x200] sm:$0xff] %vm3927_vm3, %v2794_v11 }
 0x3b3   : > { %v2099_v14 = vpop.f32.mrf.mxu1 }
 0x3b4   : > { %v2795_v60 = vpack.c.bf16 %v2099_v14, %v2097_v34 }
 0x3b5   : > { %v2103_v1 = vpop.f32.mrf.mxu1 }
 0x3b6   : > { %2709 = vst.msk [vmem:[%s3925_s12 + $0x208] sm:$0xff] %vm3927_vm3, %v2795_v60 }
 0x3b7   : > { %v2105_v53 = vpop.f32.mrf.mxu1 }
 0x3b8   : > { %v2796_v62 = vpack.c.bf16 %v2105_v53, %v2103_v1 }
 0x3b9   : > { %v2107_v8 = vpop.f32.mrf.mxu1 }
 0x3ba   : > { %2710 = vst.msk [vmem:[%s3925_s12 + $0x210] sm:$0xff] %vm3927_vm3, %v2796_v62 }
 0x3bb   : > { %v2109_v6 = vpop.f32.mrf.mxu1 }
 0x3bc   : > { %v2797_v49 = vpack.c.bf16 %v2109_v6, %v2107_v8 }
 0x3bd   : > { %v2113_v26 = vpop.f32.mrf.mxu1 }
 0x3be   : > { %2711 = vst.msk [vmem:[%s3925_s12 + $0x218] sm:$0xff] %vm3927_vm3, %v2797_v49 }
 0x3bf   : > { %v2115_v0 = vpop.f32.mrf.mxu1 }
 0x3c0   : > { %v2798_v44 = vpack.c.bf16 %v2115_v0, %v2113_v26 }
 0x3c1   : > { %v2117_v28 = vpop.f32.mrf.mxu1 }
 0x3c2   : > { %2712 = vst.msk [vmem:[%s3925_s12 + $0x220] sm:$0xff] %vm3927_vm3, %v2798_v44 }
 0x3c3   : > { %v2119_v21 = vpop.f32.mrf.mxu1 }
 0x3c4   : > { %v2799_v29 = vpack.c.bf16 %v2119_v21, %v2117_v28 }
 0x3c5   : > { %v2123_v47 = vpop.f32.mrf.mxu1 }
 0x3c6   : > { %2713 = vst.msk [vmem:[%s3925_s12 + $0x228] sm:$0xff] %vm3927_vm3, %v2799_v29 }
 0x3c7   : > { %v2125_v19 = vpop.f32.mrf.mxu1 }
 0x3c8   : > { %v2800_v51 = vpack.c.bf16 %v2125_v19, %v2123_v47 }
 0x3c9   : > { %v2127_v4 = vpop.f32.mrf.mxu1 }
 0x3ca   : > { %2714 = vst.msk [vmem:[%s3925_s12 + $0x230] sm:$0xff] %vm3927_vm3, %v2800_v51 }
 0x3cb   : > { %v2129_v31 = vpop.f32.mrf.mxu1 }
 0x3cc   : > { %v2801_v54 = vpack.c.bf16 %v2129_v31, %v2127_v4 }
 0x3cd   : > { %v2133_v58 = vpop.f32.mrf.mxu1 }
 0x3ce   : > { %2715 = vst.msk [vmem:[%s3925_s12 + $0x238] sm:$0xff] %vm3927_vm3, %v2801_v54 }
 0x3cf   : > { %v2135_v42 = vpop.f32.mrf.mxu1 }
 0x3d0   : > { %v2802_v2 = vpack.c.bf16 %v2135_v42, %v2133_v58 }
 0x3d1   : > { %v2137_v57 = vpop.f32.mrf.mxu1 }
 0x3d2   : > { %2716 = vst.msk [vmem:[%s3925_s12 + $0x240] sm:$0xff] %vm3927_vm3, %v2802_v2 }
 0x3d3   : > { %v2139_v7 = vpop.f32.mrf.mxu1 }
 0x3d4   : > { %v2803_v30 = vpack.c.bf16 %v2139_v7, %v2137_v57 }
 0x3d5   : > { %v2143_v61 = vpop.f32.mrf.mxu1 }
 0x3d6   : > { %2717 = vst.msk [vmem:[%s3925_s12 + $0x248] sm:$0xff] %vm3927_vm3, %v2803_v30 }
 0x3d7   : > { %v2145_v15 = vpop.f32.mrf.mxu1 }
 0x3d8   : > { %v2804_v20 = vpack.c.bf16 %v2145_v15, %v2143_v61 }
 0x3d9   : > { %v2147_v22 = vpop.f32.mrf.mxu1 }
 0x3da   : > { %2718 = vst.msk [vmem:[%s3925_s12 + $0x250] sm:$0xff] %vm3927_vm3, %v2804_v20 }
 0x3db   : > { %v2149_v18 = vpop.f32.mrf.mxu1 }
 0x3dc   : > { %v2805_v9 = vpack.c.bf16 %v2149_v18, %v2147_v22 }
 0x3dd   : > { %v2153_v43 = vpop.f32.mrf.mxu1 }
 0x3de   : > { %2719 = vst.msk [vmem:[%s3925_s12 + $0x258] sm:$0xff] %vm3927_vm3, %v2805_v9 }
 0x3df   : > { %v2155_v27 = vpop.f32.mrf.mxu1 }
 0x3e0   : > { %v2806_v63 = vpack.c.bf16 %v2155_v27, %v2153_v43 }
 0x3e1   : > { %v2157_v39 = vpop.f32.mrf.mxu1 }
 0x3e2   : > { %2720 = vst.msk [vmem:[%s3925_s12 + $0x260] sm:$0xff] %vm3927_vm3, %v2806_v63 }
 0x3e3   : > { %v2159_v45 = vpop.f32.mrf.mxu1 }
 0x3e4   : > { %v2807_v5 = vpack.c.bf16 %v2159_v45, %v2157_v39 }
 0x3e5   : > { %v2163_v24 = vpop.f32.mrf.mxu1 }
 0x3e6   : > { %2721 = vst.msk [vmem:[%s3925_s12 + $0x268] sm:$0xff] %vm3927_vm3, %v2807_v5 }
 0x3e7   : > { %v2165_v13 = vpop.f32.mrf.mxu1 }
 0x3e8   : > { %v2808_v41 = vpack.c.bf16 %v2165_v13, %v2163_v24 }
 0x3e9   : > { %v2167_v33 = vpop.f32.mrf.mxu1 }
 0x3ea   : > { %2722 = vst.msk [vmem:[%s3925_s12 + $0x270] sm:$0xff] %vm3927_vm3, %v2808_v41 }
 0x3eb   : > { %v2169_v36 = vpop.f32.mrf.mxu1 }
 0x3ec   : > { %v2809_v52 = vpack.c.bf16 %v2169_v36, %v2167_v33 }
 0x3ed   : > { %v2173_v50 = vpop.f32.mrf.mxu1 }
 0x3ee   : > { %2723 = vst.msk [vmem:[%s3925_s12 + $0x278] sm:$0xff] %vm3927_vm3, %v2809_v52 }
 0x3ef   : > { %v2175_v56 = vpop.f32.mrf.mxu1 }
 0x3f0   : > { %v2810_v32 = vpack.c.bf16 %v2175_v56, %v2173_v50 }
 0x3f1   : > { %v2177_v37 = vpop.f32.mrf.mxu1 }
 0x3f2   : > { %2724 = vst.msk [vmem:[%s3925_s12 + $0x280] sm:$0xff] %vm3927_vm3, %v2810_v32 }
 0x3f3   : > { %v2179_v10 = vpop.f32.mrf.mxu1 }
 0x3f4   : > { %v2811_v46 = vpack.c.bf16 %v2179_v10, %v2177_v37 }
 0x3f5   : > { %v2183_v17 = vpop.f32.mrf.mxu1 }
 0x3f6   : > { %2725 = vst.msk [vmem:[%s3925_s12 + $0x288] sm:$0xff] %vm3927_vm3, %v2811_v46 }
 0x3f7   : > { %v2185_v25 = vpop.f32.mrf.mxu1 }
 0x3f8   : > { %v2812_v35 = vpack.c.bf16 %v2185_v25, %v2183_v17 }
 0x3f9   : > { %v2187_v48 = vpop.f32.mrf.mxu1 }
 0x3fa   : > { %2726 = vst.msk [vmem:[%s3925_s12 + $0x290] sm:$0xff] %vm3927_vm3, %v2812_v35 }
 0x3fb   : > { %v2189_v40 = vpop.f32.mrf.mxu1 }
 0x3fc   : > { %v2813_v38 = vpack.c.bf16 %v2189_v40, %v2187_v48 }
 0x3fe   : > { %2727 = vst.msk [vmem:[%s3925_s12 + $0x298] sm:$0xff] %vm3927_vm3, %v2813_v38 }
 0x3ff PF: > { %p12_p9 = scmp.ge.s32.totalorder %s3033_s14, 4   ;;  %s4286_s9 = smov %s2983_s10 }
 0x400   : > { %s4287_s10 = smov %s2987_s11  ;;  %s4288_s11 = smov %s3043_s17 }
 0x401   : > { %s4289_s12 = smov %s3033_s14  ;;  %14 = sbr.rel (!%p12_p9) target bundleno = 3 (0x3), region = 70 }
 0x406   :  { %2410 = vsyncpa [#allocation3], 1 }
 0x407   :  { %2412 = vsyncpa [#allocation3 + $0x1], 1 }

// kernel: extractor_forward.3
= control target key start
LH: loop header
LB: loop body
LE: loop exit
PB: predicated region body
PF: predicated region fallthrough
CT: control target
= control target key end

     0   :  { %s2343_s12 = smov 0   ;;  %s2884_s0 = inlined_call_operand.vmem [shape: bf16[2,196,768], index: 0, kind: input, shape index: {}]   ;;  %s2885_s1 = inlined_call_operand.vmem [shape: bf16[768,128], index: 1, kind: input, shape index: {}]   ;;  %s2886_s2 = inlined_call_operand.vmem [shape: f32[1,128], index: 2, kind: input, shape index: {}]   ;;  %s2887_s3 = inlined_call_operand.vmem [shape: f32[2,196,128], index: 3, kind: output, shape index: {}]  }
   0x1 LB: > { %s1659_s13 = sadd.s32 4294967295, %s2321_s12   ;;  %p1663_p0 = scmp.ge.s32.totalorder %s2321_s12, 1  ;;  %s2321_s12 = sphi %s2343_s12, %s13_s12  }
   0x2   : > { %p137_p1 = scmp.lt.s32.totalorder %s2321_s12, 3 }
   0x4   : > { %p138_p2 = pnand %p1663_p0, %p137_p1 }
   0x5   : > { %p161_p3 = scmp.lt.s32.totalorder (!%p138_p2), %s1659_s13, 1 }
   0x6   : > { %141 = sbr.rel (%p138_p2) target bundleno = 555 (0x22b), region = 32 }
   0xb   : > { %v2103_v0 = vld [vmem:[%s2885_s1 + $0x78] sm:$0xff]   ;;  %v2105_v2 = vld [vmem:[%s2885_s1 + $0x70] sm:$0xff]   ;;  %v2107_v4 = vld [vmem:[%s2885_s1 + $0x68] sm:$0xff]   ;;  %s2889_s13 = smov (!%p161_p3, %s1659_s13), 1  ;;  %vm1500_vm0 = vcmask 1043456  }
   0xc   : > { %v2104_v1 = vld [vmem:[%s2885_s1 + $0x38] sm:$0xff]   ;;  %1795 = vmatprep.subr.bf16.mxu0 %v2103_v0  ;;  %2077 = vmatprep.subr.bf16.mxu1 %v2103_v0  ;;  %v2106_v3 = vld [vmem:[%s2885_s1 + $0x30] sm:$0xff]   ;;  %v2108_v5 = vld [vmem:[%s2885_s1 + $0x28] sm:$0xff]   ;;  %s2093_s28 = smul.u32 600, %s2889_s13 }
   0xd   : > { %1796 = vmatpush3.bf16.msra.mxu0 %v2104_v1  ;;  %2085 = vmatpush3.bf16.msra.mxu1 %v2104_v1  ;;  %v2109_v6 = vld [vmem:[%s2885_s1 + $0x60] sm:$0xff]   ;;  %v2111_v8 = vld [vmem:[%s2885_s1 + $0x58] sm:$0xff]   ;;  %v2113_v10 = vld [vmem:[%s2885_s1 + $0x50] sm:$0xff]   ;;  %s2094_s18 = smul.u32 200, %s2889_s13 }
   0xe   : > { %1797 = vmatprep.subr.bf16.mxu0 %v2105_v2  ;;  %2078 = vmatprep.subr.bf16.mxu1 %v2105_v2  ;;  %v2110_v7 = vld [vmem:[%s2885_s1 + $0x20] sm:$0xff]   ;;  %s2384_s8 = scalar_lea.vmem %s2884_s0, %s2093_s28  ;;  %v2112_v9 = vld [vmem:[%s2885_s1 + $0x18] sm:$0xff]   ;;  %v2114_v13 = vld [vmem:[%s2885_s1 + $0x10] sm:$0xff]  }
   0xf   : > { %v2121_v11 = vld [vmem:[%s2384_s8 + $0x4] ss:$24 sps:$4 sm:$0xff]   ;;  %v2124_v12 = vld [vmem:[%s2384_s8 + $0x154] ss:$24 sps:$4 sm:$0xff]   ;;  %v2119_v19 = vld [vmem:[%s2384_s8] ss:$24 sps:$4 sm:$0xff]   ;;  %s2829_s21 = scalar_lea.vmem %s2887_s3, %s2094_s18 }
  0x10   : > { %v2115_v14 = vld [vmem:[%s2885_s1 + $0x48] sm:$0xff]   ;;  %1051 = vmatprep.mubr.bf16.mxu0 %v2121_v11  ;;  %1107 = vmatprep.mubr.bf16.mxu1 %v2124_v12  ;;  %v2117_v16 = vld [vmem:[%s2885_s1 + $0x40] sm:$0xff]   ;;  %v2125_v18 = vld [vmem:[%s2885_s1 + $0x178] sm:$0xff]  }
  0x11   : > { %1798 = vmatpush3.bf16.msra.mxu0 %v2106_v3  ;;  %2086 = vmatpush3.bf16.msra.mxu1 %v2106_v3  ;;  %v2116_v15 = vld [vmem:[%s2885_s1 + $0x8] sm:$0xff]   ;;  %v2118_v17 = vld [vmem:[%s2885_s1] sm:$0xff]   ;;  %v2127_v21 = vld [vmem:[%s2885_s1 + $0xf8] sm:$0xff]  }
  0x12   : > { %1799 = vmatprep.subr.bf16.mxu0 %v2107_v4  ;;  %2079 = vmatprep.subr.bf16.mxu1 %v2107_v4  ;;  %v2122_v20 = vld [vmem:[%s2384_s8 + $0x150] ss:$24 sps:$4 sm:$0xff]   ;;  %v2126_v22 = vld [vmem:[%s2885_s1 + $0x138] sm:$0xff]   ;;  %v2128_v23 = vld [vmem:[%s2384_s8 + $0x34] ss:$24 sps:$4 sm:$0xff]  }
  0x13   : > { %v2130_v24 = vld [vmem:[%s2384_s8 + $0x184] ss:$24 sps:$4 sm:$0xff]   ;;  %v2133_v26 = vld [vmem:[%s2885_s1 + $0x170] sm:$0xff]   ;;  %v2135_v31 = vld [vmem:[%s2384_s8 + $0x180] ss:$24 sps:$4 sm:$0xff]  }
  0x14   : > { %v2132_v25 = vld [vmem:[%s2885_s1 + $0xb8] sm:$0xff]   ;;  %v2137_v27 = vld [vmem:[%s2885_s1 + $0xf0] sm:$0xff]   ;;  %v2139_v32 = vld [vmem:[%s2885_s1 + $0x168] sm:$0xff]  }
  0x15   : > { %1800 = vmatpush3.bf16.msra.mxu0 %v2108_v5  ;;  %2087 = vmatpush3.bf16.msra.mxu1 %v2108_v5  ;;  %v2136_v28 = vld [vmem:[%s2885_s1 + $0x130] sm:$0xff]   ;;  %v2140_v33 = vld [vmem:[%s2384_s8 + $0x64] ss:$24 sps:$4 sm:$0xff]   ;;  %v2147_v34 = vld [vmem:[%s2885_s1 + $0xe8] sm:$0xff]  }
  0x16   : > { %1801 = vmatprep.subr.bf16.mxu0 %v2109_v6  ;;  %2080 = vmatprep.subr.bf16.mxu1 %v2109_v6  ;;  %v2138_v29 = vld [vmem:[%s2885_s1 + $0xb0] sm:$0xff]   ;;  %v2144_v36 = vld [vmem:[%s2885_s1 + $0x128] sm:$0xff]   ;;  %v2149_v38 = vld [vmem:[%s2885_s1 + $0x160] sm:$0xff]  }
  0x17   : > { %v2134_v30 = vld [vmem:[%s2384_s8 + $0x30] ss:$24 sps:$4 sm:$0xff]   ;;  %v2142_v35 = vld [vmem:[%s2384_s8 + $0x1b4] ss:$24 sps:$4 sm:$0xff]   ;;  %v2157_v39 = vld [vmem:[%s2885_s1 + $0xe0] sm:$0xff]  }
  0x18   : > { %v2148_v37 = vld [vmem:[%s2885_s1 + $0xa8] sm:$0xff]   ;;  %v2150_v40 = vld [vmem:[%s2885_s1 + $0x120] sm:$0xff]   ;;  %v2159_v44 = vld [vmem:[%s2885_s1 + $0x158] sm:$0xff]  }
  0x19   : > { %1802 = vmatpush3.bf16.msra.mxu0 %v2110_v7  ;;  %2088 = vmatpush3.bf16.msra.mxu1 %v2110_v7  ;;  %v2158_v41 = vld [vmem:[%s2885_s1 + $0xa0] sm:$0xff]   ;;  %v2146_v43 = vld [vmem:[%s2384_s8 + $0x1b0] ss:$24 sps:$4 sm:$0xff]   ;;  %v2161_v45 = vld [vmem:[%s2885_s1 + $0xd8] sm:$0xff]  }
  0x1a   : > { %1803 = vmatprep.subr.bf16.mxu0 %v2111_v8  ;;  %2081 = vmatprep.subr.bf16.mxu1 %v2111_v8  ;;  %v2145_v42 = vld [vmem:[%s2384_s8 + $0x60] ss:$24 sps:$4 sm:$0xff]   ;;  %v2151_v46 = vld [vmem:[%s2384_s8 + $0x94] ss:$24 sps:$4 sm:$0xff]   ;;  %v2153_v47 = vld [vmem:[%s2384_s8 + $0x1e4] ss:$24 sps:$4 sm:$0xff]  }
  0x1b   : > { %v2160_v48 = vld [vmem:[%s2885_s1 + $0x118] sm:$0xff]   ;;  %v2169_v50 = vld [vmem:[%s2885_s1 + $0x150] sm:$0xff]   ;;  %v2178_v58 = vld [vmem:[%s2885_s1 + $0xc8] sm:$0xff]  }
  0x1c   : > { %v2166_v49 = vld [vmem:[%s2885_s1 + $0x98] sm:$0xff]   ;;  %v2170_v51 = vld [vmem:[%s2885_s1 + $0xd0] sm:$0xff]   ;;  %v2179_v59 = vld [vmem:[%s2885_s1 + $0x88] sm:$0xff]  }
  0x1d   : > { %1804 = vmatpush3.bf16.msra.mxu0 %v2112_v9  ;;  %2089 = vmatpush3.bf16.msra.mxu1 %v2112_v9  ;;  %v2155_v52 = vld [vmem:[%s2384_s8 + $0x90] ss:$24 sps:$4 sm:$0xff]   ;;  %v2156_v55 = vld [vmem:[%s2384_s8 + $0x1e0] ss:$24 sps:$4 sm:$0xff]   ;;  %v2162_v56 = vld [vmem:[%s2384_s8 + $0xc4] ss:$24 sps:$4 sm:$0xff]  }
  0x1e   : > { %1805 = vmatprep.subr.bf16.mxu0 %v2113_v10  ;;  %2082 = vmatprep.subr.bf16.mxu1 %v2113_v10  ;;  %v2171_v53 = vld [vmem:[%s2885_s1 + $0x110] sm:$0xff]   ;;  %v2180_v60 = vld [vmem:[%s2885_s1 + $0x148] sm:$0xff]   ;;  %v244_v61 = vld [vmem:[%s2384_s8 + $0x240] sm:$0x33] }
  0x1f   : > { %v2172_v54 = vld [vmem:[%s2885_s1 + $0x90] sm:$0xff]   ;;  %v2181_v62 = vld [vmem:[%s2885_s1 + $0x108] sm:$0xff]   ;;  %v2182_v63 = vld [vmem:[%s2885_s1 + $0xc0] sm:$0xff]   ;;  %v1740_v4 = vcombine.high %v244_v61, %v244_v61  ;;  %v1739_v8 = vcombine.low %v244_v61, %v244_v61 }
  0x20   : > { %v2164_v57 = vld [vmem:[%s2384_s8 + $0x214] ss:$24 sps:$4 sm:$0xff]   ;;  %v2183_v0 = vld [vmem:[%s2885_s1 + $0x80] sm:$0xff]   ;;  %v2168_v2 = vld [vmem:[%s2384_s8 + $0x210] ss:$24 sps:$4 sm:$0xff]  }
  0x21   : > { %1806 = vmatpush3.bf16.msra.mxu0 %v2114_v13  ;;  %2090 = vmatpush3.bf16.msra.mxu1 %v2114_v13  ;;  %v2167_v1 = vld [vmem:[%s2384_s8 + $0xc0] ss:$24 sps:$4 sm:$0xff]   ;;  %v2173_v3 = vld [vmem:[%s2384_s8 + $0xf4] ss:$24 sps:$4 sm:$0xff]   ;;  %v2176_v7 = vld [vmem:[%s2384_s8 + $0xf0] ss:$24 sps:$4 sm:$0xff]  }
  0x22   : > { %1807 = vmatprep.subr.bf16.mxu0 %v2115_v14  ;;  %2083 = vmatprep.subr.bf16.mxu1 %v2115_v14  ;;  %v2190_v5 = vld [vmem:[%s2885_s1 + $0x140] sm:$0xff]   ;;  %v2192_v13 = vld [vmem:[%s2384_s8 + $0x3c] ss:$24 sps:$4 sm:$0xff]  }
  0x23   : > { %v2191_v6 = vld [vmem:[%s2885_s1 + $0x100] sm:$0xff]   ;;  %v2196_v14 = vld [vmem:[%s2384_s8 + $0x14] ss:$24 sps:$4 sm:$0xff]  }
  0x24   : > { %v2184_v9 = vld [vmem:[%s2384_s8 + $0x124] ss:$24 sps:$4 sm:$0xff]   ;;  %v2186_v11 = vld [vmem:[%s2384_s8 + $0x8] ss:$24 sps:$4 sm:$0xff]  }
  0x25   : > { %1808 = vmatpush3.bf16.msra.mxu0 %v2116_v15  ;;  %2091 = vmatpush3.bf16.msra.mxu1 %v2116_v15  ;;  %v2188_v10 = vld [vmem:[%s2384_s8 + $0xc] ss:$24 sps:$4 sm:$0xff]   ;;  %v2189_v12 = vld [vmem:[%s2384_s8 + $0x120] ss:$24 sps:$4 sm:$0xff]   ;;  %v2194_v15 = vld [vmem:[%s2384_s8 + $0x10] ss:$24 sps:$4 sm:$0xff]  }
  0x26   : > { %1809 = vmatprep.subr.bf16.mxu0 %v2117_v16  ;;  %2084 = vmatprep.subr.bf16.mxu1 %v2117_v16  ;;  %v2197_v16 = vld [vmem:[%s2384_s8 + $0x38] ss:$24 sps:$4 sm:$0xff]  }
  0x29   : > { %1810 = vmatpush3.bf16.msra.mxu0 %v2118_v17  ;;  %2092 = vmatpush3.bf16.msra.mxu1 %v2118_v17  ;;  %v2198_v17 = vld [vmem:[%s2384_s8 + $0x6c] ss:$24 sps:$4 sm:$0xff]  }
  0x2a   : > { %1983 = vmatprep.subr.bf16.mxu0 %v2125_v18  ;;  %1889 = vmatprep.subr.bf16.mxu1 %v2127_v21  ;;  %v2200_v18 = vld [vmem:[%s2384_s8 + $0x44] ss:$24 sps:$4 sm:$0xff]  }
  0x2b   : > { %v2204_v21 = vld [vmem:[%s2384_s8 + $0x9c] ss:$24 sps:$4 sm:$0xff]  }
  0x2c   : > { %1052 = vmatmul.mubr.bf16.vlgmr.msra.gmra.mxu0 %v2119_v19  ;;  %1108 = vmatmul.mubr.bf16.vlgmr.msra.gmra.mxu1 %v2122_v20  ;;  %v2202_v19 = vld [vmem:[%s2384_s8 + $0x68] ss:$24 sps:$4 sm:$0xff]  }
  0x2d   : > { %1984 = vmatpush3.bf16.msra.mxu0 %v2126_v22  ;;  %1059 = vmatprep.mubr.bf16.mxu0 %v2128_v23  ;;  %v2203_v20 = vld [vmem:[%s2384_s8 + $0x40] ss:$24 sps:$4 sm:$0xff]   ;;  %v2206_v22 = vld [vmem:[%s2384_s8 + $0x74] ss:$24 sps:$4 sm:$0xff]  }
  0x2e   : > { %1115 = vmatprep.mubr.bf16.mxu1 %v2130_v24  ;;  %1890 = vmatpush3.bf16.msra.mxu1 %v2132_v25  ;;  %v2208_v23 = vld [vmem:[%s2384_s8 + $0x98] ss:$24 sps:$4 sm:$0xff]   ;;  %v2210_v25 = vld [vmem:[%s2384_s8 + $0xcc] ss:$24 sps:$4 sm:$0xff]  }
  0x2f   : > { %1985 = vmatprep.subr.bf16.mxu0 %v2133_v26  ;;  %1891 = vmatprep.subr.bf16.mxu1 %v2137_v27  ;;  %v2209_v24 = vld [vmem:[%s2384_s8 + $0x70] ss:$24 sps:$4 sm:$0xff]   ;;  %v2212_v26 = vld [vmem:[%s2384_s8 + $0xa4] ss:$24 sps:$4 sm:$0xff]  }
  0x30   : > { %v2214_v27 = vld [vmem:[%s2384_s8 + $0xc8] ss:$24 sps:$4 sm:$0xff]  }
  0x31   : > { %1986 = vmatpush3.bf16.msra.mxu0 %v2136_v28  ;;  %v2215_v28 = vld [vmem:[%s2384_s8 + $0xa0] ss:$24 sps:$4 sm:$0xff]  }
  0x32   : > { %1892 = vmatpush3.bf16.msra.mxu1 %v2138_v29  ;;  %1987 = vmatprep.subr.bf16.mxu0 %v2139_v32  ;;  %v2216_v29 = vld [vmem:[%s2384_s8 + $0xfc] ss:$24 sps:$4 sm:$0xff]   ;;  %v2221_v32 = vld [vmem:[%s2384_s8 + $0xd0] ss:$24 sps:$4 sm:$0xff]  }
  0x33   : > { %1893 = vmatprep.subr.bf16.mxu1 %v2147_v34  ;;  %v2224_v34 = vld [vmem:[%s2384_s8 + $0x104] ss:$24 sps:$4 sm:$0xff]  }
  0x34   : > { %1060 = vmatmul.mubr.bf16.gmra.mxu0 %v2134_v30  ;;  %1116 = vmatmul.mubr.bf16.gmra.mxu1 %v2135_v31  ;;  %v2218_v30 = vld [vmem:[%s2384_s8 + $0xd4] ss:$24 sps:$4 sm:$0xff]   ;;  %v2220_v31 = vld [vmem:[%s2384_s8 + $0xf8] ss:$24 sps:$4 sm:$0xff]  }
  0x35   : > { %1067 = vmatprep.mubr.bf16.mxu0 %v2140_v33  ;;  %1123 = vmatprep.mubr.bf16.mxu1 %v2142_v35  ;;  %v2222_v33 = vld [vmem:[%s2384_s8 + $0x12c] ss:$24 sps:$4 sm:$0xff]   ;;  %v2226_v35 = vld [vmem:[%s2384_s8 + $0x128] ss:$24 sps:$4 sm:$0xff]  }
  0x36   : > { %1988 = vmatpush3.bf16.msra.mxu0 %v2144_v36  ;;  %1894 = vmatpush3.bf16.msra.mxu1 %v2148_v37  ;;  %v2227_v36 = vld [vmem:[%s2384_s8 + $0x100] ss:$24 sps:$4 sm:$0xff]   ;;  %v2228_v37 = vld [vmem:[%s2384_s8 + $0x15c] ss:$24 sps:$4 sm:$0xff]  }
  0x37   : > { %1989 = vmatprep.subr.bf16.mxu0 %v2149_v38  ;;  %1895 = vmatprep.subr.bf16.mxu1 %v2157_v39  ;;  %v2230_v38 = vld [vmem:[%s2384_s8 + $0x134] ss:$24 sps:$4 sm:$0xff]   ;;  %v2232_v39 = vld [vmem:[%s2384_s8 + $0x158] ss:$24 sps:$4 sm:$0xff]  }
  0x3a   : > { %1990 = vmatpush3.bf16.msra.mxu0 %v2150_v40  ;;  %1896 = vmatpush3.bf16.msra.mxu1 %v2158_v41  ;;  %v2233_v40 = vld [vmem:[%s2384_s8 + $0x130] ss:$24 sps:$4 sm:$0xff]   ;;  %v2234_v41 = vld [vmem:[%s2384_s8 + $0x18c] ss:$24 sps:$4 sm:$0xff]  }
  0x3b   : > { %1991 = vmatprep.subr.bf16.mxu0 %v2159_v44  ;;  %1897 = vmatprep.subr.bf16.mxu1 %v2161_v45  ;;  %v2239_v44 = vld [vmem:[%s2384_s8 + $0x160] ss:$24 sps:$4 sm:$0xff]   ;;  %v2240_v45 = vld [vmem:[%s2384_s8 + $0x1bc] ss:$24 sps:$4 sm:$0xff]  }
  0x3c   : > { %1068 = vmatmul.mubr.bf16.gmra.mxu0 %v2145_v42  ;;  %1124 = vmatmul.mubr.bf16.gmra.mxu1 %v2146_v43  ;;  %v2236_v42 = vld [vmem:[%s2384_s8 + $0x164] ss:$24 sps:$4 sm:$0xff]   ;;  %v2238_v43 = vld [vmem:[%s2384_s8 + $0x188] ss:$24 sps:$4 sm:$0xff]  }
  0x3d   : > { %1075 = vmatprep.mubr.bf16.mxu0 %v2151_v46  ;;  %1131 = vmatprep.mubr.bf16.mxu1 %v2153_v47  ;;  %v2242_v46 = vld [vmem:[%s2384_s8 + $0x194] ss:$24 sps:$4 sm:$0xff]   ;;  %v2244_v47 = vld [vmem:[%s2384_s8 + $0x1b8] ss:$24 sps:$4 sm:$0xff]  }
  0x3e   : > { %1992 = vmatpush3.bf16.msra.mxu0 %v2160_v48  ;;  %1898 = vmatpush3.bf16.msra.mxu1 %v2166_v49  ;;  %v2245_v48 = vld [vmem:[%s2384_s8 + $0x190] ss:$24 sps:$4 sm:$0xff]   ;;  %v2246_v49 = vld [vmem:[%s2384_s8 + $0x1ec] ss:$24 sps:$4 sm:$0xff]  }
  0x3f   : > { %1993 = vmatprep.subr.bf16.mxu0 %v2169_v50  ;;  %1899 = vmatprep.subr.bf16.mxu1 %v2170_v51  ;;  %v2248_v50 = vld [vmem:[%s2384_s8 + $0x1c4] ss:$24 sps:$4 sm:$0xff]   ;;  %v2250_v51 = vld [vmem:[%s2384_s8 + $0x1e8] ss:$24 sps:$4 sm:$0xff]  }
  0x42   : > { %1994 = vmatpush3.bf16.msra.mxu0 %v2171_v53  ;;  %1900 = vmatpush3.bf16.msra.mxu1 %v2172_v54  ;;  %v2252_v53 = vld [vmem:[%s2384_s8 + $0x21c] ss:$24 sps:$4 sm:$0xff]  }
  0x43   : > { %1901 = vmatprep.subr.bf16.mxu1 %v2178_v58  ;;  %1995 = vmatprep.subr.bf16.mxu0 %v2180_v60  ;;  %v2254_v54 = vld [vmem:[%s2384_s8 + $0x1f4] ss:$24 sps:$4 sm:$0xff]  }
  0x44   : > { %1076 = vmatmul.mubr.bf16.gmra.mxu0 %v2155_v52  ;;  %1132 = vmatmul.mubr.bf16.gmra.mxu1 %v2156_v55  ;;  %v2251_v52 = vld [vmem:[%s2384_s8 + $0x1c0] ss:$24 sps:$4 sm:$0xff]   ;;  %v245_v55 = vld [vmem:[%s2384_s8 + $0x248] sm:$0x33]  ;;  %v246_v60 = vld [vmem:[%s2384_s8 + $0x250] sm:$0x33] }
  0x45   : > { %1083 = vmatprep.mubr.bf16.mxu0 %v2162_v56  ;;  %1139 = vmatprep.mubr.bf16.mxu1 %v2164_v57  ;;  %v2256_v56 = vld [vmem:[%s2384_s8 + $0x218] ss:$24 sps:$4 sm:$0xff]   ;;  %v1742_v58 = vcombine.high %v245_v55, %v245_v55  ;;  %v1741_v61 = vcombine.low %v245_v55, %v245_v55 }
  0x46   : > { %1902 = vmatpush3.bf16.msra.mxu1 %v2179_v59  ;;  %1996 = vmatpush3.bf16.msra.mxu0 %v2181_v62  ;;  %v2257_v57 = vld [vmem:[%s2384_s8 + $0x1f0] ss:$24 sps:$4 sm:$0xff]   ;;  %v2259_v59 = vld [vmem:[%s2384_s8 + $0x224] ss:$24 sps:$4 sm:$0xff]   ;;  %v2262_v62 = vld [vmem:[%s2384_s8 + $0x220] ss:$24 sps:$4 sm:$0xff]  }
  0x47   : > { %1903 = vmatprep.subr.bf16.mxu1 %v2182_v63  ;;  %1997 = vmatprep.subr.bf16.mxu0 %v2190_v5  ;;  %v1744_v63 = vcombine.high %v246_v60, %v246_v60 }
  0x4a   : > { %1904 = vmatpush3.bf16.msra.mxu1 %v2183_v0  ;;  %1998 = vmatpush3.bf16.msra.mxu0 %v2191_v6  ;;  %v1743_v0 = vcombine.low %v246_v60, %v246_v60 }
  0x4c   : > { %1084 = vmatmul.mubr.bf16.gmra.mxu0 %v2167_v1  ;;  %1140 = vmatmul.mubr.bf16.gmra.mxu1 %v2168_v2 }
  0x4d   : > { %1091 = vmatprep.mubr.bf16.mxu0 %v2173_v3  ;;  %1147 = vmatprep.mubr.bf16.mxu1 %v1740_v4 }
  0x54   : > { %1092 = vmatmul.mubr.bf16.gmra.mxu0 %v2176_v7  ;;  %1148 = vmatmul.mubr.bf16.gmra.mxu1 %v1739_v8 }
  0x55   : > { %1099 = vmatprep.mubr.bf16.mxu0 %v2184_v9  ;;  %1187 = vmatprep.mubr.bf16.mxu1 %v2188_v10 }
  0x5c   : > { %1100 = vmatmul.mubr.bf16.gmra.mxu0 %v2189_v12  ;;  %1188 = vmatmul.mubr.bf16.vlgmr.msra.gmra.mxu1 %v2186_v11 }
  0x5d   : > { %1195 = vmatprep.mubr.bf16.mxu1 %v2192_v13  ;;  %1323 = vmatprep.mubr.bf16.mxu0 %v2196_v14 }
  0x64   : > { %1196 = vmatmul.mubr.bf16.gmra.mxu1 %v2197_v16  ;;  %1324 = vmatmul.mubr.bf16.vlgmr.msra.gmra.mxu0 %v2194_v15  ;;  %v2597_v16 = vld [vmem:[%s2886_s2] ss:$0 sm:$0xff] }
  0x65   : > { %1203 = vmatprep.mubr.bf16.mxu1 %v2198_v17  ;;  %1331 = vmatprep.mubr.bf16.mxu0 %v2200_v18 }
  0x6c   : > { %1204 = vmatmul.mubr.bf16.gmra.mxu1 %v2202_v19  ;;  %1332 = vmatmul.mubr.bf16.gmra.mxu0 %v2203_v20 }
  0x6d   : > { %1211 = vmatprep.mubr.bf16.mxu1 %v2204_v21  ;;  %1339 = vmatprep.mubr.bf16.mxu0 %v2206_v22 }
  0x74   : > { %1212 = vmatmul.mubr.bf16.gmra.mxu1 %v2208_v23  ;;  %1340 = vmatmul.mubr.bf16.gmra.mxu0 %v2209_v24 }
  0x75   : > { %1219 = vmatprep.mubr.bf16.mxu1 %v2210_v25  ;;  %1347 = vmatprep.mubr.bf16.mxu0 %v2212_v26 }
  0x7c   : > { %1220 = vmatmul.mubr.bf16.gmra.mxu1 %v2214_v27  ;;  %1348 = vmatmul.mubr.bf16.gmra.mxu0 %v2215_v28 }
  0x7d   : > { %1227 = vmatprep.mubr.bf16.mxu1 %v2216_v29  ;;  %1355 = vmatprep.mubr.bf16.mxu0 %v2218_v30 }
  0x84   : > { %1228 = vmatmul.mubr.bf16.gmra.mxu1 %v2220_v31  ;;  %1356 = vmatmul.mubr.bf16.gmra.mxu0 %v2221_v32 }
  0x85   : > { %1235 = vmatprep.mubr.bf16.mxu1 %v2222_v33  ;;  %1363 = vmatprep.mubr.bf16.mxu0 %v2224_v34 }
  0x8c   : > { %1236 = vmatmul.mubr.bf16.gmra.mxu1 %v2226_v35  ;;  %1364 = vmatmul.mubr.bf16.gmra.mxu0 %v2227_v36 }
  0x8d   : > { %1243 = vmatprep.mubr.bf16.mxu1 %v2228_v37  ;;  %1371 = vmatprep.mubr.bf16.mxu0 %v2230_v38 }
  0x94   : > { %1244 = vmatmul.mubr.bf16.gmra.mxu1 %v2232_v39  ;;  %1372 = vmatmul.mubr.bf16.gmra.mxu0 %v2233_v40 }
  0x95   : > { %1251 = vmatprep.mubr.bf16.mxu1 %v2234_v41  ;;  %1379 = vmatprep.mubr.bf16.mxu0 %v2236_v42 }
  0x9c   : > { %1252 = vmatmul.mubr.bf16.gmra.mxu1 %v2238_v43  ;;  %1380 = vmatmul.mubr.bf16.gmra.mxu0 %v2239_v44 }
  0x9d   : > { %1259 = vmatprep.mubr.bf16.mxu1 %v2240_v45  ;;  %1387 = vmatprep.mubr.bf16.mxu0 %v2242_v46 }
  0xa4   : > { %1260 = vmatmul.mubr.bf16.gmra.mxu1 %v2244_v47  ;;  %1388 = vmatmul.mubr.bf16.gmra.mxu0 %v2245_v48 }
  0xa5   : > { %1267 = vmatprep.mubr.bf16.mxu1 %v2246_v49  ;;  %1395 = vmatprep.mubr.bf16.mxu0 %v2248_v50 }
  0xac   : > { %1268 = vmatmul.mubr.bf16.gmra.mxu1 %v2250_v51  ;;  %1396 = vmatmul.mubr.bf16.gmra.mxu0 %v2251_v52 }
  0xad   : > { %1275 = vmatprep.mubr.bf16.mxu1 %v2252_v53  ;;  %1403 = vmatprep.mubr.bf16.mxu0 %v2254_v54 }
  0xb4   : > { %1276 = vmatmul.mubr.bf16.gmra.mxu1 %v2256_v56  ;;  %1404 = vmatmul.mubr.bf16.gmra.mxu0 %v2257_v57 }
  0xb5   : > { %1283 = vmatprep.mubr.bf16.mxu1 %v1742_v58  ;;  %1411 = vmatprep.mubr.bf16.mxu0 %v2259_v59 }
  0xbc   : > { %1284 = vmatmul.mubr.bf16.gmra.mxu1 %v1741_v61  ;;  %1412 = vmatmul.mubr.bf16.gmra.mxu0 %v2262_v62 }
  0xbd   : > { %1419 = vmatprep.mubr.bf16.mxu0 %v1744_v63 }
  0xc4   : > { %1420 = vmatmul.mubr.bf16.gmra.mxu0 %v1743_v0 }
  0xec   : > { %v2578_v1 = vpop.f32.mrf.mxu0  ;;  %v1853_v2 = vpop.f32.mrf.mxu1 }
  0xee   : > { %v2580_v3 = vpop.f32.mrf.mxu0  ;;  %v1854_v4 = vpop.f32.mrf.mxu1 }
  0xef   : > { %v2582_v5 = vadd.f32 %v1854_v4, %v1853_v2 }
  0xf0   : > { %v2584_v6 = vpop.f32.mrf.mxu0  ;;  %v1856_v7 = vpop.f32.mrf.mxu1 }
  0xf2   : > { %v2586_v8 = vpop.f32.mrf.mxu0  ;;  %v1857_v9 = vpop.f32.mrf.mxu1 }
  0xf3   : > { %v2588_v10 = vadd.f32 %v1857_v9, %v1856_v7 }
  0xf4   : > { %v2590_v11 = vpop.f32.mrf.mxu0  ;;  %v1859_v12 = vpop.f32.mrf.mxu1 }
  0xf6   : > { %v2592_v13 = vpop.f32.mrf.mxu0  ;;  %v1860_v14 = vpop.f32.mrf.mxu1 }
  0xf7   : > { %v1861_v15 = vadd.f32 %v1860_v14, %v1859_v12 }
  0xf8   : > { %v2599_v17 = vpop.f32.mrf.mxu0  ;;  %v1862_v18 = vpop.f32.mrf.mxu1 }
  0xf9   : > { %v2602_v19 = vadd.f32 %v1861_v15, %v2597_v16 }
  0xfa   : > { %v2604_v20 = vpop.f32.mrf.mxu0  ;;  %v1863_v21 = vpop.f32.mrf.mxu1 }
  0xfb   : > { %v1864_v22 = vadd.f32 %v1863_v21, %v1862_v18 }
  0xfc   : > { %v2606_v23 = vpop.f32.mrf.mxu0  ;;  %v1865_v24 = vpop.f32.mrf.mxu1 }
  0xfd   : > { %v2609_v25 = vadd.f32 %v1864_v22, %v2597_v16 }
  0xfe   : > { %v2611_v26 = vpop.f32.mrf.mxu0  ;;  %v1866_v27 = vpop.f32.mrf.mxu1 }
  0xff   : > { %v1867_v28 = vadd.f32 %v1866_v27, %v1865_v24  ;;  %v1813_v27 = vadd.f32 %v2580_v3, %v2578_v1  ;;  %v1819_v3 = vadd.f32 %v2592_v13, %v2590_v11 }
 0x100   : > { %v2613_v29 = vpop.f32.mrf.mxu0  ;;  %v1868_v30 = vpop.f32.mrf.mxu1 }
 0x101   : > { %v2616_v31 = vadd.f32 %v1867_v28, %v2597_v16 }
 0x102   : > { %v2618_v32 = vpop.f32.mrf.mxu0  ;;  %v1869_v33 = vpop.f32.mrf.mxu1 }
 0x103   : > { %v1870_v34 = vadd.f32 %v1869_v33, %v1868_v30 }
 0x104   : > { %v2620_v35 = vpop.f32.mrf.mxu0  ;;  %v1871_v36 = vpop.f32.mrf.mxu1 }
 0x105   : > { %v2623_v37 = vadd.f32 %v1870_v34, %v2597_v16 }
 0x106   : > { %v2625_v38 = vpop.f32.mrf.mxu0  ;;  %v1872_v39 = vpop.f32.mrf.mxu1 }
 0x107   : > { %v1873_v40 = vadd.f32 %v1872_v39, %v1871_v36  ;;  %v1054_v39 = vadd.f32 %v1813_v27, %v2597_v16 }
 0x108   : > { %v2627_v41 = vpop.f32.mrf.mxu0  ;;  %v1874_v42 = vpop.f32.mrf.mxu1 }
 0x109   : > { %v2630_v43 = vadd.f32 %v1873_v40, %v2597_v16  ;;  %v1816_v40 = vadd.f32 %v2586_v8, %v2584_v6 }
 0x10a   : > { %v2632_v44 = vpop.f32.mrf.mxu0  ;;  %v1875_v45 = vpop.f32.mrf.mxu1 }
 0x10b   : > { %v1876_v46 = vadd.f32 %v1875_v45, %v1874_v42  ;;  %v1057_v1 = vadd.f32 %v1816_v40, %v2597_v16 }
 0x10c   : > { %v2634_v47 = vpop.f32.mrf.mxu0  ;;  %v1877_v48 = vpop.f32.mrf.mxu1 }
 0x10d   : > { %v2637_v49 = vadd.f32 %v1876_v46, %v2597_v16 }
 0x10e   : > { %v2639_v50 = vpop.f32.mrf.mxu0  ;;  %v1878_v51 = vpop.f32.mrf.mxu1 }
 0x10f   : > { %v1879_v52 = vadd.f32 %v1878_v51, %v1877_v48 }
 0x110   : > { %v2641_v53 = vpop.f32.mrf.mxu0  ;;  %v1880_v54 = vpop.f32.mrf.mxu1 }
 0x111   : > { %v2644_v55 = vadd.f32 %v1879_v52, %v2597_v16 }
 0x112   : > { %v2646_v56 = vpop.f32.mrf.mxu0  ;;  %v1881_v57 = vpop.f32.mrf.mxu1 }
 0x113   : > { %v1882_v58 = vadd.f32 %v1881_v57, %v1880_v54 }
 0x114   : > { %v2648_v59 = vpop.f32.mrf.mxu0  ;;  %v1883_v60 = vpop.f32.mrf.mxu1 }
 0x115   : > { %v2651_v61 = vadd.f32 %v1882_v58, %v2597_v16 }
 0x116   : > { %v2653_v62 = vpop.f32.mrf.mxu0  ;;  %v1884_v63 = vpop.f32.mrf.mxu1 }
 0x117   : > { %v1885_v0 = vadd.f32 %v1884_v63, %v1883_v60 }
 0x118   : > { %v2655_v2 = vpop.f32.mrf.mxu0  ;;  %v1886_v4 = vpop.f32.mrf.mxu1 }
 0x119   : > { %v2658_v7 = vadd.f32 %v1885_v0, %v2597_v16 }
 0x11a   : > { %v2660_v9 = vpop.f32.mrf.mxu0  ;;  %v1887_v12 = vpop.f32.mrf.mxu1 }
 0x11c   : > { %v2662_v14 = vpop.f32.mrf.mxu0  ;;  %v1905_v15 = vpop.f32.mrf.mxu1 }
 0x11e   : > { %v2664_v18 = vpop.f32.mrf.mxu0  ;;  %v1906_v21 = vpop.f32.mrf.mxu1 }
 0x11f   : > { %v1907_v33 = vadd.f32 %v1906_v21, %v1905_v15  ;;  %v1062_v15 = vadd.f32 %v1819_v3, %v2597_v16  ;;  %v1822_v21 = vadd.f32 %v2604_v20, %v2599_v17 }
 0x120   : > { %v2666_v22 = vpop.f32.mrf.mxu0  ;;  %v1908_v24 = vpop.f32.mrf.mxu1 }
 0x121   : > { %v1190_v46 = vadd.f32 %v1907_v33, %v1054_v39  ;;  %v1065_v40 = vadd.f32 %v1822_v21, %v2597_v16  ;;  %v1831_v21 = vadd.f32 %v2625_v38, %v2620_v35 }
 0x122   : > { %v2670_v28 = vpop.f32.mrf.mxu0  ;;  %v1909_v30 = vpop.f32.mrf.mxu1 }
 0x123   : > { %v1910_v48 = vadd.f32 %v1909_v30, %v1908_v24 }
 0x124   : > { %v1911_v34 = vpop.f32.mrf.mxu1  ;;  %v1999_v36 = vpop.f32.mrf.mxu0 }
 0x125   : > { %v1193_v63 = vadd.f32 %v1910_v48, %v1057_v1 }
 0x126   : > { %v1912_v42 = vpop.f32.mrf.mxu1  ;;  %v2000_v45 = vpop.f32.mrf.mxu0 }
 0x127   : > { %v2001_v51 = vadd.f32 %v2000_v45, %v1999_v36  ;;  %v1913_v0 = vadd.f32 %v1912_v42, %v1911_v34  ;;  %v1825_v42 = vadd.f32 %v2611_v26, %v2606_v23 }
 0x128   : > { %v1914_v52 = vpop.f32.mrf.mxu1  ;;  %v2002_v54 = vpop.f32.mrf.mxu0 }
 0x129   : > { %v2678_v57 = vadd.f32 %v2001_v51, %v1190_v46  ;;  %v1198_v27 = vadd.f32 %v1913_v0, %v1062_v15  ;;  %v1070_v3 = vadd.f32 %v1825_v42, %v2597_v16 }
 0x12a   : > { %v1915_v58 = vpop.f32.mrf.mxu1  ;;  %v2003_v60 = vpop.f32.mrf.mxu0 }
 0x12b   : > { %v2004_v4 = vadd.f32 %v2003_v60, %v2002_v54  ;;  %v1427_v6 = vmul.f32 %v2678_v57, %v2678_v57  ;;  %v1916_v30 = vadd.f32 %v1915_v58, %v1914_v52  ;;  %v1828_v58 = vadd.f32 %v2618_v32, %v2613_v29 }
 0x12c   : > { %v1917_v8 = vpop.f32.mrf.mxu1  ;;  %v2005_v12 = vpop.f32.mrf.mxu0 }
 0x12d   : > { %v2685_v24 = vadd.f32 %v2004_v4, %v1193_v63  ;;  %1452 = vadd.xlane.f32.xlu0 %v1427_v6  ;;  %v1201_v46 = vadd.f32 %v1916_v30, %v1065_v40  ;;  %v1073_v15 = vadd.f32 %v1828_v58, %v2597_v16  ;;  %v1834_v40 = vadd.f32 %v2632_v44, %v2627_v41 }
 0x12e   : > { %v1918_v11 = vpop.f32.mrf.mxu1  ;;  %v2006_v13 = vpop.f32.mrf.mxu0 }
 0x12f   : > { %v2007_v33 = vadd.f32 %v2006_v13, %v2005_v12  ;;  %v1428_v34 = vmul.f32 %v2685_v24, %v2685_v24  ;;  %v1919_v48 = vadd.f32 %v1918_v11, %v1917_v8 }
 0x130   : > { %v1920_v36 = vpop.f32.mrf.mxu1  ;;  %v2008_v39 = vpop.f32.mrf.mxu0 }
 0x131   : > { %1454 = vadd.xlane.f32.xlu0 %v1428_v34  ;;  %v2692_v17 = vadd.f32 %v2007_v33, %v1198_v27  ;;  %v1206_v63 = vadd.f32 %v1919_v48, %v1070_v3 }
 0x132   : > { %v1921_v20 = vpop.f32.mrf.mxu1  ;;  %v2009_v45 = vpop.f32.mrf.mxu0 }
 0x133   : > { %v2010_v51 = vadd.f32 %v2009_v45, %v2008_v39  ;;  %v1429_v52 = vmul.f32 %v2692_v17, %v2692_v17  ;;  %v1922_v0 = vadd.f32 %v1921_v20, %v1920_v36  ;;  %v1078_v39 = vadd.f32 %v1831_v21, %v2597_v16 }
 0x134   : > { %v1923_v54 = vpop.f32.mrf.mxu1  ;;  %v2011_v1 = vpop.f32.mrf.mxu0 }
 0x135   : > { %v2699_v60 = vadd.f32 %v2010_v51, %v1201_v46  ;;  %1456 = vadd.xlane.f32.xlu1 %v1429_v52  ;;  %v1209_v13 = vadd.f32 %v1922_v0, %v1073_v15 }
 0x136   : > { %v1924_v23 = vpop.f32.mrf.mxu1  ;;  %v2012_v26 = vpop.f32.mrf.mxu0 }
 0x137   : > { %v2013_v4 = vadd.f32 %v2012_v26, %v2011_v1  ;;  %v1430_v6 = vmul.f32 %v2699_v60, %v2699_v60  ;;  %v1925_v27 = vadd.f32 %v1924_v23, %v1923_v54  ;;  %v1081_v54 = vadd.f32 %v1834_v40, %v2597_v16 }
 0x138   : > { %v1926_v8 = vpop.f32.mrf.mxu1  ;;  %v2014_v12 = vpop.f32.mrf.mxu0  ;;  %v1837_v1 = vadd.f32 %v2639_v50, %v2634_v47 }
 0x139   : > { %v2706_v11 = vadd.f32 %v2013_v4, %v1206_v63  ;;  %1458 = vadd.xlane.f32.xlu1 %v1430_v6  ;;  %v1214_v20 = vadd.f32 %v1925_v27, %v1078_v39 }
 0x13a   : > { %v1927_v29 = vpop.f32.mrf.mxu1  ;;  %v2015_v32 = vpop.f32.mrf.mxu0  ;;  %v1086_v6 = vadd.f32 %v1837_v1, %v2597_v16 }
 0x13b   : > { %v2016_v30 = vadd.f32 %v2015_v32, %v2014_v12  ;;  %v1431_v33 = vmul.f32 %v2706_v11, %v2706_v11  ;;  %v1928_v45 = vadd.f32 %v1927_v29, %v1926_v8  ;;  %v1840_v8 = vadd.f32 %v2646_v56, %v2641_v53 }
 0x13c   : > { %v1929_v34 = vpop.f32.mrf.mxu1  ;;  %v2017_v36 = vpop.f32.mrf.mxu0 }
 0x13d   : > { %v2713_v42 = vadd.f32 %v2016_v30, %v1209_v13  ;;  %1460 = vadd.xlane.f32.xlu0 %v1431_v33  ;;  %v1217_v58 = vadd.f32 %v1928_v45, %v1081_v54  ;;  %v1089_v30 = vadd.f32 %v1840_v8, %v2597_v16  ;;  %v1843_v33 = vadd.f32 %v2653_v62, %v2648_v59 }
 0x13e   : > { %v1930_v35 = vpop.f32.mrf.mxu1  ;;  %v2018_v38 = vpop.f32.mrf.mxu0 }
 0x13f   : > { %v2019_v46 = vadd.f32 %v2018_v38, %v2017_v36  ;;  %v1432_v48 = vmul.f32 %v2713_v42, %v2713_v42  ;;  %v1931_v23 = vadd.f32 %v1930_v35, %v1929_v34  ;;  %v1094_v45 = vadd.f32 %v1843_v33, %v2597_v16 }
 0x140   : > { %v1932_v51 = vpop.f32.mrf.mxu1  ;;  %v2020_v52 = vpop.f32.mrf.mxu0 }
 0x141   : > { %v2720_v3 = vadd.f32 %v2019_v46, %v1214_v20  ;;  %1462 = vadd.xlane.f32.xlu1 %v1432_v48  ;;  %v1222_v15 = vadd.f32 %v1931_v23, %v1086_v6  ;;  %v1846_v46 = vadd.f32 %v2660_v9, %v2655_v2  ;;  %v1849_v23 = vadd.f32 %v2664_v18, %v2662_v14 }
 0x142   : > { %v1933_v41 = vpop.f32.mrf.mxu1  ;;  %v2021_v44 = vpop.f32.mrf.mxu0 }
 0x143   : > { %v2022_v26 = vadd.f32 %v2021_v44, %v2020_v52  ;;  %v1433_v63 = vmul.f32 %v2720_v3, %v2720_v3  ;;  %v1934_v21 = vadd.f32 %v1933_v41, %v1932_v51 }
 0x144   : > { %v1935_v0 = vpop.f32.mrf.mxu1  ;;  %v2023_v4 = vpop.f32.mrf.mxu0 }
 0x145   : > { %v2727_v12 = vadd.f32 %v2022_v26, %v1217_v58  ;;  %1464 = vadd.xlane.f32.xlu0 %v1433_v63  ;;  %v1225_v36 = vadd.f32 %v1934_v21, %v1089_v30  ;;  %v1097_v58 = vadd.f32 %v1846_v46, %v2597_v16 }
 0x146   : > { %v1936_v47 = vpop.f32.mrf.mxu1  ;;  %v2024_v50 = vpop.f32.mrf.mxu0 }
 0x147   : > { %v2025_v29 = vadd.f32 %v2024_v50, %v2023_v4  ;;  %v1434_v32 = vmul.f32 %v2727_v12, %v2727_v12  ;;  %v1937_v39 = vadd.f32 %v1936_v47, %v1935_v0  ;;  %v1102_v50 = vadd.f32 %v1849_v23, %v2597_v16 }
 0x148   : > { %v1938_v13 = vpop.f32.mrf.mxu1  ;;  %v2026_v27 = vpop.f32.mrf.mxu0 }
 0x149   : > { %v2734_v34 = vadd.f32 %v2025_v29, %v1222_v15  ;;  %1466 = vadd.xlane.f32.xlu1 %v1434_v32  ;;  %v1230_v51 = vadd.f32 %v1937_v39, %v1094_v45  ;;  %v1852_v15 = vadd.f32 %v2670_v28, %v2666_v22  ;;  %v1110_v45 = vadd.f32 %v2582_v5, %v2597_v16 }
 0x14a   : > { %v1939_v53 = vpop.f32.mrf.mxu1  ;;  %v2027_v56 = vpop.f32.mrf.mxu0 }
 0x14b   : > { %v2028_v40 = vadd.f32 %v2027_v56, %v2026_v27  ;;  %v1435_v35 = vmul.f32 %v2734_v34, %v2734_v34  ;;  %v1940_v52 = vadd.f32 %v1939_v53, %v1938_v13  ;;  %v1105_v53 = vadd.f32 %v1852_v15, %v2597_v16 }
 0x14c   : > { %v1941_v38 = vpop.f32.mrf.mxu1  ;;  %v2029_v20 = vpop.f32.mrf.mxu0 }
 0x14d   : > { %v2741_v48 = vadd.f32 %v2028_v40, %v1225_v36  ;;  %1468 = vadd.xlane.f32.xlu0 %v1435_v35  ;;  %v1233_v63 = vadd.f32 %v1940_v52, %v1097_v58  ;;  %v1113_v58 = vadd.f32 %v2588_v10, %v2597_v16 }
 0x14e   : > { %v1942_v59 = vpop.f32.mrf.mxu1  ;;  %v2030_v62 = vpop.f32.mrf.mxu0 }
 0x14f   : > { %v2031_v54 = vadd.f32 %v2030_v62, %v2029_v20  ;;  %v1436_v1 = vmul.f32 %v2741_v48, %v2741_v48  ;;  %v1943_v0 = vadd.f32 %v1942_v59, %v1941_v38 }
 0x150   : > { %v1944_v41 = vpop.f32.mrf.mxu1  ;;  %v2032_v44 = vpop.f32.mrf.mxu0 }
 0x151   : > { %v2748_v26 = vadd.f32 %v2031_v54, %v1230_v51  ;;  %1470 = vadd.xlane.f32.xlu1 %v1436_v1  ;;  %v1238_v29 = vadd.f32 %v1943_v0, %v1102_v50 }
 0x152   : > { %v1945_v2 = vpop.f32.mrf.mxu1  ;;  %v2033_v9 = vpop.f32.mrf.mxu0 }
 0x153   : > { %v2034_v4 = vadd.f32 %v2033_v9, %v2032_v44  ;;  %v1437_v6 = vmul.f32 %v2748_v26, %v2748_v26  ;;  %v1946_v32 = vadd.f32 %v1945_v2, %v1944_v41 }
 0x154   : > { %v1947_v8 = vpop.f32.mrf.mxu1  ;;  %v2035_v47 = vpop.f32.mrf.mxu0 }
 0x155   : > { %v2755_v21 = vadd.f32 %v2034_v4, %v1233_v63  ;;  %1472 = vadd.xlane.f32.xlu0 %v1437_v6  ;;  %v1241_v28 = vadd.f32 %v1946_v32, %v1105_v53 }
 0x156   : > { %v1948_v14 = vpop.f32.mrf.mxu1  ;;  %v2036_v18 = vpop.f32.mrf.mxu0 }
 0x157   : > { %v2037_v13 = vadd.f32 %v2036_v18, %v2035_v47  ;;  %v1438_v27 = vmul.f32 %v2755_v21, %v2755_v21  ;;  %v1949_v39 = vadd.f32 %v1948_v14, %v1947_v8 }
 0x158   : > { %v1950_v30 = vpop.f32.mrf.mxu1  ;;  %v2038_v33 = vpop.f32.mrf.mxu0 }
 0x159   : > { %v2760_v56 = vadd.f32 %v2037_v13, %v1238_v29  ;;  %1474 = vadd.xlane.f32.xlu1 %v1438_v27  ;;  %v1246_v51 = vadd.f32 %v1949_v39, %v1110_v45 }
 0x15a   : > { %v1951_v36 = vpop.f32.mrf.mxu1  ;;  %v2039_v22 = vpop.f32.mrf.mxu0 }
 0x15b   : > { %v2040_v40 = vadd.f32 %v2039_v22, %v2038_v33  ;;  %v1439_v35 = vmul.f32 %v2760_v56, %v2760_v56  ;;  %v1952_v52 = vadd.f32 %v1951_v36, %v1950_v30 }
 0x15c   : > { %v1953_v38 = vpop.f32.mrf.mxu1  ;;  %v2041_v20 = vpop.f32.mrf.mxu0 }
 0x15d   : > { %v2766_v46 = vadd.f32 %v2040_v40, %v1241_v28  ;;  %1476 = vadd.xlane.f32.xlu0 %v1439_v35  ;;  %v1249_v9 = vadd.f32 %v1952_v52, %v1113_v58 }
 0x15e   : > { %v1954_v59 = vpop.f32.mrf.mxu1  ;;  %v2042_v62 = vpop.f32.mrf.mxu0 }
 0x15f   : > { %v2043_v54 = vadd.f32 %v2042_v62, %v2041_v20  ;;  %v1440_v1 = vmul.f32 %v2766_v46, %v2766_v46  ;;  %v1955_v63 = vadd.f32 %v1954_v59, %v1953_v38 }
 0x160   : > { %v1956_v41 = vpop.f32.mrf.mxu1  ;;  %v2044_v44 = vpop.f32.mrf.mxu0 }
 0x161   : > { %v2772_v23 = vadd.f32 %v2043_v54, %v1246_v51  ;;  %1478 = vadd.xlane.f32.xlu1 %v1440_v1  ;;  %v1254_v10 = vadd.f32 %v1955_v63, %v2602_v19 }
 0x162   : > { %v1957_v5 = vpop.f32.mrf.mxu1  ;;  %v2045_v2 = vpop.f32.mrf.mxu0 }
 0x163   : > { %v2046_v0 = vadd.f32 %v2045_v2, %v2044_v44  ;;  %v1441_v4 = vmul.f32 %v2772_v23, %v2772_v23  ;;  %v1958_v16 = vadd.f32 %v1957_v5, %v1956_v41 }
 0x164   : > { %v1959_v6 = vpop.f32.mrf.mxu1  ;;  %v2047_v8 = vpop.f32.mrf.mxu0 }
 0x165   : > { %v2776_v47 = vadd.f32 %v2046_v0, %v1249_v9  ;;  %1480 = vadd.xlane.f32.xlu0 %v1441_v4  ;;  %v1257_v33 = vadd.f32 %v1958_v16, %v2609_v25 }
 0x166   : > { %v1960_v50 = vpop.f32.mrf.mxu1  ;;  %v2048_v15 = vpop.f32.mrf.mxu0 }
 0x167   : > { %v2049_v14 = vadd.f32 %v2048_v15, %v2047_v8  ;;  %v1442_v18 = vmul.f32 %v2776_v47, %v2776_v47  ;;  %v1961_v53 = vadd.f32 %v1960_v50, %v1959_v6 }
 0x168   : > { %v1962_v29 = vpop.f32.mrf.mxu1  ;;  %v2050_v32 = vpop.f32.mrf.mxu0 }
 0x169   : > { %v2781_v13 = vadd.f32 %v2049_v14, %v1254_v10  ;;  %1482 = vadd.xlane.f32.xlu1 %v1442_v18  ;;  %v1262_v38 = vadd.f32 %v1961_v53, %v2616_v31 }
 0x16a   : > { %v1963_v27 = vpop.f32.mrf.mxu1  ;;  %v2051_v30 = vpop.f32.mrf.mxu0 }
 0x16b   : > { %v2052_v36 = vadd.f32 %v2051_v30, %v2050_v32  ;;  %v1443_v22 = vmul.f32 %v2781_v13, %v2781_v13  ;;  %v1964_v20 = vadd.f32 %v1963_v27, %v1962_v29 }
 0x16c   : > { %v1965_v19 = vpop.f32.mrf.mxu1  ;;  %v2053_v28 = vpop.f32.mrf.mxu0 }
 0x16d   : > { %v2786_v39 = vadd.f32 %v2052_v36, %v1257_v33  ;;  %1484 = vadd.xlane.f32.xlu0 %v1443_v22  ;;  %v1265_v1 = vadd.f32 %v1964_v20, %v2623_v37 }
 0x16e   : > { %v1966_v40 = vpop.f32.mrf.mxu1  ;;  %v2054_v35 = vpop.f32.mrf.mxu0 }
 0x16f   : > { %v2055_v45 = vadd.f32 %v2054_v35, %v2053_v28  ;;  %v1444_v59 = vmul.f32 %v2786_v39, %v2786_v39  ;;  %v1967_v41 = vadd.f32 %v1966_v40, %v1965_v19 }
 0x170   : > { %v1968_v25 = vpop.f32.mrf.mxu1  ;;  %v2056_v62 = vpop.f32.mrf.mxu0 }
 0x171   : > { %v2791_v51 = vadd.f32 %v2055_v45, %v1262_v38  ;;  %1486 = vadd.xlane.f32.xlu1 %v1444_v59  ;;  %v1270_v0 = vadd.f32 %v1967_v41, %v2630_v43 }
 0x172   : > { %v1969_v52 = vpop.f32.mrf.mxu1  ;;  %v2057_v54 = vpop.f32.mrf.mxu0 }
 0x173   : > { %v2058_v44 = vadd.f32 %v2057_v54, %v2056_v62  ;;  %v1445_v58 = vmul.f32 %v2791_v51, %v2791_v51  ;;  %v1970_v4 = vadd.f32 %v1969_v52, %v1968_v25 }
 0x174   : > { %v1971_v31 = vpop.f32.mrf.mxu1  ;;  %v2059_v5 = vpop.f32.mrf.mxu0 }
 0x175   : > { %v2796_v2 = vadd.f32 %v2058_v44, %v1265_v1  ;;  %1488 = vadd.xlane.f32.xlu0 %v1445_v58  ;;  %v1273_v14 = vadd.f32 %v1970_v4, %v2637_v49 }
 0x176   : > { %v1972_v9 = vpop.f32.mrf.mxu1  ;;  %v2060_v63 = vpop.f32.mrf.mxu0 }
 0x177   : > { %v2061_v6 = vadd.f32 %v2060_v63, %v2059_v5  ;;  %v1446_v8 = vmul.f32 %v2796_v2, %v2796_v2  ;;  %v1973_v18 = vadd.f32 %v1972_v9, %v1971_v31 }
 0x178   : > { %v1974_v37 = vpop.f32.mrf.mxu1  ;;  %v2062_v50 = vpop.f32.mrf.mxu0 }
 0x179   : > { %v2801_v15 = vadd.f32 %v2061_v6, %v1270_v0  ;;  %1490 = vadd.xlane.f32.xlu1 %v1446_v8  ;;  %v1278_v36 = vadd.f32 %v1973_v18, %v2644_v55 }
 0x17a   : > { %v1975_v10 = vpop.f32.mrf.mxu1  ;;  %v2063_v16 = vpop.f32.mrf.mxu0 }
 0x17b   : > { %v2064_v29 = vadd.f32 %v2063_v16, %v2062_v50  ;;  %v1447_v32 = vmul.f32 %v2801_v15, %v2801_v15  ;;  %v1976_v22 = vadd.f32 %v1975_v10, %v1974_v37 }
 0x17c   : > { %v1977_v43 = vpop.f32.mrf.mxu1  ;;  %v2065_v27 = vpop.f32.mrf.mxu0 }
 0x17d   : > { %v2806_v30 = vadd.f32 %v2064_v29, %v1273_v14  ;;  %1492 = vadd.xlane.f32.xlu0 %v1447_v32  ;;  %v1281_v45 = vadd.f32 %v1976_v22, %v2651_v61 }
 0x17e   : > { %v1978_v33 = vpop.f32.mrf.mxu1  ;;  %v2066_v53 = vpop.f32.mrf.mxu0 }
 0x17f   : > { %v2067_v19 = vadd.f32 %v2066_v53, %v2065_v27  ;;  %v1448_v28 = vmul.f32 %v2806_v30, %v2806_v30  ;;  %v1979_v59 = vadd.f32 %v1978_v33, %v1977_v43 }
 0x180   : > { %v2068_v49 = vpop.f32.mrf.mxu0  ;;  %v1980_v40 = vpop.f32.mrf.mxu1 }
 0x181   : > { %v2811_v35 = vadd.f32 %v2067_v19, %v1278_v36  ;;  %1494 = vadd.xlane.f32.xlu1 %v1448_v28  ;;  %v1286_v1 = vadd.f32 %v1979_v59, %v2658_v7 }
 0x182   : > { %v2069_v38 = vpop.f32.mrf.mxu0  ;;  %v1981_v20 = vpop.f32.mrf.mxu1 }
 0x183   : > { %v2070_v25 = vadd.f32 %v2069_v38, %v2068_v49  ;;  %v1449_v62 = vmul.f32 %v2811_v35, %v2811_v35 }
 0x184   : > { %v2071_v55 = vpop.f32.mrf.mxu0 }
 0x185   : > { %v2816_v52 = vadd.f32 %v2070_v25, %v1281_v45  ;;  %1496 = vadd.xlane.f32.xlu0 %v1449_v62 }
 0x186   : > { %v2072_v54 = vpop.f32.mrf.mxu0 }
 0x187   : > { %v2073_v41 = vadd.f32 %v2072_v54, %v2071_v55  ;;  %v1450_v44 = vmul.f32 %v2816_v52, %v2816_v52 }
 0x188   : > { %v2074_v58 = vpop.f32.mrf.mxu0 }
 0x189   : > { %v2821_v31 = vadd.f32 %v2073_v41, %v1286_v1  ;;  %1498 = vadd.xlane.f32.xlu1 %v1450_v44 }
 0x18a   : > { %v2075_v61 = vpop.f32.mrf.mxu0 }
 0x18b   : > { %v1451_v5 = vmul.f32 %v2821_v31, %v2821_v31 }
 0x18d   : > { %v1501_v9 = vsel %vm1500_vm0, %v1451_v5, 0.0 }
 0x18e   : > { %1502 = vadd.xlane.f32.xlu0 %v1501_v9 }
 0x1b6   : > { %v1453_v63 = vpop.xlane.xlu0 %1452 }
 0x1b7   : > { %v1504_v0 = vmax.f32 %v1453_v63, 1e-24 }
 0x1b9   : > { %2265 = vrsqrt.f32 %v1504_v0 }
 0x1ba   : > { %v1455_v7 = vpop.xlane.xlu0 %1454 }
 0x1bb   : > { %v1505_v4 = vmax.f32 %v1455_v7, 1e-24 }
 0x1bd   : > { %2267 = vrsqrt.f32 %v1505_v4 }
 0x1be   : > { %v1457_v6 = vpop.xlane.xlu1 %1456 }
 0x1bf   : > { %v1506_v8 = vmax.f32 %v1457_v6, 1e-24 }
 0x1c1   : > { %2269 = vrsqrt.f32 %v1506_v8 }
 0x1c2   : > { %v1459_v37 = vpop.xlane.xlu1 %1458 }
 0x1c3   : > { %v1507_v50 = vmax.f32 %v1459_v37, 1e-24 }
 0x1c5   : > { %2271 = vrsqrt.f32 %v1507_v50 }
 0x1c6   : > { %v2266_v10 = vpop.eup %2265  ;;  %v1461_v16 = vpop.xlane.xlu0 %1460 }
 0x1c7   : > { %v1554_v14 = vmul.f32 %v2266_v10, %v2678_v57  ;;  %v1508_v18 = vmax.f32 %v1461_v16, 1e-24 }
 0x1c9   : > { %1579 = vst [vmem:[%s2829_s21] sm:$0xff] %v1554_v14  ;;  %2273 = vrsqrt.f32 %v1508_v18 }
 0x1ca   : > { %v2268_v29 = vpop.eup %2267  ;;  %v1463_v32 = vpop.xlane.xlu1 %1462 }
 0x1cb   : > { %v1555_v43 = vmul.f32 %v2268_v29, %v2685_v24  ;;  %v1509_v27 = vmax.f32 %v1463_v32, 1e-24 }
 0x1cd   : > { %1580 = vst [vmem:[%s2829_s21 + $0x8] sm:$0xff] %v1555_v43  ;;  %2275 = vrsqrt.f32 %v1509_v27 }
 0x1ce   : > { %v2270_v33 = vpop.eup %2269  ;;  %v1465_v53 = vpop.xlane.xlu0 %1464 }
 0x1cf   : > { %v1556_v36 = vmul.f32 %v2270_v33, %v2692_v17  ;;  %v1510_v22 = vmax.f32 %v1465_v53, 1e-24 }
 0x1d1   : > { %1581 = vst [vmem:[%s2829_s21 + $0x10] sm:$0xff] %v1556_v36  ;;  %2277 = vrsqrt.f32 %v1510_v22 }
 0x1d2   : > { %v2272_v57 = vpop.eup %2271  ;;  %v1467_v19 = vpop.xlane.xlu1 %1466 }
 0x1d3   : > { %v1557_v28 = vmul.f32 %v2272_v57, %v2699_v60  ;;  %v1511_v49 = vmax.f32 %v1467_v19, 1e-24 }
 0x1d5   : > { %1582 = vst [vmem:[%s2829_s21 + $0x18] sm:$0xff] %v1557_v28  ;;  %2279 = vrsqrt.f32 %v1511_v49 }
 0x1d6   : > { %v2274_v24 = vpop.eup %2273  ;;  %v1469_v40 = vpop.xlane.xlu0 %1468 }
 0x1d7   : > { %v1558_v38 = vmul.f32 %v2274_v24, %v2706_v11  ;;  %v1512_v20 = vmax.f32 %v1469_v40, 1e-24 }
 0x1d9   : > { %1583 = vst [vmem:[%s2829_s21 + $0x20] sm:$0xff] %v1558_v38  ;;  %2281 = vrsqrt.f32 %v1512_v20 }
 0x1da   : > { %v2276_v17 = vpop.eup %2275  ;;  %v1471_v45 = vpop.xlane.xlu1 %1470 }
 0x1db   : > { %v1559_v59 = vmul.f32 %v2276_v17, %v2713_v42  ;;  %v1513_v25 = vmax.f32 %v1471_v45, 1e-24 }
 0x1dd   : > { %1584 = vst [vmem:[%s2829_s21 + $0x28] sm:$0xff] %v1559_v59  ;;  %2283 = vrsqrt.f32 %v1513_v25 }
 0x1de   : > { %v2278_v60 = vpop.eup %2277  ;;  %v1473_v62 = vpop.xlane.xlu0 %1472 }
 0x1df   : > { %v1560_v55 = vmul.f32 %v2278_v60, %v2720_v3  ;;  %v1514_v54 = vmax.f32 %v1473_v62, 1e-24 }
 0x1e1   : > { %1585 = vst [vmem:[%s2829_s21 + $0x30] sm:$0xff] %v1560_v55  ;;  %2285 = vrsqrt.f32 %v1514_v54 }
 0x1e2   : > { %v2280_v11 = vpop.eup %2279  ;;  %v1475_v1 = vpop.xlane.xlu1 %1474 }
 0x1e3   : > { %v1561_v41 = vmul.f32 %v2280_v11, %v2727_v12  ;;  %v1515_v44 = vmax.f32 %v1475_v1, 1e-24 }
 0x1e5   : > { %1586 = vst [vmem:[%s2829_s21 + $0x38] sm:$0xff] %v1561_v41  ;;  %2287 = vrsqrt.f32 %v1515_v44 }
 0x1e6   : > { %v2282_v42 = vpop.eup %2281  ;;  %v1477_v58 = vpop.xlane.xlu0 %1476 }
 0x1e7   : > { %v1562_v61 = vmul.f32 %v2282_v42, %v2734_v34  ;;  %v1516_v5 = vmax.f32 %v1477_v58, 1e-24 }
 0x1e9   : > { %1587 = vst [vmem:[%s2829_s21 + $0x40] sm:$0xff] %v1562_v61  ;;  %2289 = vrsqrt.f32 %v1516_v5 }
 0x1ea   : > { %v2284_v3 = vpop.eup %2283  ;;  %v1479_v9 = vpop.xlane.xlu1 %1478 }
 0x1eb   : > { %v1563_v63 = vmul.f32 %v2284_v3, %v2741_v48  ;;  %v1517_v0 = vmax.f32 %v1479_v9, 1e-24 }
 0x1ed   : > { %1588 = vst [vmem:[%s2829_s21 + $0x48] sm:$0xff] %v1563_v63  ;;  %2291 = vrsqrt.f32 %v1517_v0 }
 0x1ee   : > { %v2286_v12 = vpop.eup %2285  ;;  %v1481_v7 = vpop.xlane.xlu0 %1480 }
 0x1ef   : > { %v1564_v4 = vmul.f32 %v2286_v12, %v2748_v26  ;;  %v1518_v6 = vmax.f32 %v1481_v7, 1e-24 }
 0x1f1   : > { %1589 = vst [vmem:[%s2829_s21 + $0x50] sm:$0xff] %v1564_v4  ;;  %2293 = vrsqrt.f32 %v1518_v6 }
 0x1f2   : > { %v2288_v34 = vpop.eup %2287  ;;  %v1483_v8 = vpop.xlane.xlu1 %1482 }
 0x1f3   : > { %v1565_v37 = vmul.f32 %v2288_v34, %v2755_v21  ;;  %v1519_v50 = vmax.f32 %v1483_v8, 1e-24 }
 0x1f5   : > { %1590 = vst [vmem:[%s2829_s21 + $0x58] sm:$0xff] %v1565_v37  ;;  %2295 = vrsqrt.f32 %v1519_v50 }
 0x1f6   : > { %v2290_v48 = vpop.eup %2289  ;;  %v1485_v10 = vpop.xlane.xlu0 %1484 }
 0x1f7   : > { %v1566_v16 = vmul.f32 %v2290_v48, %v2760_v56  ;;  %v1520_v14 = vmax.f32 %v1485_v10, 1e-24 }
 0x1f9   : > { %1591 = vst [vmem:[%s2829_s21 + $0x60] sm:$0xff] %v1566_v16  ;;  %2297 = vrsqrt.f32 %v1520_v14 }
 0x1fa   : > { %v2292_v26 = vpop.eup %2291  ;;  %v1487_v18 = vpop.xlane.xlu1 %1486 }
 0x1fb   : > { %v1567_v29 = vmul.f32 %v2292_v26, %v2766_v46  ;;  %v1521_v32 = vmax.f32 %v1487_v18, 1e-24 }
 0x1fd   : > { %1592 = vst [vmem:[%s2829_s21 + $0x68] sm:$0xff] %v1567_v29  ;;  %2299 = vrsqrt.f32 %v1521_v32 }
 0x1fe   : > { %v2294_v21 = vpop.eup %2293  ;;  %v1489_v43 = vpop.xlane.xlu0 %1488 }
 0x1ff   : > { %v1568_v27 = vmul.f32 %v2294_v21, %v2772_v23  ;;  %v1522_v33 = vmax.f32 %v1489_v43, 1e-24 }
 0x201   : > { %1593 = vst [vmem:[%s2829_s21 + $0x70] sm:$0xff] %v1568_v27  ;;  %2301 = vrsqrt.f32 %v1522_v33 }
 0x202   : > { %v2296_v56 = vpop.eup %2295  ;;  %v1491_v53 = vpop.xlane.xlu1 %1490 }
 0x203   : > { %v1569_v36 = vmul.f32 %v2296_v56, %v2776_v47  ;;  %v1523_v22 = vmax.f32 %v1491_v53, 1e-24 }
 0x205   : > { %1594 = vst [vmem:[%s2829_s21 + $0x78] sm:$0xff] %v1569_v36  ;;  %2303 = vrsqrt.f32 %v1523_v22 }
 0x206   : > { %v2298_v46 = vpop.eup %2297  ;;  %v1493_v57 = vpop.xlane.xlu0 %1492 }
 0x207   : > { %v1570_v19 = vmul.f32 %v2298_v46, %v2781_v13  ;;  %v1524_v28 = vmax.f32 %v1493_v57, 1e-24 }
 0x209   : > { %1595 = vst [vmem:[%s2829_s21 + $0x80] sm:$0xff] %v1570_v19  ;;  %2305 = vrsqrt.f32 %v1524_v28 }
 0x20a   : > { %v2300_v23 = vpop.eup %2299  ;;  %v1495_v49 = vpop.xlane.xlu1 %1494 }
 0x20b   : > { %v1571_v24 = vmul.f32 %v2300_v23, %v2786_v39  ;;  %v1525_v40 = vmax.f32 %v1495_v49, 1e-24 }
 0x20d   : > { %1596 = vst [vmem:[%s2829_s21 + $0x88] sm:$0xff] %v1571_v24  ;;  %2307 = vrsqrt.f32 %v1525_v40 }
 0x20e   : > { %v2302_v47 = vpop.eup %2301  ;;  %v1497_v38 = vpop.xlane.xlu0 %1496 }
 0x20f   : > { %v1572_v20 = vmul.f32 %v2302_v47, %v2791_v51  ;;  %v1526_v17 = vmax.f32 %v1497_v38, 1e-24 }
 0x211   : > { %1597 = vst [vmem:[%s2829_s21 + $0x90] sm:$0xff] %v1572_v20  ;;  %2309 = vrsqrt.f32 %v1526_v17 }
 0x212   : > { %v2304_v13 = vpop.eup %2303  ;;  %v1499_v45 = vpop.xlane.xlu1 %1498 }
 0x213   : > { %v1573_v59 = vmul.f32 %v2304_v13, %v2796_v2  ;;  %v1527_v25 = vmax.f32 %v1499_v45, 1e-24 }
 0x215   : > { %1598 = vst [vmem:[%s2829_s21 + $0x98] sm:$0xff] %v1573_v59  ;;  %2311 = vrsqrt.f32 %v1527_v25 }
 0x216   : > { %v2306_v39 = vpop.eup %2305 }
 0x217   : > { %v1574_v60 = vmul.f32 %v2306_v39, %v2801_v15  ;;  %v1503_v62 = vpop.xlane.xlu0 %1502 }
 0x218   : > { %v1528_v55 = vmax.f32 %v1503_v62, 1e-24 }
 0x219   : > { %1599 = vst [vmem:[%s2829_s21 + $0xa0] sm:$0xff] %v1574_v60 }
 0x21a   : > { %v2308_v51 = vpop.eup %2307  ;;  %2313 = vrsqrt.f32 %v1528_v55 }
 0x21b   : > { %v1575_v54 = vmul.f32 %v2308_v51, %v2806_v30 }
 0x21d   : > { %1600 = vst [vmem:[%s2829_s21 + $0xa8] sm:$0xff] %v1575_v54 }
 0x21e   : > { %v2310_v11 = vpop.eup %2309 }
 0x21f   : > { %v1576_v1 = vmul.f32 %v2310_v11, %v2811_v35 }
 0x221   : > { %1601 = vst [vmem:[%s2829_s21 + $0xb0] sm:$0xff] %v1576_v1 }
 0x222   : > { %v2312_v2 = vpop.eup %2311 }
 0x223   : > { %v1577_v41 = vmul.f32 %v2312_v2, %v2816_v52 }
 0x225   : > { %1602 = vst [vmem:[%s2829_s21 + $0xb8] sm:$0xff] %v1577_v41 }
 0x227   : > { %v2314_v44 = vpop.eup %2313 }
 0x228   : > { %v1578_v15 = vmul.f32 %v2314_v44, %v2821_v31 }
 0x22a   : > { %1603 = vst [vmem:[%s2829_s21 + $0xc0] sm:$0xf] %v1578_v15 }
 0x22b PF: > { %s13_s12 = sadd.s32 1, %s2321_s12  }
 0x22c   : > { %p10_p4 = scmp.ge.s32.totalorder %s13_s12, 4  }
 0x22e   :  { %12 = sbr.rel (!%p10_p4) target bundleno = 1 (0x1), region = 62 }

</bundles_post_ra>
